<compile_context>
chip_gen: v6e
topology: v6e:2x2x1
jax: 0.10.0
libtpu: 0.0.40
codegen_flags: <defaults>
</compile_context>

<pallas_src>
import functools
import math

import jax
import jax.numpy as jnp
import numpy as np
from jax import lax
from jax.experimental import pallas as pl
from jax.experimental.pallas import tpu as pltpu


def ray_som_kernel(means_ref, stds_ref, sd_ref, dens_ref,
                   loss_ref, nmeans_ref, nvars_ref,
                   *, som_sigma, n_valid_pts):
    f32 = jnp.float32
    means = means_ref[...].astype(f32)        # (TR, P)
    stds = stds_ref[...].astype(f32)          # (TR, P)
    sd = sd_ref[...].astype(f32)              # (TR, N)   points on lanes
    dens = dens_ref[...].astype(f32)          # (TR, N)

    TR, P = means.shape
    N = sd.shape[1]

    # ---- per-prototype constants: reciprocals hoisted off the big tensors ----
    vars_ = stds * stds                                         # (TR, P)
    inv_two_var = 1.0 / (2.0 * vars_)                           # (TR, P)
    inv_norm = 1.0 / (math.sqrt(2.0 * math.pi) * stds)          # (TR, P)
    dens_eps = dens + 1e-8                                      # (TR, N)

    # ---- SOM neighbour weights rel[b, c2, c1], stored as P columns ----------
    # rel_cols[c][b, r] == rel[b, r, c]  (rel is symmetric in (r, c)).
    neg_inv_two_sig2 = -1.0 / (2.0 * som_sigma * som_sigma)
    rel_cols = []
    for c in range(P):
        dm = means - means[:, c:c + 1]                          # (TR, P)
        rel_cols.append(jnp.exp(dm * dm * neg_inv_two_sig2))    # (TR, P)
    rel_sum = rel_cols[0]
    for c in range(1, P):
        rel_sum = rel_sum + rel_cols[c]
    inv_rel_sum = 1.0 / rel_sum                                 # (TR, P)

    # ---- p(z | c1): one (TR, N) slice per prototype (VPU + EUP exp) ---------
    pz = []
    for c in range(P):
        d = means[:, c:c + 1] - sd                              # (TR, N)
        g = jnp.exp(-(d * d) * inv_two_var[:, c:c + 1]) * inv_norm[:, c:c + 1]
        pz.append((g + 1e-5) * dens_eps + 1e-8)                 # (TR, N)

    # ---- p(z | c2) = sum_c1 p(c1|c2) p(z|c1): unrolled VPU FMAs + running
    #      max / first-argmax over prototypes (no (TR,P,N) temporary) ---------
    p_best = None
    best_idx = None
    for c2 in range(P):
        acc = rel_cols[0][:, c2:c2 + 1] * pz[0]
        for c1 in range(1, P):
            acc = acc + rel_cols[c1][:, c2:c2 + 1] * pz[c1]
        p2 = acc * inv_rel_sum[:, c2:c2 + 1] + P * 1e-8         # (TR, N)
        if c2 == 0:
            p_best = p2
            best_idx = jnp.zeros((TR, N), jnp.int32)
        else:
            take = p2 > p_best                                   # strict: first max wins
            p_best = jnp.where(take, p2, p_best)
            best_idx = jnp.where(take, c2, best_idx)

    inv_p_best = 1.0 / p_best                                    # (TR, N)

    # mask for lane-padded points (only emitted when the wrapper padded n_pts)
    if n_valid_pts < N:
        pt_mask = lax.broadcasted_iota(jnp.int32, (TR, N), 1) < n_valid_pts
    else:
        pt_mask = None

    # disjoint float masks of the best prototype, reused for every r
    eqf = [(best_idx == c).astype(f32) for c in range(P)]        # P x (TR, N)

    # ---- SOM mean / variance update, one prototype at a time (lane reduces) -
    col_ids = lax.broadcasted_iota(jnp.int32, (TR, P), 1)
    new_means = jnp.zeros((TR, P), f32)
    new_vars = jnp.zeros((TR, P), f32)
    for r in range(P):
        # rel_g[b, n] = rel[b, r, best_idx[b, n]]   (gather via disjoint masks)
        rel_g = eqf[0] * rel_cols[0][:, r:r + 1]
        for c in range(1, P):
            rel_g = rel_g + eqf[c] * rel_cols[c][:, r:r + 1]
        w = rel_g * pz[r] * inv_p_best + 1e-5                    # (TR, N)
        if pt_mask is not None:
            w = jnp.where(pt_mask, w, 0.0)
        inv_w_sum = 1.0 / jnp.sum(w, axis=1, keepdims=True)      # (TR, 1)
        nm = jnp.sum(w * sd, axis=1, keepdims=True) * inv_w_sum  # (TR, 1)
        dmn = sd - nm
        nv = jnp.sum(w * dmn * dmn, axis=1, keepdims=True) * inv_w_sum
        sel = col_ids == r
        new_means = jnp.where(sel, nm, new_means)
        new_vars = jnp.where(sel, nv, new_vars)

    # ---- mask + KL divergence loss (small (TR, P) math) ---------------------
    new_stds = jnp.sqrt(new_vars)
    mean_diffs = jnp.abs(means - new_means)
    var_diffs = jnp.abs(jnp.sqrt(vars_) - new_stds)
    pos = new_vars > 0.0
    mask = ((mean_diffs > 0.1) & pos & (var_diffs > 0.1)).astype(f32)

    s2 = jnp.maximum(new_stds, 1.5)                              # s2[s2 < 1.5] = 1.5
    kl = (jnp.log(s2 / stds + 1e-8)
          + (vars_ + (means - new_means) ** 2) / (2.0 * s2 * s2) - 0.5)

    loss_ref[...] = jnp.mean(kl * mask, axis=1, keepdims=True)   # (TR, 1)
    nmeans_ref[...] = new_means
    nvars_ref[...] = new_vars


def ray_som_forward(gauss_means, gauss_stds, sensor_distances, density,
                    som_sigma=2.0, tile_rays=256):
    """Forward pass of RaySOM.  Returns (loss_kl, new_means, new_vars)."""
    n_rays, n_protos = gauss_means.shape
    n_pts = sensor_distances.shape[1]

    def round_up(x, m):
        return ((x + m - 1) // m) * m

    # Ray tile: large (sweep 128-512) to amortize per-grid-step overhead, but
    # never larger than the (sublane-rounded) number of rays.  Live in-kernel
    # footprint is ~(P + ~10) * TR * Npad * 4B, i.e. a few MiB at TR=256, so it
    # fits comfortably on v5e/v6e (128 MiB VMEM) and v7x (64 MiB VMEM).
    tr = round_up(min(int(tile_rays), round_up(n_rays, 8)), 8)
    n_rays_p = round_up(n_rays, tr)
    # Points padded to a lane multiple; padded points are masked in-kernel.
    n_pts_p = round_up(n_pts, 128)

    means = gauss_means.astype(jnp.float32)
    stds = gauss_stds.astype(jnp.float32)
    sd = sensor_distances.astype(jnp.float32)
    dens = density.astype(jnp.float32)

    if n_rays_p != n_rays:
        pr = n_rays_p - n_rays
        means = jnp.pad(means, ((0, pr), (0, 0)), constant_values=1.0)
        stds = jnp.pad(stds, ((0, pr), (0, 0)), constant_values=1.0)
        sd = jnp.pad(sd, ((0, pr), (0, 0)))
        dens = jnp.pad(dens, ((0, pr), (0, 0)))
    if n_pts_p != n_pts:
        pp = n_pts_p - n_pts
        sd = jnp.pad(sd, ((0, 0), (0, pp)))
        dens = jnp.pad(dens, ((0, 0), (0, pp)))

    kernel = functools.partial(ray_som_kernel,
                               som_sigma=float(som_sigma),
                               n_valid_pts=int(n_pts))

    proto_spec = pl.BlockSpec((tr, n_protos), lambda i: (i, 0))
    pts_spec = pl.BlockSpec((tr, n_pts_p), lambda i: (i, 0))
    loss_spec = pl.BlockSpec((tr, 1), lambda i: (i, 0))

    loss, new_means, new_vars = pl.pallas_call(
        kernel,
        out_shape=(
            jax.ShapeDtypeStruct((n_rays_p, 1), jnp.float32),
            jax.ShapeDtypeStruct((n_rays_p, n_protos), jnp.float32),
            jax.ShapeDtypeStruct((n_rays_p, n_protos), jnp.float32),
        ),
        grid_spec=pltpu.PrefetchScalarGridSpec(
            num_scalar_prefetch=0,
            grid=(n_rays_p // tr,),
            in_specs=[proto_spec, proto_spec, pts_spec, pts_spec],
            out_specs=[loss_spec, proto_spec, proto_spec],
        ),
        compiler_params=pltpu.CompilerParams(
            dimension_semantics=("parallel",),   # megacore sharding on v7x when grid >= 2
            vmem_limit_bytes=32 * 1024 * 1024,
        ),
    )(means, stds, sd, dens)

    return loss[:n_rays, 0], new_means[:n_rays], new_vars[:n_rays]


def ray_som_ref(means, stds, sd, density, som_sigma):
    """Pure-JAX reference mirroring the PyTorch module."""
    n_rays, P = means.shape
    distances = jnp.abs(means[:, None, :] - sd[:, :, None])            # (R, N, P)
    diff = means[:, :, None] - means[:, None, :]
    rel = jnp.exp(-(diff ** 2) / (2.0 * som_sigma ** 2))               # (R, c2, c1)
    p_c1_given_c2 = rel / rel.sum(axis=2, keepdims=True)
    vars_ = stds ** 2
    p_z_c1 = (jnp.exp(-distances ** 2 / (2.0 * vars_[:, None, :]))
              / (math.sqrt(2.0 * math.pi) * stds[:, None, :]) + 1e-5)
    p_z_c1 = p_z_c1 * (density + 1e-8)[:, :, None] + 1e-8
    temp = p_z_c1[:, :, None, :] * p_c1_given_c2[:, None, :, :] + 1e-8
    p_z_c2 = temp.sum(-1)                                              # (R, N, c2)
    p_best = p_z_c2.max(axis=2)
    best = jnp.argmax(p_z_c2, axis=2)                                  # (R, N)
    new_means = jnp.zeros_like(means)
    new_vars = jnp.zeros_like(stds)
    for r in range(P):
        rel_w = jnp.take_along_axis(rel[:, r, :], best, axis=1)        # (R, N)
        w = rel_w * p_z_c1[:, :, r] / p_best + 1e-5
        nm = (w * sd).sum(axis=1) / w.sum(axis=1)
        nv = (w * (sd - nm[:, None]) ** 2).sum(axis=1) / w.sum(axis=1)
        new_means = new_means.at[:, r].set(nm)
        new_vars = new_vars.at[:, r].set(nv)
    mean_diffs = jnp.abs(means - new_means)
    var_diffs = jnp.abs(jnp.sqrt(vars_) - jnp.sqrt(new_vars))
    mask = ((mean_diffs > 0.1) & (new_vars > 0)
            & (var_diffs > 0.1) & (new_vars > 0)).astype(jnp.float32)
    s2 = jnp.maximum(jnp.sqrt(new_vars), 1.5)
    kl = jnp.log(s2 / stds + 1e-8) + (stds ** 2 + (means - new_means) ** 2) / (2 * s2 ** 2) - 0.5
    return (kl * mask).mean(axis=1), new_means, new_vars


if __name__ == "__main__":
    som_sigma = 2.0   # module hyper-parameter (deterministic, set in-script)

    n_rays, n_protos, n_pts = 16, 8, 128
    key = jax.random.PRNGKey(0)
    k1, k2, k3, k4 = jax.random.split(key, 4)

    gauss_means = jax.random.uniform(k1, (n_rays, n_protos), jnp.float32, 0.5, 10.0)
    gauss_stds = jax.random.uniform(k2, (n_rays, n_protos), jnp.float32, 0.5, 2.5)
    sensor_distances = jax.random.uniform(k3, (n_rays, n_pts), jnp.float32, 0.0, 10.0)
    density = jax.random.uniform(k4, (n_rays, n_pts), jnp.float32, 0.0, 1.0)

    loss, new_means, new_vars = ray_som_forward(
        gauss_means, gauss_stds, sensor_distances, density, som_sigma=som_sigma)
    jax.block_until_ready((loss, new_means, new_vars))

    loss_r, means_r, vars_r = ray_som_ref(
        gauss_means, gauss_stds, sensor_distances, density, som_sigma)
    np.testing.assert_allclose(np.asarray(new_means), np.asarray(means_r), rtol=1e-4, atol=1e-4)
    np.testing.assert_allclose(np.asarray(new_vars), np.asarray(vars_r), rtol=1e-4, atol=1e-4)
    np.testing.assert_allclose(np.asarray(loss), np.asarray(loss_r), rtol=1e-4, atol=1e-4)

    print("KERNEL_OK")
</pallas_src>

<mosaic_0001>
module attributes {stable_mosaic.version = 11 : i64} {
  func.func @ray_som_kernel(%arg0: i32, %arg1: memref<16x8xf32, #tpu.memory_space<vmem>>, %arg2: memref<16x8xf32, #tpu.memory_space<vmem>>, %arg3: memref<16x128xf32, #tpu.memory_space<vmem>>, %arg4: memref<16x128xf32, #tpu.memory_space<vmem>>, %arg5: memref<16x1xf32, #tpu.memory_space<vmem>>, %arg6: memref<16x8xf32, #tpu.memory_space<vmem>>, %arg7: memref<16x8xf32, #tpu.memory_space<vmem>>) attributes {dimension_semantics = [#tpu.dimension_semantics<parallel>], iteration_bounds = array<i64: 1>, scalar_prefetch = 0 : i64, scratch_operands = 0 : i64, tpu.core_type = #tpu.core_type<tc>, window_params = [{transform_indices = @transform_0, window_bounds = array<i64: 16, 8>}, {transform_indices = @transform_1, window_bounds = array<i64: 16, 8>}, {transform_indices = @transform_2, window_bounds = array<i64: 16, 128>}, {transform_indices = @transform_3, window_bounds = array<i64: 16, 128>}, {transform_indices = @transform_4, window_bounds = array<i64: 16, 1>}, {transform_indices = @transform_5, window_bounds = array<i64: 16, 8>}, {transform_indices = @transform_6, window_bounds = array<i64: 16, 8>}]} {
    %c0 = arith.constant 0 : index
    %c0_0 = arith.constant 0 : index
    %0 = vector.load %arg1[%c0, %c0_0] : memref<16x8xf32, #tpu.memory_space<vmem>>, vector<16x8xf32>
    %c0_1 = arith.constant 0 : index
    %c0_2 = arith.constant 0 : index
    %1 = vector.load %arg2[%c0_1, %c0_2] : memref<16x8xf32, #tpu.memory_space<vmem>>, vector<16x8xf32>
    %c0_3 = arith.constant 0 : index
    %c0_4 = arith.constant 0 : index
    %2 = vector.load %arg3[%c0_3, %c0_4] : memref<16x128xf32, #tpu.memory_space<vmem>>, vector<16x128xf32>
    %c0_5 = arith.constant 0 : index
    %c0_6 = arith.constant 0 : index
    %3 = vector.load %arg4[%c0_5, %c0_6] : memref<16x128xf32, #tpu.memory_space<vmem>>, vector<16x128xf32>
    %4 = arith.mulf %1, %1 : vector<16x8xf32>
    %cst = arith.constant 2.000000e+00 : f32
    %5 = vector.broadcast %cst : f32 to vector<16x8xf32>
    %6 = arith.mulf %5, %4 : vector<16x8xf32>
    %cst_7 = arith.constant 1.000000e+00 : f32
    %7 = vector.broadcast %cst_7 : f32 to vector<16x8xf32>
    %8 = arith.divf %7, %6 : vector<16x8xf32>
    %cst_8 = arith.constant 2.50662827 : f32
    %9 = vector.broadcast %cst_8 : f32 to vector<16x8xf32>
    %10 = arith.mulf %9, %1 : vector<16x8xf32>
    %cst_9 = arith.constant 1.000000e+00 : f32
    %11 = vector.broadcast %cst_9 : f32 to vector<16x8xf32>
    %12 = arith.divf %11, %10 : vector<16x8xf32>
    %cst_10 = arith.constant 9.99999993E-9 : f32
    %13 = vector.broadcast %cst_10 : f32 to vector<16x128xf32>
    %14 = arith.addf %3, %13 : vector<16x128xf32>
    %15 = vector.extract_strided_slice %0 {offsets = [0, 0], sizes = [16, 1], strides = [1, 1]} : vector<16x8xf32> to vector<16x1xf32>
    %16 = vector.broadcast %15 : vector<16x1xf32> to vector<16x8xf32>
    %17 = arith.subf %0, %16 : vector<16x8xf32>
    %18 = arith.mulf %17, %17 : vector<16x8xf32>
    %cst_11 = arith.constant -1.250000e-01 : f32
    %19 = vector.broadcast %cst_11 : f32 to vector<16x8xf32>
    %20 = arith.mulf %18, %19 : vector<16x8xf32>
    %21 = math.exp %20 : vector<16x8xf32>
    %22 = vector.extract_strided_slice %0 {offsets = [0, 1], sizes = [16, 1], strides = [1, 1]} : vector<16x8xf32> to vector<16x1xf32>
    %23 = vector.broadcast %22 : vector<16x1xf32> to vector<16x8xf32>
    %24 = arith.subf %0, %23 : vector<16x8xf32>
    %25 = arith.mulf %24, %24 : vector<16x8xf32>
    %cst_12 = arith.constant -1.250000e-01 : f32
    %26 = vector.broadcast %cst_12 : f32 to vector<16x8xf32>
    %27 = arith.mulf %25, %26 : vector<16x8xf32>
    %28 = math.exp %27 : vector<16x8xf32>
    %29 = vector.extract_strided_slice %0 {offsets = [0, 2], sizes = [16, 1], strides = [1, 1]} : vector<16x8xf32> to vector<16x1xf32>
    %30 = vector.broadcast %29 : vector<16x1xf32> to vector<16x8xf32>
    %31 = arith.subf %0, %30 : vector<16x8xf32>
    %32 = arith.mulf %31, %31 : vector<16x8xf32>
    %cst_13 = arith.constant -1.250000e-01 : f32
    %33 = vector.broadcast %cst_13 : f32 to vector<16x8xf32>
    %34 = arith.mulf %32, %33 : vector<16x8xf32>
    %35 = math.exp %34 : vector<16x8xf32>
    %36 = vector.extract_strided_slice %0 {offsets = [0, 3], sizes = [16, 1], strides = [1, 1]} : vector<16x8xf32> to vector<16x1xf32>
    %37 = vector.broadcast %36 : vector<16x1xf32> to vector<16x8xf32>
    %38 = arith.subf %0, %37 : vector<16x8xf32>
    %39 = arith.mulf %38, %38 : vector<16x8xf32>
    %cst_14 = arith.constant -1.250000e-01 : f32
    %40 = vector.broadcast %cst_14 : f32 to vector<16x8xf32>
    %41 = arith.mulf %39, %40 : vector<16x8xf32>
    %42 = math.exp %41 : vector<16x8xf32>
    %43 = vector.extract_strided_slice %0 {offsets = [0, 4], sizes = [16, 1], strides = [1, 1]} : vector<16x8xf32> to vector<16x1xf32>
    %44 = vector.broadcast %43 : vector<16x1xf32> to vector<16x8xf32>
    %45 = arith.subf %0, %44 : vector<16x8xf32>
    %46 = arith.mulf %45, %45 : vector<16x8xf32>
    %cst_15 = arith.constant -1.250000e-01 : f32
    %47 = vector.broadcast %cst_15 : f32 to vector<16x8xf32>
    %48 = arith.mulf %46, %47 : vector<16x8xf32>
    %49 = math.exp %48 : vector<16x8xf32>
    %50 = vector.extract_strided_slice %0 {offsets = [0, 5], sizes = [16, 1], strides = [1, 1]} : vector<16x8xf32> to vector<16x1xf32>
    %51 = vector.broadcast %50 : vector<16x1xf32> to vector<16x8xf32>
    %52 = arith.subf %0, %51 : vector<16x8xf32>
    %53 = arith.mulf %52, %52 : vector<16x8xf32>
    %cst_16 = arith.constant -1.250000e-01 : f32
    %54 = vector.broadcast %cst_16 : f32 to vector<16x8xf32>
    %55 = arith.mulf %53, %54 : vector<16x8xf32>
    %56 = math.exp %55 : vector<16x8xf32>
    %57 = vector.extract_strided_slice %0 {offsets = [0, 6], sizes = [16, 1], strides = [1, 1]} : vector<16x8xf32> to vector<16x1xf32>
    %58 = vector.broadcast %57 : vector<16x1xf32> to vector<16x8xf32>
    %59 = arith.subf %0, %58 : vector<16x8xf32>
    %60 = arith.mulf %59, %59 : vector<16x8xf32>
    %cst_17 = arith.constant -1.250000e-01 : f32
    %61 = vector.broadcast %cst_17 : f32 to vector<16x8xf32>
    %62 = arith.mulf %60, %61 : vector<16x8xf32>
    %63 = math.exp %62 : vector<16x8xf32>
    %64 = vector.extract_strided_slice %0 {offsets = [0, 7], sizes = [16, 1], strides = [1, 1]} : vector<16x8xf32> to vector<16x1xf32>
    %65 = vector.broadcast %64 : vector<16x1xf32> to vector<16x8xf32>
    %66 = arith.subf %0, %65 : vector<16x8xf32>
    %67 = arith.mulf %66, %66 : vector<16x8xf32>
    %cst_18 = arith.constant -1.250000e-01 : f32
    %68 = vector.broadcast %cst_18 : f32 to vector<16x8xf32>
    %69 = arith.mulf %67, %68 : vector<16x8xf32>
    %70 = math.exp %69 : vector<16x8xf32>
    %71 = arith.addf %21, %28 : vector<16x8xf32>
    %72 = arith.addf %71, %35 : vector<16x8xf32>
    %73 = arith.addf %72, %42 : vector<16x8xf32>
    %74 = arith.addf %73, %49 : vector<16x8xf32>
    %75 = arith.addf %74, %56 : vector<16x8xf32>
    %76 = arith.addf %75, %63 : vector<16x8xf32>
    %77 = arith.addf %76, %70 : vector<16x8xf32>
    %cst_19 = arith.constant 1.000000e+00 : f32
    %78 = vector.broadcast %cst_19 : f32 to vector<16x8xf32>
    %79 = arith.divf %78, %77 : vector<16x8xf32>
    %80 = vector.extract_strided_slice %0 {offsets = [0, 0], sizes = [16, 1], strides = [1, 1]} : vector<16x8xf32> to vector<16x1xf32>
    %81 = vector.broadcast %80 : vector<16x1xf32> to vector<16x128xf32>
    %82 = arith.subf %81, %2 : vector<16x128xf32>
    %83 = arith.mulf %82, %82 : vector<16x128xf32>
    %cst_20 = arith.constant 0.000000e+00 : f32
    %84 = vector.broadcast %cst_20 : f32 to vector<16x128xf32>
    %85 = arith.subf %84, %83 : vector<16x128xf32>
    %86 = vector.extract_strided_slice %8 {offsets = [0, 0], sizes = [16, 1], strides = [1, 1]} : vector<16x8xf32> to vector<16x1xf32>
    %87 = vector.broadcast %86 : vector<16x1xf32> to vector<16x128xf32>
    %88 = arith.mulf %85, %87 : vector<16x128xf32>
    %89 = math.exp %88 : vector<16x128xf32>
    %90 = vector.extract_strided_slice %12 {offsets = [0, 0], sizes = [16, 1], strides = [1, 1]} : vector<16x8xf32> to vector<16x1xf32>
    %91 = vector.broadcast %90 : vector<16x1xf32> to vector<16x128xf32>
    %92 = arith.mulf %89, %91 : vector<16x128xf32>
    %cst_21 = arith.constant 9.99999974E-6 : f32
    %93 = vector.broadcast %cst_21 : f32 to vector<16x128xf32>
    %94 = arith.addf %92, %93 : vector<16x128xf32>
    %95 = arith.mulf %94, %14 : vector<16x128xf32>
    %cst_22 = arith.constant 9.99999993E-9 : f32
    %96 = vector.broadcast %cst_22 : f32 to vector<16x128xf32>
    %97 = arith.addf %95, %96 : vector<16x128xf32>
    %98 = vector.extract_strided_slice %0 {offsets = [0, 1], sizes = [16, 1], strides = [1, 1]} : vector<16x8xf32> to vector<16x1xf32>
    %99 = vector.broadcast %98 : vector<16x1xf32> to vector<16x128xf32>
    %100 = arith.subf %99, %2 : vector<16x128xf32>
    %101 = arith.mulf %100, %100 : vector<16x128xf32>
    %cst_23 = arith.constant 0.000000e+00 : f32
    %102 = vector.broadcast %cst_23 : f32 to vector<16x128xf32>
    %103 = arith.subf %102, %101 : vector<16x128xf32>
    %104 = vector.extract_strided_slice %8 {offsets = [0, 1], sizes = [16, 1], strides = [1, 1]} : vector<16x8xf32> to vector<16x1xf32>
    %105 = vector.broadcast %104 : vector<16x1xf32> to vector<16x128xf32>
    %106 = arith.mulf %103, %105 : vector<16x128xf32>
    %107 = math.exp %106 : vector<16x128xf32>
    %108 = vector.extract_strided_slice %12 {offsets = [0, 1], sizes = [16, 1], strides = [1, 1]} : vector<16x8xf32> to vector<16x1xf32>
    %109 = vector.broadcast %108 : vector<16x1xf32> to vector<16x128xf32>
    %110 = arith.mulf %107, %109 : vector<16x128xf32>
    %cst_24 = arith.constant 9.99999974E-6 : f32
    %111 = vector.broadcast %cst_24 : f32 to vector<16x128xf32>
    %112 = arith.addf %110, %111 : vector<16x128xf32>
    %113 = arith.mulf %112, %14 : vector<16x128xf32>
    %cst_25 = arith.constant 9.99999993E-9 : f32
    %114 = vector.broadcast %cst_25 : f32 to vector<16x128xf32>
    %115 = arith.addf %113, %114 : vector<16x128xf32>
    %116 = vector.extract_strided_slice %0 {offsets = [0, 2], sizes = [16, 1], strides = [1, 1]} : vector<16x8xf32> to vector<16x1xf32>
    %117 = vector.broadcast %116 : vector<16x1xf32> to vector<16x128xf32>
    %118 = arith.subf %117, %2 : vector<16x128xf32>
    %119 = arith.mulf %118, %118 : vector<16x128xf32>
    %cst_26 = arith.constant 0.000000e+00 : f32
    %120 = vector.broadcast %cst_26 : f32 to vector<16x128xf32>
    %121 = arith.subf %120, %119 : vector<16x128xf32>
    %122 = vector.extract_strided_slice %8 {offsets = [0, 2], sizes = [16, 1], strides = [1, 1]} : vector<16x8xf32> to vector<16x1xf32>
    %123 = vector.broadcast %122 : vector<16x1xf32> to vector<16x128xf32>
    %124 = arith.mulf %121, %123 : vector<16x128xf32>
    %125 = math.exp %124 : vector<16x128xf32>
    %126 = vector.extract_strided_slice %12 {offsets = [0, 2], sizes = [16, 1], strides = [1, 1]} : vector<16x8xf32> to vector<16x1xf32>
    %127 = vector.broadcast %126 : vector<16x1xf32> to vector<16x128xf32>
    %128 = arith.mulf %125, %127 : vector<16x128xf32>
    %cst_27 = arith.constant 9.99999974E-6 : f32
    %129 = vector.broadcast %cst_27 : f32 to vector<16x128xf32>
    %130 = arith.addf %128, %129 : vector<16x128xf32>
    %131 = arith.mulf %130, %14 : vector<16x128xf32>
    %cst_28 = arith.constant 9.99999993E-9 : f32
    %132 = vector.broadcast %cst_28 : f32 to vector<16x128xf32>
    %133 = arith.addf %131, %132 : vector<16x128xf32>
    %134 = vector.extract_strided_slice %0 {offsets = [0, 3], sizes = [16, 1], strides = [1, 1]} : vector<16x8xf32> to vector<16x1xf32>
    %135 = vector.broadcast %134 : vector<16x1xf32> to vector<16x128xf32>
    %136 = arith.subf %135, %2 : vector<16x128xf32>
    %137 = arith.mulf %136, %136 : vector<16x128xf32>
    %cst_29 = arith.constant 0.000000e+00 : f32
    %138 = vector.broadcast %cst_29 : f32 to vector<16x128xf32>
    %139 = arith.subf %138, %137 : vector<16x128xf32>
    %140 = vector.extract_strided_slice %8 {offsets = [0, 3], sizes = [16, 1], strides = [1, 1]} : vector<16x8xf32> to vector<16x1xf32>
    %141 = vector.broadcast %140 : vector<16x1xf32> to vector<16x128xf32>
    %142 = arith.mulf %139, %141 : vector<16x128xf32>
    %143 = math.exp %142 : vector<16x128xf32>
    %144 = vector.extract_strided_slice %12 {offsets = [0, 3], sizes = [16, 1], strides = [1, 1]} : vector<16x8xf32> to vector<16x1xf32>
    %145 = vector.broadcast %144 : vector<16x1xf32> to vector<16x128xf32>
    %146 = arith.mulf %143, %145 : vector<16x128xf32>
    %cst_30 = arith.constant 9.99999974E-6 : f32
    %147 = vector.broadcast %cst_30 : f32 to vector<16x128xf32>
    %148 = arith.addf %146, %147 : vector<16x128xf32>
    %149 = arith.mulf %148, %14 : vector<16x128xf32>
    %cst_31 = arith.constant 9.99999993E-9 : f32
    %150 = vector.broadcast %cst_31 : f32 to vector<16x128xf32>
    %151 = arith.addf %149, %150 : vector<16x128xf32>
    %152 = vector.extract_strided_slice %0 {offsets = [0, 4], sizes = [16, 1], strides = [1, 1]} : vector<16x8xf32> to vector<16x1xf32>
    %153 = vector.broadcast %152 : vector<16x1xf32> to vector<16x128xf32>
    %154 = arith.subf %153, %2 : vector<16x128xf32>
    %155 = arith.mulf %154, %154 : vector<16x128xf32>
    %cst_32 = arith.constant 0.000000e+00 : f32
    %156 = vector.broadcast %cst_32 : f32 to vector<16x128xf32>
    %157 = arith.subf %156, %155 : vector<16x128xf32>
    %158 = vector.extract_strided_slice %8 {offsets = [0, 4], sizes = [16, 1], strides = [1, 1]} : vector<16x8xf32> to vector<16x1xf32>
    %159 = vector.broadcast %158 : vector<16x1xf32> to vector<16x128xf32>
    %160 = arith.mulf %157, %159 : vector<16x128xf32>
    %161 = math.exp %160 : vector<16x128xf32>
    %162 = vector.extract_strided_slice %12 {offsets = [0, 4], sizes = [16, 1], strides = [1, 1]} : vector<16x8xf32> to vector<16x1xf32>
    %163 = vector.broadcast %162 : vector<16x1xf32> to vector<16x128xf32>
    %164 = arith.mulf %161, %163 : vector<16x128xf32>
    %cst_33 = arith.constant 9.99999974E-6 : f32
    %165 = vector.broadcast %cst_33 : f32 to vector<16x128xf32>
    %166 = arith.addf %164, %165 : vector<16x128xf32>
    %167 = arith.mulf %166, %14 : vector<16x128xf32>
    %cst_34 = arith.constant 9.99999993E-9 : f32
    %168 = vector.broadcast %cst_34 : f32 to vector<16x128xf32>
    %169 = arith.addf %167, %168 : vector<16x128xf32>
    %170 = vector.extract_strided_slice %0 {offsets = [0, 5], sizes = [16, 1], strides = [1, 1]} : vector<16x8xf32> to vector<16x1xf32>
    %171 = vector.broadcast %170 : vector<16x1xf32> to vector<16x128xf32>
    %172 = arith.subf %171, %2 : vector<16x128xf32>
    %173 = arith.mulf %172, %172 : vector<16x128xf32>
    %cst_35 = arith.constant 0.000000e+00 : f32
    %174 = vector.broadcast %cst_35 : f32 to vector<16x128xf32>
    %175 = arith.subf %174, %173 : vector<16x128xf32>
    %176 = vector.extract_strided_slice %8 {offsets = [0, 5], sizes = [16, 1], strides = [1, 1]} : vector<16x8xf32> to vector<16x1xf32>
    %177 = vector.broadcast %176 : vector<16x1xf32> to vector<16x128xf32>
    %178 = arith.mulf %175, %177 : vector<16x128xf32>
    %179 = math.exp %178 : vector<16x128xf32>
    %180 = vector.extract_strided_slice %12 {offsets = [0, 5], sizes = [16, 1], strides = [1, 1]} : vector<16x8xf32> to vector<16x1xf32>
    %181 = vector.broadcast %180 : vector<16x1xf32> to vector<16x128xf32>
    %182 = arith.mulf %179, %181 : vector<16x128xf32>
    %cst_36 = arith.constant 9.99999974E-6 : f32
    %183 = vector.broadcast %cst_36 : f32 to vector<16x128xf32>
    %184 = arith.addf %182, %183 : vector<16x128xf32>
    %185 = arith.mulf %184, %14 : vector<16x128xf32>
    %cst_37 = arith.constant 9.99999993E-9 : f32
    %186 = vector.broadcast %cst_37 : f32 to vector<16x128xf32>
    %187 = arith.addf %185, %186 : vector<16x128xf32>
    %188 = vector.extract_strided_slice %0 {offsets = [0, 6], sizes = [16, 1], strides = [1, 1]} : vector<16x8xf32> to vector<16x1xf32>
    %189 = vector.broadcast %188 : vector<16x1xf32> to vector<16x128xf32>
    %190 = arith.subf %189, %2 : vector<16x128xf32>
    %191 = arith.mulf %190, %190 : vector<16x128xf32>
    %cst_38 = arith.constant 0.000000e+00 : f32
    %192 = vector.broadcast %cst_38 : f32 to vector<16x128xf32>
    %193 = arith.subf %192, %191 : vector<16x128xf32>
    %194 = vector.extract_strided_slice %8 {offsets = [0, 6], sizes = [16, 1], strides = [1, 1]} : vector<16x8xf32> to vector<16x1xf32>
    %195 = vector.broadcast %194 : vector<16x1xf32> to vector<16x128xf32>
    %196 = arith.mulf %193, %195 : vector<16x128xf32>
    %197 = math.exp %196 : vector<16x128xf32>
    %198 = vector.extract_strided_slice %12 {offsets = [0, 6], sizes = [16, 1], strides = [1, 1]} : vector<16x8xf32> to vector<16x1xf32>
    %199 = vector.broadcast %198 : vector<16x1xf32> to vector<16x128xf32>
    %200 = arith.mulf %197, %199 : vector<16x128xf32>
    %cst_39 = arith.constant 9.99999974E-6 : f32
    %201 = vector.broadcast %cst_39 : f32 to vector<16x128xf32>
    %202 = arith.addf %200, %201 : vector<16x128xf32>
    %203 = arith.mulf %202, %14 : vector<16x128xf32>
    %cst_40 = arith.constant 9.99999993E-9 : f32
    %204 = vector.broadcast %cst_40 : f32 to vector<16x128xf32>
    %205 = arith.addf %203, %204 : vector<16x128xf32>
    %206 = vector.extract_strided_slice %0 {offsets = [0, 7], sizes = [16, 1], strides = [1, 1]} : vector<16x8xf32> to vector<16x1xf32>
    %207 = vector.broadcast %206 : vector<16x1xf32> to vector<16x128xf32>
    %208 = arith.subf %207, %2 : vector<16x128xf32>
    %209 = arith.mulf %208, %208 : vector<16x128xf32>
    %cst_41 = arith.constant 0.000000e+00 : f32
    %210 = vector.broadcast %cst_41 : f32 to vector<16x128xf32>
    %211 = arith.subf %210, %209 : vector<16x128xf32>
    %212 = vector.extract_strided_slice %8 {offsets = [0, 7], sizes = [16, 1], strides = [1, 1]} : vector<16x8xf32> to vector<16x1xf32>
    %213 = vector.broadcast %212 : vector<16x1xf32> to vector<16x128xf32>
    %214 = arith.mulf %211, %213 : vector<16x128xf32>
    %215 = math.exp %214 : vector<16x128xf32>
    %216 = vector.extract_strided_slice %12 {offsets = [0, 7], sizes = [16, 1], strides = [1, 1]} : vector<16x8xf32> to vector<16x1xf32>
    %217 = vector.broadcast %216 : vector<16x1xf32> to vector<16x128xf32>
    %218 = arith.mulf %215, %217 : vector<16x128xf32>
    %cst_42 = arith.constant 9.99999974E-6 : f32
    %219 = vector.broadcast %cst_42 : f32 to vector<16x128xf32>
    %220 = arith.addf %218, %219 : vector<16x128xf32>
    %221 = arith.mulf %220, %14 : vector<16x128xf32>
    %cst_43 = arith.constant 9.99999993E-9 : f32
    %222 = vector.broadcast %cst_43 : f32 to vector<16x128xf32>
    %223 = arith.addf %221, %222 : vector<16x128xf32>
    %224 = vector.extract_strided_slice %21 {offsets = [0, 0], sizes = [16, 1], strides = [1, 1]} : vector<16x8xf32> to vector<16x1xf32>
    %225 = vector.broadcast %224 : vector<16x1xf32> to vector<16x128xf32>
    %226 = arith.mulf %225, %97 : vector<16x128xf32>
    %227 = vector.extract_strided_slice %28 {offsets = [0, 0], sizes = [16, 1], strides = [1, 1]} : vector<16x8xf32> to vector<16x1xf32>
    %228 = vector.broadcast %227 : vector<16x1xf32> to vector<16x128xf32>
    %229 = arith.mulf %228, %115 : vector<16x128xf32>
    %230 = arith.addf %226, %229 : vector<16x128xf32>
    %231 = vector.extract_strided_slice %35 {offsets = [0, 0], sizes = [16, 1], strides = [1, 1]} : vector<16x8xf32> to vector<16x1xf32>
    %232 = vector.broadcast %231 : vector<16x1xf32> to vector<16x128xf32>
    %233 = arith.mulf %232, %133 : vector<16x128xf32>
    %234 = arith.addf %230, %233 : vector<16x128xf32>
    %235 = vector.extract_strided_slice %42 {offsets = [0, 0], sizes = [16, 1], strides = [1, 1]} : vector<16x8xf32> to vector<16x1xf32>
    %236 = vector.broadcast %235 : vector<16x1xf32> to vector<16x128xf32>
    %237 = arith.mulf %236, %151 : vector<16x128xf32>
    %238 = arith.addf %234, %237 : vector<16x128xf32>
    %239 = vector.extract_strided_slice %49 {offsets = [0, 0], sizes = [16, 1], strides = [1, 1]} : vector<16x8xf32> to vector<16x1xf32>
    %240 = vector.broadcast %239 : vector<16x1xf32> to vector<16x128xf32>
    %241 = arith.mulf %240, %169 : vector<16x128xf32>
    %242 = arith.addf %238, %241 : vector<16x128xf32>
    %243 = vector.extract_strided_slice %56 {offsets = [0, 0], sizes = [16, 1], strides = [1, 1]} : vector<16x8xf32> to vector<16x1xf32>
    %244 = vector.broadcast %243 : vector<16x1xf32> to vector<16x128xf32>
    %245 = arith.mulf %244, %187 : vector<16x128xf32>
    %246 = arith.addf %242, %245 : vector<16x128xf32>
    %247 = vector.extract_strided_slice %63 {offsets = [0, 0], sizes = [16, 1], strides = [1, 1]} : vector<16x8xf32> to vector<16x1xf32>
    %248 = vector.broadcast %247 : vector<16x1xf32> to vector<16x128xf32>
    %249 = arith.mulf %248, %205 : vector<16x128xf32>
    %250 = arith.addf %246, %249 : vector<16x128xf32>
    %251 = vector.extract_strided_slice %70 {offsets = [0, 0], sizes = [16, 1], strides = [1, 1]} : vector<16x8xf32> to vector<16x1xf32>
    %252 = vector.broadcast %251 : vector<16x1xf32> to vector<16x128xf32>
    %253 = arith.mulf %252, %223 : vector<16x128xf32>
    %254 = arith.addf %250, %253 : vector<16x128xf32>
    %255 = vector.extract_strided_slice %79 {offsets = [0, 0], sizes = [16, 1], strides = [1, 1]} : vector<16x8xf32> to vector<16x1xf32>
    %256 = vector.broadcast %255 : vector<16x1xf32> to vector<16x128xf32>
    %257 = arith.mulf %254, %256 : vector<16x128xf32>
    %cst_44 = arith.constant 7.99999995E-8 : f32
    %258 = vector.broadcast %cst_44 : f32 to vector<16x128xf32>
    %259 = arith.addf %257, %258 : vector<16x128xf32>
    %c0_i32 = arith.constant 0 : i32
    %260 = vector.broadcast %c0_i32 : i32 to vector<16x128xi32>
    %261 = vector.extract_strided_slice %21 {offsets = [0, 1], sizes = [16, 1], strides = [1, 1]} : vector<16x8xf32> to vector<16x1xf32>
    %262 = vector.broadcast %261 : vector<16x1xf32> to vector<16x128xf32>
    %263 = arith.mulf %262, %97 : vector<16x128xf32>
    %264 = vector.extract_strided_slice %28 {offsets = [0, 1], sizes = [16, 1], strides = [1, 1]} : vector<16x8xf32> to vector<16x1xf32>
    %265 = vector.broadcast %264 : vector<16x1xf32> to vector<16x128xf32>
    %266 = arith.mulf %265, %115 : vector<16x128xf32>
    %267 = arith.addf %263, %266 : vector<16x128xf32>
    %268 = vector.extract_strided_slice %35 {offsets = [0, 1], sizes = [16, 1], strides = [1, 1]} : vector<16x8xf32> to vector<16x1xf32>
    %269 = vector.broadcast %268 : vector<16x1xf32> to vector<16x128xf32>
    %270 = arith.mulf %269, %133 : vector<16x128xf32>
    %271 = arith.addf %267, %270 : vector<16x128xf32>
    %272 = vector.extract_strided_slice %42 {offsets = [0, 1], sizes = [16, 1], strides = [1, 1]} : vector<16x8xf32> to vector<16x1xf32>
    %273 = vector.broadcast %272 : vector<16x1xf32> to vector<16x128xf32>
    %274 = arith.mulf %273, %151 : vector<16x128xf32>
    %275 = arith.addf %271, %274 : vector<16x128xf32>
    %276 = vector.extract_strided_slice %49 {offsets = [0, 1], sizes = [16, 1], strides = [1, 1]} : vector<16x8xf32> to vector<16x1xf32>
    %277 = vector.broadcast %276 : vector<16x1xf32> to vector<16x128xf32>
    %278 = arith.mulf %277, %169 : vector<16x128xf32>
    %279 = arith.addf %275, %278 : vector<16x128xf32>
    %280 = vector.extract_strided_slice %56 {offsets = [0, 1], sizes = [16, 1], strides = [1, 1]} : vector<16x8xf32> to vector<16x1xf32>
    %281 = vector.broadcast %280 : vector<16x1xf32> to vector<16x128xf32>
    %282 = arith.mulf %281, %187 : vector<16x128xf32>
    %283 = arith.addf %279, %282 : vector<16x128xf32>
    %284 = vector.extract_strided_slice %63 {offsets = [0, 1], sizes = [16, 1], strides = [1, 1]} : vector<16x8xf32> to vector<16x1xf32>
    %285 = vector.broadcast %284 : vector<16x1xf32> to vector<16x128xf32>
    %286 = arith.mulf %285, %205 : vector<16x128xf32>
    %287 = arith.addf %283, %286 : vector<16x128xf32>
    %288 = vector.extract_strided_slice %70 {offsets = [0, 1], sizes = [16, 1], strides = [1, 1]} : vector<16x8xf32> to vector<16x1xf32>
    %289 = vector.broadcast %288 : vector<16x1xf32> to vector<16x128xf32>
    %290 = arith.mulf %289, %223 : vector<16x128xf32>
    %291 = arith.addf %287, %290 : vector<16x128xf32>
    %292 = vector.extract_strided_slice %79 {offsets = [0, 1], sizes = [16, 1], strides = [1, 1]} : vector<16x8xf32> to vector<16x1xf32>
    %293 = vector.broadcast %292 : vector<16x1xf32> to vector<16x128xf32>
    %294 = arith.mulf %291, %293 : vector<16x128xf32>
    %cst_45 = arith.constant 7.99999995E-8 : f32
    %295 = vector.broadcast %cst_45 : f32 to vector<16x128xf32>
    %296 = arith.addf %294, %295 : vector<16x128xf32>
    %297 = arith.cmpf ogt, %296, %259 : vector<16x128xf32>
    %298 = arith.select %297, %296, %259 : vector<16x128xi1>, vector<16x128xf32>
    %c1_i32 = arith.constant 1 : i32
    %299 = vector.broadcast %c1_i32 : i32 to vector<16x128xi32>
    %300 = arith.select %297, %299, %260 : vector<16x128xi1>, vector<16x128xi32>
    %301 = vector.extract_strided_slice %21 {offsets = [0, 2], sizes = [16, 1], strides = [1, 1]} : vector<16x8xf32> to vector<16x1xf32>
    %302 = vector.broadcast %301 : vector<16x1xf32> to vector<16x128xf32>
    %303 = arith.mulf %302, %97 : vector<16x128xf32>
    %304 = vector.extract_strided_slice %28 {offsets = [0, 2], sizes = [16, 1], strides = [1, 1]} : vector<16x8xf32> to vector<16x1xf32>
    %305 = vector.broadcast %304 : vector<16x1xf32> to vector<16x128xf32>
    %306 = arith.mulf %305, %115 : vector<16x128xf32>
    %307 = arith.addf %303, %306 : vector<16x128xf32>
    %308 = vector.extract_strided_slice %35 {offsets = [0, 2], sizes = [16, 1], strides = [1, 1]} : vector<16x8xf32> to vector<16x1xf32>
    %309 = vector.broadcast %308 : vector<16x1xf32> to vector<16x128xf32>
    %310 = arith.mulf %309, %133 : vector<16x128xf32>
    %311 = arith.addf %307, %310 : vector<16x128xf32>
    %312 = vector.extract_strided_slice %42 {offsets = [0, 2], sizes = [16, 1], strides = [1, 1]} : vector<16x8xf32> to vector<16x1xf32>
    %313 = vector.broadcast %312 : vector<16x1xf32> to vector<16x128xf32>
    %314 = arith.mulf %313, %151 : vector<16x128xf32>
    %315 = arith.addf %311, %314 : vector<16x128xf32>
    %316 = vector.extract_strided_slice %49 {offsets = [0, 2], sizes = [16, 1], strides = [1, 1]} : vector<16x8xf32> to vector<16x1xf32>
    %317 = vector.broadcast %316 : vector<16x1xf32> to vector<16x128xf32>
    %318 = arith.mulf %317, %169 : vector<16x128xf32>
    %319 = arith.addf %315, %318 : vector<16x128xf32>
    %320 = vector.extract_strided_slice %56 {offsets = [0, 2], sizes = [16, 1], strides = [1, 1]} : vector<16x8xf32> to vector<16x1xf32>
    %321 = vector.broadcast %320 : vector<16x1xf32> to vector<16x128xf32>
    %322 = arith.mulf %321, %187 : vector<16x128xf32>
    %323 = arith.addf %319, %322 : vector<16x128xf32>
    %324 = vector.extract_strided_slice %63 {offsets = [0, 2], sizes = [16, 1], strides = [1, 1]} : vector<16x8xf32> to vector<16x1xf32>
    %325 = vector.broadcast %324 : vector<16x1xf32> to vector<16x128xf32>
    %326 = arith.mulf %325, %205 : vector<16x128xf32>
    %327 = arith.addf %323, %326 : vector<16x128xf32>
    %328 = vector.extract_strided_slice %70 {offsets = [0, 2], sizes = [16, 1], strides = [1, 1]} : vector<16x8xf32> to vector<16x1xf32>
    %329 = vector.broadcast %328 : vector<16x1xf32> to vector<16x128xf32>
    %330 = arith.mulf %329, %223 : vector<16x128xf32>
    %331 = arith.addf %327, %330 : vector<16x128xf32>
    %332 = vector.extract_strided_slice %79 {offsets = [0, 2], sizes = [16, 1], strides = [1, 1]} : vector<16x8xf32> to vector<16x1xf32>
    %333 = vector.broadcast %332 : vector<16x1xf32> to vector<16x128xf32>
    %334 = arith.mulf %331, %333 : vector<16x128xf32>
    %cst_46 = arith.constant 7.99999995E-8 : f32
    %335 = vector.broadcast %cst_46 : f32 to vector<16x128xf32>
    %336 = arith.addf %334, %335 : vector<16x128xf32>
    %337 = arith.cmpf ogt, %336, %298 : vector<16x128xf32>
    %338 = arith.select %337, %336, %298 : vector<16x128xi1>, vector<16x128xf32>
    %c2_i32 = arith.constant 2 : i32
    %339 = vector.broadcast %c2_i32 : i32 to vector<16x128xi32>
    %340 = arith.select %337, %339, %300 : vector<16x128xi1>, vector<16x128xi32>
    %341 = vector.extract_strided_slice %21 {offsets = [0, 3], sizes = [16, 1], strides = [1, 1]} : vector<16x8xf32> to vector<16x1xf32>
    %342 = vector.broadcast %341 : vector<16x1xf32> to vector<16x128xf32>
    %343 = arith.mulf %342, %97 : vector<16x128xf32>
    %344 = vector.extract_strided_slice %28 {offsets = [0, 3], sizes = [16, 1], strides = [1, 1]} : vector<16x8xf32> to vector<16x1xf32>
    %345 = vector.broadcast %344 : vector<16x1xf32> to vector<16x128xf32>
    %346 = arith.mulf %345, %115 : vector<16x128xf32>
    %347 = arith.addf %343, %346 : vector<16x128xf32>
    %348 = vector.extract_strided_slice %35 {offsets = [0, 3], sizes = [16, 1], strides = [1, 1]} : vector<16x8xf32> to vector<16x1xf32>
    %349 = vector.broadcast %348 : vector<16x1xf32> to vector<16x128xf32>
    %350 = arith.mulf %349, %133 : vector<16x128xf32>
    %351 = arith.addf %347, %350 : vector<16x128xf32>
    %352 = vector.extract_strided_slice %42 {offsets = [0, 3], sizes = [16, 1], strides = [1, 1]} : vector<16x8xf32> to vector<16x1xf32>
    %353 = vector.broadcast %352 : vector<16x1xf32> to vector<16x128xf32>
    %354 = arith.mulf %353, %151 : vector<16x128xf32>
    %355 = arith.addf %351, %354 : vector<16x128xf32>
    %356 = vector.extract_strided_slice %49 {offsets = [0, 3], sizes = [16, 1], strides = [1, 1]} : vector<16x8xf32> to vector<16x1xf32>
    %357 = vector.broadcast %356 : vector<16x1xf32> to vector<16x128xf32>
    %358 = arith.mulf %357, %169 : vector<16x128xf32>
    %359 = arith.addf %355, %358 : vector<16x128xf32>
    %360 = vector.extract_strided_slice %56 {offsets = [0, 3], sizes = [16, 1], strides = [1, 1]} : vector<16x8xf32> to vector<16x1xf32>
    %361 = vector.broadcast %360 : vector<16x1xf32> to vector<16x128xf32>
    %362 = arith.mulf %361, %187 : vector<16x128xf32>
    %363 = arith.addf %359, %362 : vector<16x128xf32>
    %364 = vector.extract_strided_slice %63 {offsets = [0, 3], sizes = [16, 1], strides = [1, 1]} : vector<16x8xf32> to vector<16x1xf32>
    %365 = vector.broadcast %364 : vector<16x1xf32> to vector<16x128xf32>
    %366 = arith.mulf %365, %205 : vector<16x128xf32>
    %367 = arith.addf %363, %366 : vector<16x128xf32>
    %368 = vector.extract_strided_slice %70 {offsets = [0, 3], sizes = [16, 1], strides = [1, 1]} : vector<16x8xf32> to vector<16x1xf32>
    %369 = vector.broadcast %368 : vector<16x1xf32> to vector<16x128xf32>
    %370 = arith.mulf %369, %223 : vector<16x128xf32>
    %371 = arith.addf %367, %370 : vector<16x128xf32>
    %372 = vector.extract_strided_slice %79 {offsets = [0, 3], sizes = [16, 1], strides = [1, 1]} : vector<16x8xf32> to vector<16x1xf32>
    %373 = vector.broadcast %372 : vector<16x1xf32> to vector<16x128xf32>
    %374 = arith.mulf %371, %373 : vector<16x128xf32>
    %cst_47 = arith.constant 7.99999995E-8 : f32
    %375 = vector.broadcast %cst_47 : f32 to vector<16x128xf32>
    %376 = arith.addf %374, %375 : vector<16x128xf32>
    %377 = arith.cmpf ogt, %376, %338 : vector<16x128xf32>
    %378 = arith.select %377, %376, %338 : vector<16x128xi1>, vector<16x128xf32>
    %c3_i32 = arith.constant 3 : i32
    %379 = vector.broadcast %c3_i32 : i32 to vector<16x128xi32>
    %380 = arith.select %377, %379, %340 : vector<16x128xi1>, vector<16x128xi32>
    %381 = vector.extract_strided_slice %21 {offsets = [0, 4], sizes = [16, 1], strides = [1, 1]} : vector<16x8xf32> to vector<16x1xf32>
    %382 = vector.broadcast %381 : vector<16x1xf32> to vector<16x128xf32>
    %383 = arith.mulf %382, %97 : vector<16x128xf32>
    %384 = vector.extract_strided_slice %28 {offsets = [0, 4], sizes = [16, 1], strides = [1, 1]} : vector<16x8xf32> to vector<16x1xf32>
    %385 = vector.broadcast %384 : vector<16x1xf32> to vector<16x128xf32>
    %386 = arith.mulf %385, %115 : vector<16x128xf32>
    %387 = arith.addf %383, %386 : vector<16x128xf32>
    %388 = vector.extract_strided_slice %35 {offsets = [0, 4], sizes = [16, 1], strides = [1, 1]} : vector<16x8xf32> to vector<16x1xf32>
    %389 = vector.broadcast %388 : vector<16x1xf32> to vector<16x128xf32>
    %390 = arith.mulf %389, %133 : vector<16x128xf32>
    %391 = arith.addf %387, %390 : vector<16x128xf32>
    %392 = vector.extract_strided_slice %42 {offsets = [0, 4], sizes = [16, 1], strides = [1, 1]} : vector<16x8xf32> to vector<16x1xf32>
    %393 = vector.broadcast %392 : vector<16x1xf32> to vector<16x128xf32>
    %394 = arith.mulf %393, %151 : vector<16x128xf32>
    %395 = arith.addf %391, %394 : vector<16x128xf32>
    %396 = vector.extract_strided_slice %49 {offsets = [0, 4], sizes = [16, 1], strides = [1, 1]} : vector<16x8xf32> to vector<16x1xf32>
    %397 = vector.broadcast %396 : vector<16x1xf32> to vector<16x128xf32>
    %398 = arith.mulf %397, %169 : vector<16x128xf32>
    %399 = arith.addf %395, %398 : vector<16x128xf32>
    %400 = vector.extract_strided_slice %56 {offsets = [0, 4], sizes = [16, 1], strides = [1, 1]} : vector<16x8xf32> to vector<16x1xf32>
    %401 = vector.broadcast %400 : vector<16x1xf32> to vector<16x128xf32>
    %402 = arith.mulf %401, %187 : vector<16x128xf32>
    %403 = arith.addf %399, %402 : vector<16x128xf32>
    %404 = vector.extract_strided_slice %63 {offsets = [0, 4], sizes = [16, 1], strides = [1, 1]} : vector<16x8xf32> to vector<16x1xf32>
    %405 = vector.broadcast %404 : vector<16x1xf32> to vector<16x128xf32>
    %406 = arith.mulf %405, %205 : vector<16x128xf32>
    %407 = arith.addf %403, %406 : vector<16x128xf32>
    %408 = vector.extract_strided_slice %70 {offsets = [0, 4], sizes = [16, 1], strides = [1, 1]} : vector<16x8xf32> to vector<16x1xf32>
    %409 = vector.broadcast %408 : vector<16x1xf32> to vector<16x128xf32>
    %410 = arith.mulf %409, %223 : vector<16x128xf32>
    %411 = arith.addf %407, %410 : vector<16x128xf32>
    %412 = vector.extract_strided_slice %79 {offsets = [0, 4], sizes = [16, 1], strides = [1, 1]} : vector<16x8xf32> to vector<16x1xf32>
    %413 = vector.broadcast %412 : vector<16x1xf32> to vector<16x128xf32>
    %414 = arith.mulf %411, %413 : vector<16x128xf32>
    %cst_48 = arith.constant 7.99999995E-8 : f32
    %415 = vector.broadcast %cst_48 : f32 to vector<16x128xf32>
    %416 = arith.addf %414, %415 : vector<16x128xf32>
    %417 = arith.cmpf ogt, %416, %378 : vector<16x128xf32>
    %418 = arith.select %417, %416, %378 : vector<16x128xi1>, vector<16x128xf32>
    %c4_i32 = arith.constant 4 : i32
    %419 = vector.broadcast %c4_i32 : i32 to vector<16x128xi32>
    %420 = arith.select %417, %419, %380 : vector<16x128xi1>, vector<16x128xi32>
    %421 = vector.extract_strided_slice %21 {offsets = [0, 5], sizes = [16, 1], strides = [1, 1]} : vector<16x8xf32> to vector<16x1xf32>
    %422 = vector.broadcast %421 : vector<16x1xf32> to vector<16x128xf32>
    %423 = arith.mulf %422, %97 : vector<16x128xf32>
    %424 = vector.extract_strided_slice %28 {offsets = [0, 5], sizes = [16, 1], strides = [1, 1]} : vector<16x8xf32> to vector<16x1xf32>
    %425 = vector.broadcast %424 : vector<16x1xf32> to vector<16x128xf32>
    %426 = arith.mulf %425, %115 : vector<16x128xf32>
    %427 = arith.addf %423, %426 : vector<16x128xf32>
    %428 = vector.extract_strided_slice %35 {offsets = [0, 5], sizes = [16, 1], strides = [1, 1]} : vector<16x8xf32> to vector<16x1xf32>
    %429 = vector.broadcast %428 : vector<16x1xf32> to vector<16x128xf32>
    %430 = arith.mulf %429, %133 : vector<16x128xf32>
    %431 = arith.addf %427, %430 : vector<16x128xf32>
    %432 = vector.extract_strided_slice %42 {offsets = [0, 5], sizes = [16, 1], strides = [1, 1]} : vector<16x8xf32> to vector<16x1xf32>
    %433 = vector.broadcast %432 : vector<16x1xf32> to vector<16x128xf32>
    %434 = arith.mulf %433, %151 : vector<16x128xf32>
    %435 = arith.addf %431, %434 : vector<16x128xf32>
    %436 = vector.extract_strided_slice %49 {offsets = [0, 5], sizes = [16, 1], strides = [1, 1]} : vector<16x8xf32> to vector<16x1xf32>
    %437 = vector.broadcast %436 : vector<16x1xf32> to vector<16x128xf32>
    %438 = arith.mulf %437, %169 : vector<16x128xf32>
    %439 = arith.addf %435, %438 : vector<16x128xf32>
    %440 = vector.extract_strided_slice %56 {offsets = [0, 5], sizes = [16, 1], strides = [1, 1]} : vector<16x8xf32> to vector<16x1xf32>
    %441 = vector.broadcast %440 : vector<16x1xf32> to vector<16x128xf32>
    %442 = arith.mulf %441, %187 : vector<16x128xf32>
    %443 = arith.addf %439, %442 : vector<16x128xf32>
    %444 = vector.extract_strided_slice %63 {offsets = [0, 5], sizes = [16, 1], strides = [1, 1]} : vector<16x8xf32> to vector<16x1xf32>
    %445 = vector.broadcast %444 : vector<16x1xf32> to vector<16x128xf32>
    %446 = arith.mulf %445, %205 : vector<16x128xf32>
    %447 = arith.addf %443, %446 : vector<16x128xf32>
    %448 = vector.extract_strided_slice %70 {offsets = [0, 5], sizes = [16, 1], strides = [1, 1]} : vector<16x8xf32> to vector<16x1xf32>
    %449 = vector.broadcast %448 : vector<16x1xf32> to vector<16x128xf32>
    %450 = arith.mulf %449, %223 : vector<16x128xf32>
    %451 = arith.addf %447, %450 : vector<16x128xf32>
    %452 = vector.extract_strided_slice %79 {offsets = [0, 5], sizes = [16, 1], strides = [1, 1]} : vector<16x8xf32> to vector<16x1xf32>
    %453 = vector.broadcast %452 : vector<16x1xf32> to vector<16x128xf32>
    %454 = arith.mulf %451, %453 : vector<16x128xf32>
    %cst_49 = arith.constant 7.99999995E-8 : f32
    %455 = vector.broadcast %cst_49 : f32 to vector<16x128xf32>
    %456 = arith.addf %454, %455 : vector<16x128xf32>
    %457 = arith.cmpf ogt, %456, %418 : vector<16x128xf32>
    %458 = arith.select %457, %456, %418 : vector<16x128xi1>, vector<16x128xf32>
    %c5_i32 = arith.constant 5 : i32
    %459 = vector.broadcast %c5_i32 : i32 to vector<16x128xi32>
    %460 = arith.select %457, %459, %420 : vector<16x128xi1>, vector<16x128xi32>
    %461 = vector.extract_strided_slice %21 {offsets = [0, 6], sizes = [16, 1], strides = [1, 1]} : vector<16x8xf32> to vector<16x1xf32>
    %462 = vector.broadcast %461 : vector<16x1xf32> to vector<16x128xf32>
    %463 = arith.mulf %462, %97 : vector<16x128xf32>
    %464 = vector.extract_strided_slice %28 {offsets = [0, 6], sizes = [16, 1], strides = [1, 1]} : vector<16x8xf32> to vector<16x1xf32>
    %465 = vector.broadcast %464 : vector<16x1xf32> to vector<16x128xf32>
    %466 = arith.mulf %465, %115 : vector<16x128xf32>
    %467 = arith.addf %463, %466 : vector<16x128xf32>
    %468 = vector.extract_strided_slice %35 {offsets = [0, 6], sizes = [16, 1], strides = [1, 1]} : vector<16x8xf32> to vector<16x1xf32>
    %469 = vector.broadcast %468 : vector<16x1xf32> to vector<16x128xf32>
    %470 = arith.mulf %469, %133 : vector<16x128xf32>
    %471 = arith.addf %467, %470 : vector<16x128xf32>
    %472 = vector.extract_strided_slice %42 {offsets = [0, 6], sizes = [16, 1], strides = [1, 1]} : vector<16x8xf32> to vector<16x1xf32>
    %473 = vector.broadcast %472 : vector<16x1xf32> to vector<16x128xf32>
    %474 = arith.mulf %473, %151 : vector<16x128xf32>
    %475 = arith.addf %471, %474 : vector<16x128xf32>
    %476 = vector.extract_strided_slice %49 {offsets = [0, 6], sizes = [16, 1], strides = [1, 1]} : vector<16x8xf32> to vector<16x1xf32>
    %477 = vector.broadcast %476 : vector<16x1xf32> to vector<16x128xf32>
    %478 = arith.mulf %477, %169 : vector<16x128xf32>
    %479 = arith.addf %475, %478 : vector<16x128xf32>
    %480 = vector.extract_strided_slice %56 {offsets = [0, 6], sizes = [16, 1], strides = [1, 1]} : vector<16x8xf32> to vector<16x1xf32>
    %481 = vector.broadcast %480 : vector<16x1xf32> to vector<16x128xf32>
    %482 = arith.mulf %481, %187 : vector<16x128xf32>
    %483 = arith.addf %479, %482 : vector<16x128xf32>
    %484 = vector.extract_strided_slice %63 {offsets = [0, 6], sizes = [16, 1], strides = [1, 1]} : vector<16x8xf32> to vector<16x1xf32>
    %485 = vector.broadcast %484 : vector<16x1xf32> to vector<16x128xf32>
    %486 = arith.mulf %485, %205 : vector<16x128xf32>
    %487 = arith.addf %483, %486 : vector<16x128xf32>
    %488 = vector.extract_strided_slice %70 {offsets = [0, 6], sizes = [16, 1], strides = [1, 1]} : vector<16x8xf32> to vector<16x1xf32>
    %489 = vector.broadcast %488 : vector<16x1xf32> to vector<16x128xf32>
    %490 = arith.mulf %489, %223 : vector<16x128xf32>
    %491 = arith.addf %487, %490 : vector<16x128xf32>
    %492 = vector.extract_strided_slice %79 {offsets = [0, 6], sizes = [16, 1], strides = [1, 1]} : vector<16x8xf32> to vector<16x1xf32>
    %493 = vector.broadcast %492 : vector<16x1xf32> to vector<16x128xf32>
    %494 = arith.mulf %491, %493 : vector<16x128xf32>
    %cst_50 = arith.constant 7.99999995E-8 : f32
    %495 = vector.broadcast %cst_50 : f32 to vector<16x128xf32>
    %496 = arith.addf %494, %495 : vector<16x128xf32>
    %497 = arith.cmpf ogt, %496, %458 : vector<16x128xf32>
    %498 = arith.select %497, %496, %458 : vector<16x128xi1>, vector<16x128xf32>
    %c6_i32 = arith.constant 6 : i32
    %499 = vector.broadcast %c6_i32 : i32 to vector<16x128xi32>
    %500 = arith.select %497, %499, %460 : vector<16x128xi1>, vector<16x128xi32>
    %501 = vector.extract_strided_slice %21 {offsets = [0, 7], sizes = [16, 1], strides = [1, 1]} : vector<16x8xf32> to vector<16x1xf32>
    %502 = vector.broadcast %501 : vector<16x1xf32> to vector<16x128xf32>
    %503 = arith.mulf %502, %97 : vector<16x128xf32>
    %504 = vector.extract_strided_slice %28 {offsets = [0, 7], sizes = [16, 1], strides = [1, 1]} : vector<16x8xf32> to vector<16x1xf32>
    %505 = vector.broadcast %504 : vector<16x1xf32> to vector<16x128xf32>
    %506 = arith.mulf %505, %115 : vector<16x128xf32>
    %507 = arith.addf %503, %506 : vector<16x128xf32>
    %508 = vector.extract_strided_slice %35 {offsets = [0, 7], sizes = [16, 1], strides = [1, 1]} : vector<16x8xf32> to vector<16x1xf32>
    %509 = vector.broadcast %508 : vector<16x1xf32> to vector<16x128xf32>
    %510 = arith.mulf %509, %133 : vector<16x128xf32>
    %511 = arith.addf %507, %510 : vector<16x128xf32>
    %512 = vector.extract_strided_slice %42 {offsets = [0, 7], sizes = [16, 1], strides = [1, 1]} : vector<16x8xf32> to vector<16x1xf32>
    %513 = vector.broadcast %512 : vector<16x1xf32> to vector<16x128xf32>
    %514 = arith.mulf %513, %151 : vector<16x128xf32>
    %515 = arith.addf %511, %514 : vector<16x128xf32>
    %516 = vector.extract_strided_slice %49 {offsets = [0, 7], sizes = [16, 1], strides = [1, 1]} : vector<16x8xf32> to vector<16x1xf32>
    %517 = vector.broadcast %516 : vector<16x1xf32> to vector<16x128xf32>
    %518 = arith.mulf %517, %169 : vector<16x128xf32>
    %519 = arith.addf %515, %518 : vector<16x128xf32>
    %520 = vector.extract_strided_slice %56 {offsets = [0, 7], sizes = [16, 1], strides = [1, 1]} : vector<16x8xf32> to vector<16x1xf32>
    %521 = vector.broadcast %520 : vector<16x1xf32> to vector<16x128xf32>
    %522 = arith.mulf %521, %187 : vector<16x128xf32>
    %523 = arith.addf %519, %522 : vector<16x128xf32>
    %524 = vector.extract_strided_slice %63 {offsets = [0, 7], sizes = [16, 1], strides = [1, 1]} : vector<16x8xf32> to vector<16x1xf32>
    %525 = vector.broadcast %524 : vector<16x1xf32> to vector<16x128xf32>
    %526 = arith.mulf %525, %205 : vector<16x128xf32>
    %527 = arith.addf %523, %526 : vector<16x128xf32>
    %528 = vector.extract_strided_slice %70 {offsets = [0, 7], sizes = [16, 1], strides = [1, 1]} : vector<16x8xf32> to vector<16x1xf32>
    %529 = vector.broadcast %528 : vector<16x1xf32> to vector<16x128xf32>
    %530 = arith.mulf %529, %223 : vector<16x128xf32>
    %531 = arith.addf %527, %530 : vector<16x128xf32>
    %532 = vector.extract_strided_slice %79 {offsets = [0, 7], sizes = [16, 1], strides = [1, 1]} : vector<16x8xf32> to vector<16x1xf32>
    %533 = vector.broadcast %532 : vector<16x1xf32> to vector<16x128xf32>
    %534 = arith.mulf %531, %533 : vector<16x128xf32>
    %cst_51 = arith.constant 7.99999995E-8 : f32
    %535 = vector.broadcast %cst_51 : f32 to vector<16x128xf32>
    %536 = arith.addf %534, %535 : vector<16x128xf32>
    %537 = arith.cmpf ogt, %536, %498 : vector<16x128xf32>
    %538 = arith.select %537, %536, %498 : vector<16x128xi1>, vector<16x128xf32>
    %c7_i32 = arith.constant 7 : i32
    %539 = vector.broadcast %c7_i32 : i32 to vector<16x128xi32>
    %540 = arith.select %537, %539, %500 : vector<16x128xi1>, vector<16x128xi32>
    %cst_52 = arith.constant 1.000000e+00 : f32
    %541 = vector.broadcast %cst_52 : f32 to vector<16x128xf32>
    %542 = arith.divf %541, %538 : vector<16x128xf32>
    %c0_i32_53 = arith.constant 0 : i32
    %543 = vector.broadcast %c0_i32_53 : i32 to vector<16x128xi32>
    %544 = arith.cmpi eq, %540, %543 : vector<16x128xi32>
    %545 = arith.extui %544 : vector<16x128xi1> to vector<16x128xi32>
    %546 = arith.sitofp %545 : vector<16x128xi32> to vector<16x128xf32>
    %c1_i32_54 = arith.constant 1 : i32
    %547 = vector.broadcast %c1_i32_54 : i32 to vector<16x128xi32>
    %548 = arith.cmpi eq, %540, %547 : vector<16x128xi32>
    %549 = arith.extui %548 : vector<16x128xi1> to vector<16x128xi32>
    %550 = arith.sitofp %549 : vector<16x128xi32> to vector<16x128xf32>
    %c2_i32_55 = arith.constant 2 : i32
    %551 = vector.broadcast %c2_i32_55 : i32 to vector<16x128xi32>
    %552 = arith.cmpi eq, %540, %551 : vector<16x128xi32>
    %553 = arith.extui %552 : vector<16x128xi1> to vector<16x128xi32>
    %554 = arith.sitofp %553 : vector<16x128xi32> to vector<16x128xf32>
    %c3_i32_56 = arith.constant 3 : i32
    %555 = vector.broadcast %c3_i32_56 : i32 to vector<16x128xi32>
    %556 = arith.cmpi eq, %540, %555 : vector<16x128xi32>
    %557 = arith.extui %556 : vector<16x128xi1> to vector<16x128xi32>
    %558 = arith.sitofp %557 : vector<16x128xi32> to vector<16x128xf32>
    %c4_i32_57 = arith.constant 4 : i32
    %559 = vector.broadcast %c4_i32_57 : i32 to vector<16x128xi32>
    %560 = arith.cmpi eq, %540, %559 : vector<16x128xi32>
    %561 = arith.extui %560 : vector<16x128xi1> to vector<16x128xi32>
    %562 = arith.sitofp %561 : vector<16x128xi32> to vector<16x128xf32>
    %c5_i32_58 = arith.constant 5 : i32
    %563 = vector.broadcast %c5_i32_58 : i32 to vector<16x128xi32>
    %564 = arith.cmpi eq, %540, %563 : vector<16x128xi32>
    %565 = arith.extui %564 : vector<16x128xi1> to vector<16x128xi32>
    %566 = arith.sitofp %565 : vector<16x128xi32> to vector<16x128xf32>
    %c6_i32_59 = arith.constant 6 : i32
    %567 = vector.broadcast %c6_i32_59 : i32 to vector<16x128xi32>
    %568 = arith.cmpi eq, %540, %567 : vector<16x128xi32>
    %569 = arith.extui %568 : vector<16x128xi1> to vector<16x128xi32>
    %570 = arith.sitofp %569 : vector<16x128xi32> to vector<16x128xf32>
    %c7_i32_60 = arith.constant 7 : i32
    %571 = vector.broadcast %c7_i32_60 : i32 to vector<16x128xi32>
    %572 = arith.cmpi eq, %540, %571 : vector<16x128xi32>
    %573 = arith.extui %572 : vector<16x128xi1> to vector<16x128xi32>
    %574 = arith.sitofp %573 : vector<16x128xi32> to vector<16x128xf32>
    %575 = tpu.iota {dimensions = array<i32: 1>} : vector<16x8xi32>
    %cst_61 = arith.constant 0.000000e+00 : f32
    %576 = vector.broadcast %cst_61 : f32 to vector<16x8xf32>
    %cst_62 = arith.constant 0.000000e+00 : f32
    %577 = vector.broadcast %cst_62 : f32 to vector<16x8xf32>
    %578 = vector.extract_strided_slice %21 {offsets = [0, 0], sizes = [16, 1], strides = [1, 1]} : vector<16x8xf32> to vector<16x1xf32>
    %579 = vector.broadcast %578 : vector<16x1xf32> to vector<16x128xf32>
    %580 = arith.mulf %546, %579 : vector<16x128xf32>
    %581 = vector.extract_strided_slice %28 {offsets = [0, 0], sizes = [16, 1], strides = [1, 1]} : vector<16x8xf32> to vector<16x1xf32>
    %582 = vector.broadcast %581 : vector<16x1xf32> to vector<16x128xf32>
    %583 = arith.mulf %550, %582 : vector<16x128xf32>
    %584 = arith.addf %580, %583 : vector<16x128xf32>
    %585 = vector.extract_strided_slice %35 {offsets = [0, 0], sizes = [16, 1], strides = [1, 1]} : vector<16x8xf32> to vector<16x1xf32>
    %586 = vector.broadcast %585 : vector<16x1xf32> to vector<16x128xf32>
    %587 = arith.mulf %554, %586 : vector<16x128xf32>
    %588 = arith.addf %584, %587 : vector<16x128xf32>
    %589 = vector.extract_strided_slice %42 {offsets = [0, 0], sizes = [16, 1], strides = [1, 1]} : vector<16x8xf32> to vector<16x1xf32>
    %590 = vector.broadcast %589 : vector<16x1xf32> to vector<16x128xf32>
    %591 = arith.mulf %558, %590 : vector<16x128xf32>
    %592 = arith.addf %588, %591 : vector<16x128xf32>
    %593 = vector.extract_strided_slice %49 {offsets = [0, 0], sizes = [16, 1], strides = [1, 1]} : vector<16x8xf32> to vector<16x1xf32>
    %594 = vector.broadcast %593 : vector<16x1xf32> to vector<16x128xf32>
    %595 = arith.mulf %562, %594 : vector<16x128xf32>
    %596 = arith.addf %592, %595 : vector<16x128xf32>
    %597 = vector.extract_strided_slice %56 {offsets = [0, 0], sizes = [16, 1], strides = [1, 1]} : vector<16x8xf32> to vector<16x1xf32>
    %598 = vector.broadcast %597 : vector<16x1xf32> to vector<16x128xf32>
    %599 = arith.mulf %566, %598 : vector<16x128xf32>
    %600 = arith.addf %596, %599 : vector<16x128xf32>
    %601 = vector.extract_strided_slice %63 {offsets = [0, 0], sizes = [16, 1], strides = [1, 1]} : vector<16x8xf32> to vector<16x1xf32>
    %602 = vector.broadcast %601 : vector<16x1xf32> to vector<16x128xf32>
    %603 = arith.mulf %570, %602 : vector<16x128xf32>
    %604 = arith.addf %600, %603 : vector<16x128xf32>
    %605 = vector.extract_strided_slice %70 {offsets = [0, 0], sizes = [16, 1], strides = [1, 1]} : vector<16x8xf32> to vector<16x1xf32>
    %606 = vector.broadcast %605 : vector<16x1xf32> to vector<16x128xf32>
    %607 = arith.mulf %574, %606 : vector<16x128xf32>
    %608 = arith.addf %604, %607 : vector<16x128xf32>
    %609 = arith.mulf %608, %97 : vector<16x128xf32>
    %610 = arith.mulf %609, %542 : vector<16x128xf32>
    %cst_63 = arith.constant 9.99999974E-6 : f32
    %611 = vector.broadcast %cst_63 : f32 to vector<16x128xf32>
    %612 = arith.addf %610, %611 : vector<16x128xf32>
    %cst_64 = arith.constant dense<0.000000e+00> : vector<16xf32>
    %613 = vector.multi_reduction <add>, %612, %cst_64 [1] : vector<16x128xf32> to vector<16xf32>
    %614 = vector.shape_cast %613 : vector<16xf32> to vector<16x1xf32>
    %cst_65 = arith.constant 1.000000e+00 : f32
    %615 = vector.broadcast %cst_65 : f32 to vector<16x1xf32>
    %616 = arith.divf %615, %614 : vector<16x1xf32>
    %617 = arith.mulf %612, %2 : vector<16x128xf32>
    %cst_66 = arith.constant dense<0.000000e+00> : vector<16xf32>
    %618 = vector.multi_reduction <add>, %617, %cst_66 [1] : vector<16x128xf32> to vector<16xf32>
    %619 = vector.shape_cast %618 : vector<16xf32> to vector<16x1xf32>
    %620 = arith.mulf %619, %616 : vector<16x1xf32>
    %621 = vector.broadcast %620 : vector<16x1xf32> to vector<16x128xf32>
    %622 = arith.subf %2, %621 : vector<16x128xf32>
    %623 = arith.mulf %612, %622 : vector<16x128xf32>
    %624 = arith.mulf %623, %622 : vector<16x128xf32>
    %cst_67 = arith.constant dense<0.000000e+00> : vector<16xf32>
    %625 = vector.multi_reduction <add>, %624, %cst_67 [1] : vector<16x128xf32> to vector<16xf32>
    %626 = vector.shape_cast %625 : vector<16xf32> to vector<16x1xf32>
    %627 = arith.mulf %626, %616 : vector<16x1xf32>
    %c0_i32_68 = arith.constant 0 : i32
    %628 = vector.broadcast %c0_i32_68 : i32 to vector<16x8xi32>
    %629 = arith.cmpi eq, %575, %628 : vector<16x8xi32>
    %630 = vector.shape_cast %620 : vector<16x1xf32> to vector<16x1xf32>
    %631 = vector.broadcast %630 : vector<16x1xf32> to vector<16x8xf32>
    %632 = arith.select %629, %631, %576 : vector<16x8xi1>, vector<16x8xf32>
    %633 = vector.shape_cast %627 : vector<16x1xf32> to vector<16x1xf32>
    %634 = vector.broadcast %633 : vector<16x1xf32> to vector<16x8xf32>
    %635 = arith.select %629, %634, %577 : vector<16x8xi1>, vector<16x8xf32>
    %636 = vector.extract_strided_slice %21 {offsets = [0, 1], sizes = [16, 1], strides = [1, 1]} : vector<16x8xf32> to vector<16x1xf32>
    %637 = vector.broadcast %636 : vector<16x1xf32> to vector<16x128xf32>
    %638 = arith.mulf %546, %637 : vector<16x128xf32>
    %639 = vector.extract_strided_slice %28 {offsets = [0, 1], sizes = [16, 1], strides = [1, 1]} : vector<16x8xf32> to vector<16x1xf32>
    %640 = vector.broadcast %639 : vector<16x1xf32> to vector<16x128xf32>
    %641 = arith.mulf %550, %640 : vector<16x128xf32>
    %642 = arith.addf %638, %641 : vector<16x128xf32>
    %643 = vector.extract_strided_slice %35 {offsets = [0, 1], sizes = [16, 1], strides = [1, 1]} : vector<16x8xf32> to vector<16x1xf32>
    %644 = vector.broadcast %643 : vector<16x1xf32> to vector<16x128xf32>
    %645 = arith.mulf %554, %644 : vector<16x128xf32>
    %646 = arith.addf %642, %645 : vector<16x128xf32>
    %647 = vector.extract_strided_slice %42 {offsets = [0, 1], sizes = [16, 1], strides = [1, 1]} : vector<16x8xf32> to vector<16x1xf32>
    %648 = vector.broadcast %647 : vector<16x1xf32> to vector<16x128xf32>
    %649 = arith.mulf %558, %648 : vector<16x128xf32>
    %650 = arith.addf %646, %649 : vector<16x128xf32>
    %651 = vector.extract_strided_slice %49 {offsets = [0, 1], sizes = [16, 1], strides = [1, 1]} : vector<16x8xf32> to vector<16x1xf32>
    %652 = vector.broadcast %651 : vector<16x1xf32> to vector<16x128xf32>
    %653 = arith.mulf %562, %652 : vector<16x128xf32>
    %654 = arith.addf %650, %653 : vector<16x128xf32>
    %655 = vector.extract_strided_slice %56 {offsets = [0, 1], sizes = [16, 1], strides = [1, 1]} : vector<16x8xf32> to vector<16x1xf32>
    %656 = vector.broadcast %655 : vector<16x1xf32> to vector<16x128xf32>
    %657 = arith.mulf %566, %656 : vector<16x128xf32>
    %658 = arith.addf %654, %657 : vector<16x128xf32>
    %659 = vector.extract_strided_slice %63 {offsets = [0, 1], sizes = [16, 1], strides = [1, 1]} : vector<16x8xf32> to vector<16x1xf32>
    %660 = vector.broadcast %659 : vector<16x1xf32> to vector<16x128xf32>
    %661 = arith.mulf %570, %660 : vector<16x128xf32>
    %662 = arith.addf %658, %661 : vector<16x128xf32>
    %663 = vector.extract_strided_slice %70 {offsets = [0, 1], sizes = [16, 1], strides = [1, 1]} : vector<16x8xf32> to vector<16x1xf32>
    %664 = vector.broadcast %663 : vector<16x1xf32> to vector<16x128xf32>
    %665 = arith.mulf %574, %664 : vector<16x128xf32>
    %666 = arith.addf %662, %665 : vector<16x128xf32>
    %667 = arith.mulf %666, %115 : vector<16x128xf32>
    %668 = arith.mulf %667, %542 : vector<16x128xf32>
    %cst_69 = arith.constant 9.99999974E-6 : f32
    %669 = vector.broadcast %cst_69 : f32 to vector<16x128xf32>
    %670 = arith.addf %668, %669 : vector<16x128xf32>
    %cst_70 = arith.constant dense<0.000000e+00> : vector<16xf32>
    %671 = vector.multi_reduction <add>, %670, %cst_70 [1] : vector<16x128xf32> to vector<16xf32>
    %672 = vector.shape_cast %671 : vector<16xf32> to vector<16x1xf32>
    %cst_71 = arith.constant 1.000000e+00 : f32
    %673 = vector.broadcast %cst_71 : f32 to vector<16x1xf32>
    %674 = arith.divf %673, %672 : vector<16x1xf32>
    %675 = arith.mulf %670, %2 : vector<16x128xf32>
    %cst_72 = arith.constant dense<0.000000e+00> : vector<16xf32>
    %676 = vector.multi_reduction <add>, %675, %cst_72 [1] : vector<16x128xf32> to vector<16xf32>
    %677 = vector.shape_cast %676 : vector<16xf32> to vector<16x1xf32>
    %678 = arith.mulf %677, %674 : vector<16x1xf32>
    %679 = vector.broadcast %678 : vector<16x1xf32> to vector<16x128xf32>
    %680 = arith.subf %2, %679 : vector<16x128xf32>
    %681 = arith.mulf %670, %680 : vector<16x128xf32>
    %682 = arith.mulf %681, %680 : vector<16x128xf32>
    %cst_73 = arith.constant dense<0.000000e+00> : vector<16xf32>
    %683 = vector.multi_reduction <add>, %682, %cst_73 [1] : vector<16x128xf32> to vector<16xf32>
    %684 = vector.shape_cast %683 : vector<16xf32> to vector<16x1xf32>
    %685 = arith.mulf %684, %674 : vector<16x1xf32>
    %c1_i32_74 = arith.constant 1 : i32
    %686 = vector.broadcast %c1_i32_74 : i32 to vector<16x8xi32>
    %687 = arith.cmpi eq, %575, %686 : vector<16x8xi32>
    %688 = vector.shape_cast %678 : vector<16x1xf32> to vector<16x1xf32>
    %689 = vector.broadcast %688 : vector<16x1xf32> to vector<16x8xf32>
    %690 = arith.select %687, %689, %632 : vector<16x8xi1>, vector<16x8xf32>
    %691 = vector.shape_cast %685 : vector<16x1xf32> to vector<16x1xf32>
    %692 = vector.broadcast %691 : vector<16x1xf32> to vector<16x8xf32>
    %693 = arith.select %687, %692, %635 : vector<16x8xi1>, vector<16x8xf32>
    %694 = vector.extract_strided_slice %21 {offsets = [0, 2], sizes = [16, 1], strides = [1, 1]} : vector<16x8xf32> to vector<16x1xf32>
    %695 = vector.broadcast %694 : vector<16x1xf32> to vector<16x128xf32>
    %696 = arith.mulf %546, %695 : vector<16x128xf32>
    %697 = vector.extract_strided_slice %28 {offsets = [0, 2], sizes = [16, 1], strides = [1, 1]} : vector<16x8xf32> to vector<16x1xf32>
    %698 = vector.broadcast %697 : vector<16x1xf32> to vector<16x128xf32>
    %699 = arith.mulf %550, %698 : vector<16x128xf32>
    %700 = arith.addf %696, %699 : vector<16x128xf32>
    %701 = vector.extract_strided_slice %35 {offsets = [0, 2], sizes = [16, 1], strides = [1, 1]} : vector<16x8xf32> to vector<16x1xf32>
    %702 = vector.broadcast %701 : vector<16x1xf32> to vector<16x128xf32>
    %703 = arith.mulf %554, %702 : vector<16x128xf32>
    %704 = arith.addf %700, %703 : vector<16x128xf32>
    %705 = vector.extract_strided_slice %42 {offsets = [0, 2], sizes = [16, 1], strides = [1, 1]} : vector<16x8xf32> to vector<16x1xf32>
    %706 = vector.broadcast %705 : vector<16x1xf32> to vector<16x128xf32>
    %707 = arith.mulf %558, %706 : vector<16x128xf32>
    %708 = arith.addf %704, %707 : vector<16x128xf32>
    %709 = vector.extract_strided_slice %49 {offsets = [0, 2], sizes = [16, 1], strides = [1, 1]} : vector<16x8xf32> to vector<16x1xf32>
    %710 = vector.broadcast %709 : vector<16x1xf32> to vector<16x128xf32>
    %711 = arith.mulf %562, %710 : vector<16x128xf32>
    %712 = arith.addf %708, %711 : vector<16x128xf32>
    %713 = vector.extract_strided_slice %56 {offsets = [0, 2], sizes = [16, 1], strides = [1, 1]} : vector<16x8xf32> to vector<16x1xf32>
    %714 = vector.broadcast %713 : vector<16x1xf32> to vector<16x128xf32>
    %715 = arith.mulf %566, %714 : vector<16x128xf32>
    %716 = arith.addf %712, %715 : vector<16x128xf32>
    %717 = vector.extract_strided_slice %63 {offsets = [0, 2], sizes = [16, 1], strides = [1, 1]} : vector<16x8xf32> to vector<16x1xf32>
    %718 = vector.broadcast %717 : vector<16x1xf32> to vector<16x128xf32>
    %719 = arith.mulf %570, %718 : vector<16x128xf32>
    %720 = arith.addf %716, %719 : vector<16x128xf32>
    %721 = vector.extract_strided_slice %70 {offsets = [0, 2], sizes = [16, 1], strides = [1, 1]} : vector<16x8xf32> to vector<16x1xf32>
    %722 = vector.broadcast %721 : vector<16x1xf32> to vector<16x128xf32>
    %723 = arith.mulf %574, %722 : vector<16x128xf32>
    %724 = arith.addf %720, %723 : vector<16x128xf32>
    %725 = arith.mulf %724, %133 : vector<16x128xf32>
    %726 = arith.mulf %725, %542 : vector<16x128xf32>
    %cst_75 = arith.constant 9.99999974E-6 : f32
    %727 = vector.broadcast %cst_75 : f32 to vector<16x128xf32>
    %728 = arith.addf %726, %727 : vector<16x128xf32>
    %cst_76 = arith.constant dense<0.000000e+00> : vector<16xf32>
    %729 = vector.multi_reduction <add>, %728, %cst_76 [1] : vector<16x128xf32> to vector<16xf32>
    %730 = vector.shape_cast %729 : vector<16xf32> to vector<16x1xf32>
    %cst_77 = arith.constant 1.000000e+00 : f32
    %731 = vector.broadcast %cst_77 : f32 to vector<16x1xf32>
    %732 = arith.divf %731, %730 : vector<16x1xf32>
    %733 = arith.mulf %728, %2 : vector<16x128xf32>
    %cst_78 = arith.constant dense<0.000000e+00> : vector<16xf32>
    %734 = vector.multi_reduction <add>, %733, %cst_78 [1] : vector<16x128xf32> to vector<16xf32>
    %735 = vector.shape_cast %734 : vector<16xf32> to vector<16x1xf32>
    %736 = arith.mulf %735, %732 : vector<16x1xf32>
    %737 = vector.broadcast %736 : vector<16x1xf32> to vector<16x128xf32>
    %738 = arith.subf %2, %737 : vector<16x128xf32>
    %739 = arith.mulf %728, %738 : vector<16x128xf32>
    %740 = arith.mulf %739, %738 : vector<16x128xf32>
    %cst_79 = arith.constant dense<0.000000e+00> : vector<16xf32>
    %741 = vector.multi_reduction <add>, %740, %cst_79 [1] : vector<16x128xf32> to vector<16xf32>
    %742 = vector.shape_cast %741 : vector<16xf32> to vector<16x1xf32>
    %743 = arith.mulf %742, %732 : vector<16x1xf32>
    %c2_i32_80 = arith.constant 2 : i32
    %744 = vector.broadcast %c2_i32_80 : i32 to vector<16x8xi32>
    %745 = arith.cmpi eq, %575, %744 : vector<16x8xi32>
    %746 = vector.shape_cast %736 : vector<16x1xf32> to vector<16x1xf32>
    %747 = vector.broadcast %746 : vector<16x1xf32> to vector<16x8xf32>
    %748 = arith.select %745, %747, %690 : vector<16x8xi1>, vector<16x8xf32>
    %749 = vector.shape_cast %743 : vector<16x1xf32> to vector<16x1xf32>
    %750 = vector.broadcast %749 : vector<16x1xf32> to vector<16x8xf32>
    %751 = arith.select %745, %750, %693 : vector<16x8xi1>, vector<16x8xf32>
    %752 = vector.extract_strided_slice %21 {offsets = [0, 3], sizes = [16, 1], strides = [1, 1]} : vector<16x8xf32> to vector<16x1xf32>
    %753 = vector.broadcast %752 : vector<16x1xf32> to vector<16x128xf32>
    %754 = arith.mulf %546, %753 : vector<16x128xf32>
    %755 = vector.extract_strided_slice %28 {offsets = [0, 3], sizes = [16, 1], strides = [1, 1]} : vector<16x8xf32> to vector<16x1xf32>
    %756 = vector.broadcast %755 : vector<16x1xf32> to vector<16x128xf32>
    %757 = arith.mulf %550, %756 : vector<16x128xf32>
    %758 = arith.addf %754, %757 : vector<16x128xf32>
    %759 = vector.extract_strided_slice %35 {offsets = [0, 3], sizes = [16, 1], strides = [1, 1]} : vector<16x8xf32> to vector<16x1xf32>
    %760 = vector.broadcast %759 : vector<16x1xf32> to vector<16x128xf32>
    %761 = arith.mulf %554, %760 : vector<16x128xf32>
    %762 = arith.addf %758, %761 : vector<16x128xf32>
    %763 = vector.extract_strided_slice %42 {offsets = [0, 3], sizes = [16, 1], strides = [1, 1]} : vector<16x8xf32> to vector<16x1xf32>
    %764 = vector.broadcast %763 : vector<16x1xf32> to vector<16x128xf32>
    %765 = arith.mulf %558, %764 : vector<16x128xf32>
    %766 = arith.addf %762, %765 : vector<16x128xf32>
    %767 = vector.extract_strided_slice %49 {offsets = [0, 3], sizes = [16, 1], strides = [1, 1]} : vector<16x8xf32> to vector<16x1xf32>
    %768 = vector.broadcast %767 : vector<16x1xf32> to vector<16x128xf32>
    %769 = arith.mulf %562, %768 : vector<16x128xf32>
    %770 = arith.addf %766, %769 : vector<16x128xf32>
    %771 = vector.extract_strided_slice %56 {offsets = [0, 3], sizes = [16, 1], strides = [1, 1]} : vector<16x8xf32> to vector<16x1xf32>
    %772 = vector.broadcast %771 : vector<16x1xf32> to vector<16x128xf32>
    %773 = arith.mulf %566, %772 : vector<16x128xf32>
    %774 = arith.addf %770, %773 : vector<16x128xf32>
    %775 = vector.extract_strided_slice %63 {offsets = [0, 3], sizes = [16, 1], strides = [1, 1]} : vector<16x8xf32> to vector<16x1xf32>
    %776 = vector.broadcast %775 : vector<16x1xf32> to vector<16x128xf32>
    %777 = arith.mulf %570, %776 : vector<16x128xf32>
    %778 = arith.addf %774, %777 : vector<16x128xf32>
    %779 = vector.extract_strided_slice %70 {offsets = [0, 3], sizes = [16, 1], strides = [1, 1]} : vector<16x8xf32> to vector<16x1xf32>
    %780 = vector.broadcast %779 : vector<16x1xf32> to vector<16x128xf32>
    %781 = arith.mulf %574, %780 : vector<16x128xf32>
    %782 = arith.addf %778, %781 : vector<16x128xf32>
    %783 = arith.mulf %782, %151 : vector<16x128xf32>
    %784 = arith.mulf %783, %542 : vector<16x128xf32>
    %cst_81 = arith.constant 9.99999974E-6 : f32
    %785 = vector.broadcast %cst_81 : f32 to vector<16x128xf32>
    %786 = arith.addf %784, %785 : vector<16x128xf32>
    %cst_82 = arith.constant dense<0.000000e+00> : vector<16xf32>
    %787 = vector.multi_reduction <add>, %786, %cst_82 [1] : vector<16x128xf32> to vector<16xf32>
    %788 = vector.shape_cast %787 : vector<16xf32> to vector<16x1xf32>
    %cst_83 = arith.constant 1.000000e+00 : f32
    %789 = vector.broadcast %cst_83 : f32 to vector<16x1xf32>
    %790 = arith.divf %789, %788 : vector<16x1xf32>
    %791 = arith.mulf %786, %2 : vector<16x128xf32>
    %cst_84 = arith.constant dense<0.000000e+00> : vector<16xf32>
    %792 = vector.multi_reduction <add>, %791, %cst_84 [1] : vector<16x128xf32> to vector<16xf32>
    %793 = vector.shape_cast %792 : vector<16xf32> to vector<16x1xf32>
    %794 = arith.mulf %793, %790 : vector<16x1xf32>
    %795 = vector.broadcast %794 : vector<16x1xf32> to vector<16x128xf32>
    %796 = arith.subf %2, %795 : vector<16x128xf32>
    %797 = arith.mulf %786, %796 : vector<16x128xf32>
    %798 = arith.mulf %797, %796 : vector<16x128xf32>
    %cst_85 = arith.constant dense<0.000000e+00> : vector<16xf32>
    %799 = vector.multi_reduction <add>, %798, %cst_85 [1] : vector<16x128xf32> to vector<16xf32>
    %800 = vector.shape_cast %799 : vector<16xf32> to vector<16x1xf32>
    %801 = arith.mulf %800, %790 : vector<16x1xf32>
    %c3_i32_86 = arith.constant 3 : i32
    %802 = vector.broadcast %c3_i32_86 : i32 to vector<16x8xi32>
    %803 = arith.cmpi eq, %575, %802 : vector<16x8xi32>
    %804 = vector.shape_cast %794 : vector<16x1xf32> to vector<16x1xf32>
    %805 = vector.broadcast %804 : vector<16x1xf32> to vector<16x8xf32>
    %806 = arith.select %803, %805, %748 : vector<16x8xi1>, vector<16x8xf32>
    %807 = vector.shape_cast %801 : vector<16x1xf32> to vector<16x1xf32>
    %808 = vector.broadcast %807 : vector<16x1xf32> to vector<16x8xf32>
    %809 = arith.select %803, %808, %751 : vector<16x8xi1>, vector<16x8xf32>
    %810 = vector.extract_strided_slice %21 {offsets = [0, 4], sizes = [16, 1], strides = [1, 1]} : vector<16x8xf32> to vector<16x1xf32>
    %811 = vector.broadcast %810 : vector<16x1xf32> to vector<16x128xf32>
    %812 = arith.mulf %546, %811 : vector<16x128xf32>
    %813 = vector.extract_strided_slice %28 {offsets = [0, 4], sizes = [16, 1], strides = [1, 1]} : vector<16x8xf32> to vector<16x1xf32>
    %814 = vector.broadcast %813 : vector<16x1xf32> to vector<16x128xf32>
    %815 = arith.mulf %550, %814 : vector<16x128xf32>
    %816 = arith.addf %812, %815 : vector<16x128xf32>
    %817 = vector.extract_strided_slice %35 {offsets = [0, 4], sizes = [16, 1], strides = [1, 1]} : vector<16x8xf32> to vector<16x1xf32>
    %818 = vector.broadcast %817 : vector<16x1xf32> to vector<16x128xf32>
    %819 = arith.mulf %554, %818 : vector<16x128xf32>
    %820 = arith.addf %816, %819 : vector<16x128xf32>
    %821 = vector.extract_strided_slice %42 {offsets = [0, 4], sizes = [16, 1], strides = [1, 1]} : vector<16x8xf32> to vector<16x1xf32>
    %822 = vector.broadcast %821 : vector<16x1xf32> to vector<16x128xf32>
    %823 = arith.mulf %558, %822 : vector<16x128xf32>
    %824 = arith.addf %820, %823 : vector<16x128xf32>
    %825 = vector.extract_strided_slice %49 {offsets = [0, 4], sizes = [16, 1], strides = [1, 1]} : vector<16x8xf32> to vector<16x1xf32>
    %826 = vector.broadcast %825 : vector<16x1xf32> to vector<16x128xf32>
    %827 = arith.mulf %562, %826 : vector<16x128xf32>
    %828 = arith.addf %824, %827 : vector<16x128xf32>
    %829 = vector.extract_strided_slice %56 {offsets = [0, 4], sizes = [16, 1], strides = [1, 1]} : vector<16x8xf32> to vector<16x1xf32>
    %830 = vector.broadcast %829 : vector<16x1xf32> to vector<16x128xf32>
    %831 = arith.mulf %566, %830 : vector<16x128xf32>
    %832 = arith.addf %828, %831 : vector<16x128xf32>
    %833 = vector.extract_strided_slice %63 {offsets = [0, 4], sizes = [16, 1], strides = [1, 1]} : vector<16x8xf32> to vector<16x1xf32>
    %834 = vector.broadcast %833 : vector<16x1xf32> to vector<16x128xf32>
    %835 = arith.mulf %570, %834 : vector<16x128xf32>
    %836 = arith.addf %832, %835 : vector<16x128xf32>
    %837 = vector.extract_strided_slice %70 {offsets = [0, 4], sizes = [16, 1], strides = [1, 1]} : vector<16x8xf32> to vector<16x1xf32>
    %838 = vector.broadcast %837 : vector<16x1xf32> to vector<16x128xf32>
    %839 = arith.mulf %574, %838 : vector<16x128xf32>
    %840 = arith.addf %836, %839 : vector<16x128xf32>
    %841 = arith.mulf %840, %169 : vector<16x128xf32>
    %842 = arith.mulf %841, %542 : vector<16x128xf32>
    %cst_87 = arith.constant 9.99999974E-6 : f32
    %843 = vector.broadcast %cst_87 : f32 to vector<16x128xf32>
    %844 = arith.addf %842, %843 : vector<16x128xf32>
    %cst_88 = arith.constant dense<0.000000e+00> : vector<16xf32>
    %845 = vector.multi_reduction <add>, %844, %cst_88 [1] : vector<16x128xf32> to vector<16xf32>
    %846 = vector.shape_cast %845 : vector<16xf32> to vector<16x1xf32>
    %cst_89 = arith.constant 1.000000e+00 : f32
    %847 = vector.broadcast %cst_89 : f32 to vector<16x1xf32>
    %848 = arith.divf %847, %846 : vector<16x1xf32>
    %849 = arith.mulf %844, %2 : vector<16x128xf32>
    %cst_90 = arith.constant dense<0.000000e+00> : vector<16xf32>
    %850 = vector.multi_reduction <add>, %849, %cst_90 [1] : vector<16x128xf32> to vector<16xf32>
    %851 = vector.shape_cast %850 : vector<16xf32> to vector<16x1xf32>
    %852 = arith.mulf %851, %848 : vector<16x1xf32>
    %853 = vector.broadcast %852 : vector<16x1xf32> to vector<16x128xf32>
    %854 = arith.subf %2, %853 : vector<16x128xf32>
    %855 = arith.mulf %844, %854 : vector<16x128xf32>
    %856 = arith.mulf %855, %854 : vector<16x128xf32>
    %cst_91 = arith.constant dense<0.000000e+00> : vector<16xf32>
    %857 = vector.multi_reduction <add>, %856, %cst_91 [1] : vector<16x128xf32> to vector<16xf32>
    %858 = vector.shape_cast %857 : vector<16xf32> to vector<16x1xf32>
    %859 = arith.mulf %858, %848 : vector<16x1xf32>
    %c4_i32_92 = arith.constant 4 : i32
    %860 = vector.broadcast %c4_i32_92 : i32 to vector<16x8xi32>
    %861 = arith.cmpi eq, %575, %860 : vector<16x8xi32>
    %862 = vector.shape_cast %852 : vector<16x1xf32> to vector<16x1xf32>
    %863 = vector.broadcast %862 : vector<16x1xf32> to vector<16x8xf32>
    %864 = arith.select %861, %863, %806 : vector<16x8xi1>, vector<16x8xf32>
    %865 = vector.shape_cast %859 : vector<16x1xf32> to vector<16x1xf32>
    %866 = vector.broadcast %865 : vector<16x1xf32> to vector<16x8xf32>
    %867 = arith.select %861, %866, %809 : vector<16x8xi1>, vector<16x8xf32>
    %868 = vector.extract_strided_slice %21 {offsets = [0, 5], sizes = [16, 1], strides = [1, 1]} : vector<16x8xf32> to vector<16x1xf32>
    %869 = vector.broadcast %868 : vector<16x1xf32> to vector<16x128xf32>
    %870 = arith.mulf %546, %869 : vector<16x128xf32>
    %871 = vector.extract_strided_slice %28 {offsets = [0, 5], sizes = [16, 1], strides = [1, 1]} : vector<16x8xf32> to vector<16x1xf32>
    %872 = vector.broadcast %871 : vector<16x1xf32> to vector<16x128xf32>
    %873 = arith.mulf %550, %872 : vector<16x128xf32>
    %874 = arith.addf %870, %873 : vector<16x128xf32>
    %875 = vector.extract_strided_slice %35 {offsets = [0, 5], sizes = [16, 1], strides = [1, 1]} : vector<16x8xf32> to vector<16x1xf32>
    %876 = vector.broadcast %875 : vector<16x1xf32> to vector<16x128xf32>
    %877 = arith.mulf %554, %876 : vector<16x128xf32>
    %878 = arith.addf %874, %877 : vector<16x128xf32>
    %879 = vector.extract_strided_slice %42 {offsets = [0, 5], sizes = [16, 1], strides = [1, 1]} : vector<16x8xf32> to vector<16x1xf32>
    %880 = vector.broadcast %879 : vector<16x1xf32> to vector<16x128xf32>
    %881 = arith.mulf %558, %880 : vector<16x128xf32>
    %882 = arith.addf %878, %881 : vector<16x128xf32>
    %883 = vector.extract_strided_slice %49 {offsets = [0, 5], sizes = [16, 1], strides = [1, 1]} : vector<16x8xf32> to vector<16x1xf32>
    %884 = vector.broadcast %883 : vector<16x1xf32> to vector<16x128xf32>
    %885 = arith.mulf %562, %884 : vector<16x128xf32>
    %886 = arith.addf %882, %885 : vector<16x128xf32>
    %887 = vector.extract_strided_slice %56 {offsets = [0, 5], sizes = [16, 1], strides = [1, 1]} : vector<16x8xf32> to vector<16x1xf32>
    %888 = vector.broadcast %887 : vector<16x1xf32> to vector<16x128xf32>
    %889 = arith.mulf %566, %888 : vector<16x128xf32>
    %890 = arith.addf %886, %889 : vector<16x128xf32>
    %891 = vector.extract_strided_slice %63 {offsets = [0, 5], sizes = [16, 1], strides = [1, 1]} : vector<16x8xf32> to vector<16x1xf32>
    %892 = vector.broadcast %891 : vector<16x1xf32> to vector<16x128xf32>
    %893 = arith.mulf %570, %892 : vector<16x128xf32>
    %894 = arith.addf %890, %893 : vector<16x128xf32>
    %895 = vector.extract_strided_slice %70 {offsets = [0, 5], sizes = [16, 1], strides = [1, 1]} : vector<16x8xf32> to vector<16x1xf32>
    %896 = vector.broadcast %895 : vector<16x1xf32> to vector<16x128xf32>
    %897 = arith.mulf %574, %896 : vector<16x128xf32>
    %898 = arith.addf %894, %897 : vector<16x128xf32>
    %899 = arith.mulf %898, %187 : vector<16x128xf32>
    %900 = arith.mulf %899, %542 : vector<16x128xf32>
    %cst_93 = arith.constant 9.99999974E-6 : f32
    %901 = vector.broadcast %cst_93 : f32 to vector<16x128xf32>
    %902 = arith.addf %900, %901 : vector<16x128xf32>
    %cst_94 = arith.constant dense<0.000000e+00> : vector<16xf32>
    %903 = vector.multi_reduction <add>, %902, %cst_94 [1] : vector<16x128xf32> to vector<16xf32>
    %904 = vector.shape_cast %903 : vector<16xf32> to vector<16x1xf32>
    %cst_95 = arith.constant 1.000000e+00 : f32
    %905 = vector.broadcast %cst_95 : f32 to vector<16x1xf32>
    %906 = arith.divf %905, %904 : vector<16x1xf32>
    %907 = arith.mulf %902, %2 : vector<16x128xf32>
    %cst_96 = arith.constant dense<0.000000e+00> : vector<16xf32>
    %908 = vector.multi_reduction <add>, %907, %cst_96 [1] : vector<16x128xf32> to vector<16xf32>
    %909 = vector.shape_cast %908 : vector<16xf32> to vector<16x1xf32>
    %910 = arith.mulf %909, %906 : vector<16x1xf32>
    %911 = vector.broadcast %910 : vector<16x1xf32> to vector<16x128xf32>
    %912 = arith.subf %2, %911 : vector<16x128xf32>
    %913 = arith.mulf %902, %912 : vector<16x128xf32>
    %914 = arith.mulf %913, %912 : vector<16x128xf32>
    %cst_97 = arith.constant dense<0.000000e+00> : vector<16xf32>
    %915 = vector.multi_reduction <add>, %914, %cst_97 [1] : vector<16x128xf32> to vector<16xf32>
    %916 = vector.shape_cast %915 : vector<16xf32> to vector<16x1xf32>
    %917 = arith.mulf %916, %906 : vector<16x1xf32>
    %c5_i32_98 = arith.constant 5 : i32
    %918 = vector.broadcast %c5_i32_98 : i32 to vector<16x8xi32>
    %919 = arith.cmpi eq, %575, %918 : vector<16x8xi32>
    %920 = vector.shape_cast %910 : vector<16x1xf32> to vector<16x1xf32>
    %921 = vector.broadcast %920 : vector<16x1xf32> to vector<16x8xf32>
    %922 = arith.select %919, %921, %864 : vector<16x8xi1>, vector<16x8xf32>
    %923 = vector.shape_cast %917 : vector<16x1xf32> to vector<16x1xf32>
    %924 = vector.broadcast %923 : vector<16x1xf32> to vector<16x8xf32>
    %925 = arith.select %919, %924, %867 : vector<16x8xi1>, vector<16x8xf32>
    %926 = vector.extract_strided_slice %21 {offsets = [0, 6], sizes = [16, 1], strides = [1, 1]} : vector<16x8xf32> to vector<16x1xf32>
    %927 = vector.broadcast %926 : vector<16x1xf32> to vector<16x128xf32>
    %928 = arith.mulf %546, %927 : vector<16x128xf32>
    %929 = vector.extract_strided_slice %28 {offsets = [0, 6], sizes = [16, 1], strides = [1, 1]} : vector<16x8xf32> to vector<16x1xf32>
    %930 = vector.broadcast %929 : vector<16x1xf32> to vector<16x128xf32>
    %931 = arith.mulf %550, %930 : vector<16x128xf32>
    %932 = arith.addf %928, %931 : vector<16x128xf32>
    %933 = vector.extract_strided_slice %35 {offsets = [0, 6], sizes = [16, 1], strides = [1, 1]} : vector<16x8xf32> to vector<16x1xf32>
    %934 = vector.broadcast %933 : vector<16x1xf32> to vector<16x128xf32>
    %935 = arith.mulf %554, %934 : vector<16x128xf32>
    %936 = arith.addf %932, %935 : vector<16x128xf32>
    %937 = vector.extract_strided_slice %42 {offsets = [0, 6], sizes = [16, 1], strides = [1, 1]} : vector<16x8xf32> to vector<16x1xf32>
    %938 = vector.broadcast %937 : vector<16x1xf32> to vector<16x128xf32>
    %939 = arith.mulf %558, %938 : vector<16x128xf32>
    %940 = arith.addf %936, %939 : vector<16x128xf32>
    %941 = vector.extract_strided_slice %49 {offsets = [0, 6], sizes = [16, 1], strides = [1, 1]} : vector<16x8xf32> to vector<16x1xf32>
    %942 = vector.broadcast %941 : vector<16x1xf32> to vector<16x128xf32>
    %943 = arith.mulf %562, %942 : vector<16x128xf32>
    %944 = arith.addf %940, %943 : vector<16x128xf32>
    %945 = vector.extract_strided_slice %56 {offsets = [0, 6], sizes = [16, 1], strides = [1, 1]} : vector<16x8xf32> to vector<16x1xf32>
    %946 = vector.broadcast %945 : vector<16x1xf32> to vector<16x128xf32>
    %947 = arith.mulf %566, %946 : vector<16x128xf32>
    %948 = arith.addf %944, %947 : vector<16x128xf32>
    %949 = vector.extract_strided_slice %63 {offsets = [0, 6], sizes = [16, 1], strides = [1, 1]} : vector<16x8xf32> to vector<16x1xf32>
    %950 = vector.broadcast %949 : vector<16x1xf32> to vector<16x128xf32>
    %951 = arith.mulf %570, %950 : vector<16x128xf32>
    %952 = arith.addf %948, %951 : vector<16x128xf32>
    %953 = vector.extract_strided_slice %70 {offsets = [0, 6], sizes = [16, 1], strides = [1, 1]} : vector<16x8xf32> to vector<16x1xf32>
    %954 = vector.broadcast %953 : vector<16x1xf32> to vector<16x128xf32>
    %955 = arith.mulf %574, %954 : vector<16x128xf32>
    %956 = arith.addf %952, %955 : vector<16x128xf32>
    %957 = arith.mulf %956, %205 : vector<16x128xf32>
    %958 = arith.mulf %957, %542 : vector<16x128xf32>
    %cst_99 = arith.constant 9.99999974E-6 : f32
    %959 = vector.broadcast %cst_99 : f32 to vector<16x128xf32>
    %960 = arith.addf %958, %959 : vector<16x128xf32>
    %cst_100 = arith.constant dense<0.000000e+00> : vector<16xf32>
    %961 = vector.multi_reduction <add>, %960, %cst_100 [1] : vector<16x128xf32> to vector<16xf32>
    %962 = vector.shape_cast %961 : vector<16xf32> to vector<16x1xf32>
    %cst_101 = arith.constant 1.000000e+00 : f32
    %963 = vector.broadcast %cst_101 : f32 to vector<16x1xf32>
    %964 = arith.divf %963, %962 : vector<16x1xf32>
    %965 = arith.mulf %960, %2 : vector<16x128xf32>
    %cst_102 = arith.constant dense<0.000000e+00> : vector<16xf32>
    %966 = vector.multi_reduction <add>, %965, %cst_102 [1] : vector<16x128xf32> to vector<16xf32>
    %967 = vector.shape_cast %966 : vector<16xf32> to vector<16x1xf32>
    %968 = arith.mulf %967, %964 : vector<16x1xf32>
    %969 = vector.broadcast %968 : vector<16x1xf32> to vector<16x128xf32>
    %970 = arith.subf %2, %969 : vector<16x128xf32>
    %971 = arith.mulf %960, %970 : vector<16x128xf32>
    %972 = arith.mulf %971, %970 : vector<16x128xf32>
    %cst_103 = arith.constant dense<0.000000e+00> : vector<16xf32>
    %973 = vector.multi_reduction <add>, %972, %cst_103 [1] : vector<16x128xf32> to vector<16xf32>
    %974 = vector.shape_cast %973 : vector<16xf32> to vector<16x1xf32>
    %975 = arith.mulf %974, %964 : vector<16x1xf32>
    %c6_i32_104 = arith.constant 6 : i32
    %976 = vector.broadcast %c6_i32_104 : i32 to vector<16x8xi32>
    %977 = arith.cmpi eq, %575, %976 : vector<16x8xi32>
    %978 = vector.shape_cast %968 : vector<16x1xf32> to vector<16x1xf32>
    %979 = vector.broadcast %978 : vector<16x1xf32> to vector<16x8xf32>
    %980 = arith.select %977, %979, %922 : vector<16x8xi1>, vector<16x8xf32>
    %981 = vector.shape_cast %975 : vector<16x1xf32> to vector<16x1xf32>
    %982 = vector.broadcast %981 : vector<16x1xf32> to vector<16x8xf32>
    %983 = arith.select %977, %982, %925 : vector<16x8xi1>, vector<16x8xf32>
    %984 = vector.extract_strided_slice %21 {offsets = [0, 7], sizes = [16, 1], strides = [1, 1]} : vector<16x8xf32> to vector<16x1xf32>
    %985 = vector.broadcast %984 : vector<16x1xf32> to vector<16x128xf32>
    %986 = arith.mulf %546, %985 : vector<16x128xf32>
    %987 = vector.extract_strided_slice %28 {offsets = [0, 7], sizes = [16, 1], strides = [1, 1]} : vector<16x8xf32> to vector<16x1xf32>
    %988 = vector.broadcast %987 : vector<16x1xf32> to vector<16x128xf32>
    %989 = arith.mulf %550, %988 : vector<16x128xf32>
    %990 = arith.addf %986, %989 : vector<16x128xf32>
    %991 = vector.extract_strided_slice %35 {offsets = [0, 7], sizes = [16, 1], strides = [1, 1]} : vector<16x8xf32> to vector<16x1xf32>
    %992 = vector.broadcast %991 : vector<16x1xf32> to vector<16x128xf32>
    %993 = arith.mulf %554, %992 : vector<16x128xf32>
    %994 = arith.addf %990, %993 : vector<16x128xf32>
    %995 = vector.extract_strided_slice %42 {offsets = [0, 7], sizes = [16, 1], strides = [1, 1]} : vector<16x8xf32> to vector<16x1xf32>
    %996 = vector.broadcast %995 : vector<16x1xf32> to vector<16x128xf32>
    %997 = arith.mulf %558, %996 : vector<16x128xf32>
    %998 = arith.addf %994, %997 : vector<16x128xf32>
    %999 = vector.extract_strided_slice %49 {offsets = [0, 7], sizes = [16, 1], strides = [1, 1]} : vector<16x8xf32> to vector<16x1xf32>
    %1000 = vector.broadcast %999 : vector<16x1xf32> to vector<16x128xf32>
    %1001 = arith.mulf %562, %1000 : vector<16x128xf32>
    %1002 = arith.addf %998, %1001 : vector<16x128xf32>
    %1003 = vector.extract_strided_slice %56 {offsets = [0, 7], sizes = [16, 1], strides = [1, 1]} : vector<16x8xf32> to vector<16x1xf32>
    %1004 = vector.broadcast %1003 : vector<16x1xf32> to vector<16x128xf32>
    %1005 = arith.mulf %566, %1004 : vector<16x128xf32>
    %1006 = arith.addf %1002, %1005 : vector<16x128xf32>
    %1007 = vector.extract_strided_slice %63 {offsets = [0, 7], sizes = [16, 1], strides = [1, 1]} : vector<16x8xf32> to vector<16x1xf32>
    %1008 = vector.broadcast %1007 : vector<16x1xf32> to vector<16x128xf32>
    %1009 = arith.mulf %570, %1008 : vector<16x128xf32>
    %1010 = arith.addf %1006, %1009 : vector<16x128xf32>
    %1011 = vector.extract_strided_slice %70 {offsets = [0, 7], sizes = [16, 1], strides = [1, 1]} : vector<16x8xf32> to vector<16x1xf32>
    %1012 = vector.broadcast %1011 : vector<16x1xf32> to vector<16x128xf32>
    %1013 = arith.mulf %574, %1012 : vector<16x128xf32>
    %1014 = arith.addf %1010, %1013 : vector<16x128xf32>
    %1015 = arith.mulf %1014, %223 : vector<16x128xf32>
    %1016 = arith.mulf %1015, %542 : vector<16x128xf32>
    %cst_105 = arith.constant 9.99999974E-6 : f32
    %1017 = vector.broadcast %cst_105 : f32 to vector<16x128xf32>
    %1018 = arith.addf %1016, %1017 : vector<16x128xf32>
    %cst_106 = arith.constant dense<0.000000e+00> : vector<16xf32>
    %1019 = vector.multi_reduction <add>, %1018, %cst_106 [1] : vector<16x128xf32> to vector<16xf32>
    %1020 = vector.shape_cast %1019 : vector<16xf32> to vector<16x1xf32>
    %cst_107 = arith.constant 1.000000e+00 : f32
    %1021 = vector.broadcast %cst_107 : f32 to vector<16x1xf32>
    %1022 = arith.divf %1021, %1020 : vector<16x1xf32>
    %1023 = arith.mulf %1018, %2 : vector<16x128xf32>
    %cst_108 = arith.constant dense<0.000000e+00> : vector<16xf32>
    %1024 = vector.multi_reduction <add>, %1023, %cst_108 [1] : vector<16x128xf32> to vector<16xf32>
    %1025 = vector.shape_cast %1024 : vector<16xf32> to vector<16x1xf32>
    %1026 = arith.mulf %1025, %1022 : vector<16x1xf32>
    %1027 = vector.broadcast %1026 : vector<16x1xf32> to vector<16x128xf32>
    %1028 = arith.subf %2, %1027 : vector<16x128xf32>
    %1029 = arith.mulf %1018, %1028 : vector<16x128xf32>
    %1030 = arith.mulf %1029, %1028 : vector<16x128xf32>
    %cst_109 = arith.constant dense<0.000000e+00> : vector<16xf32>
    %1031 = vector.multi_reduction <add>, %1030, %cst_109 [1] : vector<16x128xf32> to vector<16xf32>
    %1032 = vector.shape_cast %1031 : vector<16xf32> to vector<16x1xf32>
    %1033 = arith.mulf %1032, %1022 : vector<16x1xf32>
    %c7_i32_110 = arith.constant 7 : i32
    %1034 = vector.broadcast %c7_i32_110 : i32 to vector<16x8xi32>
    %1035 = arith.cmpi eq, %575, %1034 : vector<16x8xi32>
    %1036 = vector.shape_cast %1026 : vector<16x1xf32> to vector<16x1xf32>
    %1037 = vector.broadcast %1036 : vector<16x1xf32> to vector<16x8xf32>
    %1038 = arith.select %1035, %1037, %980 : vector<16x8xi1>, vector<16x8xf32>
    %1039 = vector.shape_cast %1033 : vector<16x1xf32> to vector<16x1xf32>
    %1040 = vector.broadcast %1039 : vector<16x1xf32> to vector<16x8xf32>
    %1041 = arith.select %1035, %1040, %983 : vector<16x8xi1>, vector<16x8xf32>
    %1042 = math.sqrt %1041 : vector<16x8xf32>
    %1043 = arith.subf %0, %1038 : vector<16x8xf32>
    %1044 = math.absf %1043 : vector<16x8xf32>
    %1045 = math.sqrt %4 : vector<16x8xf32>
    %1046 = arith.subf %1045, %1042 : vector<16x8xf32>
    %1047 = math.absf %1046 : vector<16x8xf32>
    %cst_111 = arith.constant 0.000000e+00 : f32
    %1048 = vector.broadcast %cst_111 : f32 to vector<16x8xf32>
    %1049 = arith.cmpf ogt, %1041, %1048 : vector<16x8xf32>
    %cst_112 = arith.constant 1.000000e-01 : f32
    %1050 = vector.broadcast %cst_112 : f32 to vector<16x8xf32>
    %1051 = arith.cmpf ogt, %1044, %1050 : vector<16x8xf32>
    %1052 = arith.andi %1051, %1049 : vector<16x8xi1>
    %cst_113 = arith.constant 1.000000e-01 : f32
    %1053 = vector.broadcast %cst_113 : f32 to vector<16x8xf32>
    %1054 = arith.cmpf ogt, %1047, %1053 : vector<16x8xf32>
    %1055 = arith.andi %1052, %1054 : vector<16x8xi1>
    %1056 = arith.extui %1055 : vector<16x8xi1> to vector<16x8xi32>
    %1057 = arith.sitofp %1056 : vector<16x8xi32> to vector<16x8xf32>
    %cst_114 = arith.constant 1.500000e+00 : f32
    %1058 = vector.broadcast %cst_114 : f32 to vector<16x8xf32>
    %1059 = arith.maximumf %1042, %1058 : vector<16x8xf32>
    %1060 = arith.divf %1059, %1 : vector<16x8xf32>
    %cst_115 = arith.constant 9.99999993E-9 : f32
    %1061 = vector.broadcast %cst_115 : f32 to vector<16x8xf32>
    %1062 = arith.addf %1060, %1061 : vector<16x8xf32>
    %1063 = math.log %1062 : vector<16x8xf32>
    %1064 = arith.subf %0, %1038 : vector<16x8xf32>
    %1065 = arith.mulf %1064, %1064 : vector<16x8xf32>
    %1066 = arith.addf %4, %1065 : vector<16x8xf32>
    %cst_116 = arith.constant 2.000000e+00 : f32
    %1067 = vector.broadcast %cst_116 : f32 to vector<16x8xf32>
    %1068 = arith.mulf %1067, %1059 : vector<16x8xf32>
    %1069 = arith.mulf %1068, %1059 : vector<16x8xf32>
    %1070 = arith.divf %1066, %1069 : vector<16x8xf32>
    %1071 = arith.addf %1063, %1070 : vector<16x8xf32>
    %cst_117 = arith.constant 5.000000e-01 : f32
    %1072 = vector.broadcast %cst_117 : f32 to vector<16x8xf32>
    %1073 = arith.subf %1071, %1072 : vector<16x8xf32>
    %1074 = arith.mulf %1073, %1057 : vector<16x8xf32>
    %cst_118 = arith.constant dense<0.000000e+00> : vector<16xf32>
    %1075 = vector.multi_reduction <add>, %1074, %cst_118 [1] : vector<16x8xf32> to vector<16xf32>
    %1076 = vector.shape_cast %1075 : vector<16xf32> to vector<16x1xf32>
    %cst_119 = arith.constant 8.000000e+00 : f32
    %1077 = vector.broadcast %cst_119 : f32 to vector<16x1xf32>
    %1078 = arith.divf %1076, %1077 : vector<16x1xf32>
    %c0_120 = arith.constant 0 : index
    %c0_121 = arith.constant 0 : index
    %1079 = vector.load %arg5[%c0_120, %c0_121] : memref<16x1xf32, #tpu.memory_space<vmem>>, vector<16x1xf32>
    tpu.vector_store %arg5[%c0_120, %c0_121], %1078 {strides = array<i32>} : memref<16x1xf32, #tpu.memory_space<vmem>>, vector<16x1xf32>,
    %c0_122 = arith.constant 0 : index
    %c0_123 = arith.constant 0 : index
    %1080 = vector.load %arg6[%c0_122, %c0_123] : memref<16x8xf32, #tpu.memory_space<vmem>>, vector<16x8xf32>
    tpu.vector_store %arg6[%c0_122, %c0_123], %1038 {strides = array<i32>} : memref<16x8xf32, #tpu.memory_space<vmem>>, vector<16x8xf32>,
    %c0_124 = arith.constant 0 : index
    %c0_125 = arith.constant 0 : index
    %1081 = vector.load %arg7[%c0_124, %c0_125] : memref<16x8xf32, #tpu.memory_space<vmem>>, vector<16x8xf32>
    tpu.vector_store %arg7[%c0_124, %c0_125], %1041 {strides = array<i32>} : memref<16x8xf32, #tpu.memory_space<vmem>>, vector<16x8xf32>,
    return
  }
  func.func @transform_0(%arg0: i32) -> (i32, i32) {
    %c0_i32 = arith.constant 0 : i32
    %c0_i32_0 = arith.constant 0 : i32
    return %arg0, %c0_i32 : i32, i32
  }
  func.func @transform_1(%arg0: i32) -> (i32, i32) {
    %c0_i32 = arith.constant 0 : i32
    %c0_i32_0 = arith.constant 0 : i32
    return %arg0, %c0_i32 : i32, i32
  }
  func.func @transform_2(%arg0: i32) -> (i32, i32) {
    %c0_i32 = arith.constant 0 : i32
    %c0_i32_0 = arith.constant 0 : i32
    return %arg0, %c0_i32 : i32, i32
  }
  func.func @transform_3(%arg0: i32) -> (i32, i32) {
    %c0_i32 = arith.constant 0 : i32
    %c0_i32_0 = arith.constant 0 : i32
    return %arg0, %c0_i32 : i32, i32
  }
  func.func @transform_4(%arg0: i32) -> (i32, i32) {
    %c0_i32 = arith.constant 0 : i32
    %c0_i32_0 = arith.constant 0 : i32
    return %arg0, %c0_i32 : i32, i32
  }
  func.func @transform_5(%arg0: i32) -> (i32, i32) {
    %c0_i32 = arith.constant 0 : i32
    %c0_i32_0 = arith.constant 0 : i32
    return %arg0, %c0_i32 : i32, i32
  }
  func.func @transform_6(%arg0: i32) -> (i32, i32) {
    %c0_i32 = arith.constant 0 : i32
    %c0_i32_0 = arith.constant 0 : i32
    return %arg0, %c0_i32 : i32, i32
  }
}

</mosaic_0001>

<bundles_post_ra>
// kernel: tpu_custom_call.1
= control target key start
LH: loop header
LB: loop body
LE: loop exit
PB: predicated region body
PF: predicated region fallthrough
CT: control target
= control target key end

     0   :  { %v2357_v0 = vmov 1   ;;  %v4388_v1 = vmov 0   ;;  %v2359_v6 = vmov 2   ;;  %v4400_v7 = vmov 3   ;;  %s4381_s0 = inlined_call_operand.vmem [shape: f32[16,8], index: 0, kind: input, shape index: {}]   ;;  %s4382_s1 = inlined_call_operand.vmem [shape: f32[16,8], index: 1, kind: input, shape index: {}]   ;;  %s4383_s2 = inlined_call_operand.vmem [shape: f32[16,128], index: 2, kind: input, shape index: {}]   ;;  %s4384_s3 = inlined_call_operand.vmem [shape: f32[16,128], index: 3, kind: input, shape index: {}]   ;;  %s4385_s5 = inlined_call_operand.vmem [shape: f32[16,8], index: 5, kind: output, shape index: {1}]   ;;  %s4386_s6 = inlined_call_operand.vmem [shape: f32[16,8], index: 6, kind: output, shape index: {2}]   ;;  %s4387_s4 = inlined_call_operand.vmem [shape: f32[16,1], index: 4, kind: output, shape index: {0}]  }
   0x1   :  { %2153 = vset.pattern.permute.xlu1 %v2357_v0  ;;  %2152 = vset.pattern.permute.xlu0 %v4388_v1  ;;  %v2406_v2 = vld [vmem:[%s4381_s0] sm:$0xff]  ;;  %v2413_v3 = vld [vmem:[%s4381_s0 + $0x8] sm:$0xff]  ;;  %v4394_v11 = vmov 5   ;;  %v4401_v14 = vmov 4   ;;  %v4392_v15 = vmov 6   ;;  %v4390_v20 = vmov 7  }
   0x2   :  { %65 = vperm.xlu1 %2153, %v2406_v2   ;;  %46 = vperm.xlu0 %2152, %v2406_v2   ;;  %v22_v4 = vld [vmem:[%s4382_s1] sm:$0xff]  ;;  %v23_v9 = vld [vmem:[%s4382_s1 + $0x8] sm:$0xff] }
   0x3   :  { %v2420_v5 = vmul.f32 %v22_v4, %v22_v4  ;;  %v37_v10 = vmul.f32 2.5066283, %v23_v9  ;;  %v2432_v12 = vmul.f32 %v23_v9, %v23_v9  ;;  %v36_v18 = vmul.f32 2.5066283, %v22_v4 }
   0x5   :  { %4538 = vst [vmem:[#allocation2_spill] sm:$0xff] %v2420_v5  ;;  %v30_v8 = vmul.f32 2.0, %v2420_v5  ;;  %4539 = vst [vmem:[#allocation3_spill] sm:$0xff] %v2432_v12  ;;  %v31_v13 = vmul.f32 2.0, %v2432_v12 }
   0x6   :  { %69 = vperm.xlu1 %2153, %v2413_v3   ;;  %51 = vperm.xlu0 %2152, %v2413_v3  }
   0x7   :  { %2219 = vrcp.f32 %v30_v8 }
   0x8   :  { %2221 = vrcp.f32 %v37_v10 }
   0x9   :  { %2223 = vrcp.f32 %v31_v13 }
   0xa   :  { %2154 = vset.pattern.permute.xlu1 %v2359_v6  ;;  %2156 = vset.pattern.permute.xlu0 %v4400_v7  ;;  %2225 = vrcp.f32 %v36_v18 }
   0xb   :  { %87 = vperm.xlu1 %2154, %v2413_v3   ;;  %105 = vperm.xlu0 %2156, %v2413_v3  }
   0xf   :  { %2155 = vset.pattern.permute.xlu1 %v4400_v7  ;;  %2158 = vset.pattern.permute.xlu0 %v4394_v11 }
  0x10   :  { %101 = vperm.xlu1 %2155, %v2406_v2   ;;  %137 = vperm.xlu0 %2158, %v2406_v2  }
  0x14   :  { %2157 = vset.pattern.permute.xlu1 %v4401_v14  ;;  %2161 = vset.pattern.permute.xlu0 %v4392_v15  ;;  %v2444_v16 = vpop.eup %2219 }
  0x15   :  { %119 = vperm.xlu1 %2157, %v2406_v2   ;;  %159 = vperm.xlu0 %2161, %v2413_v3   ;;  %v2449_v17 = vpop.eup %2221 }
  0x16   :  { %v2454_v19 = vpop.eup %2223 }
  0x17   :  { %v2226_v21 = vpop.eup %2225 }
  0x19   :  { %123 = vperm.xlu1 %2157, %v2413_v3   ;;  %2162 = vset.pattern.permute.xlu0 %v2359_v6 }
  0x1a   :  { %83 = vperm.xlu0 %2162, %v2406_v2  }
  0x1d   :  { %2159 = vset.pattern.permute.xlu1 %v4394_v11 }
  0x1e   :  { %141 = vperm.xlu1 %2159, %v2413_v3   ;;  %291 = vperm.xlu0 %2162, %v2444_v16  }
  0x22   :  { %2160 = vset.pattern.permute.xlu1 %v4392_v15  ;;  %309 = vperm.xlu0 %2162, %v2449_v17  }
  0x23   :  { %155 = vperm.xlu1 %2160, %v2406_v2  }
  0x26   :  { %2172 = vset.pattern.permute.xlu0 %v4390_v20 }
  0x27   :  { %2163 = vset.pattern.permute.xlu1 %v4390_v20  ;;  %475 = vperm.xlu0 %2172, %v2454_v19  }
  0x28   :  { %173 = vperm.xlu1 %2163, %v2406_v2  }
  0x2b   :  { %2173 = vset.pattern.permute.xlu0 %v2357_v0 }
  0x2c   :  { %177 = vperm.xlu1 %2163, %v2413_v3   ;;  %259 = vperm.xlu0 %2173, %v2454_v19  }
  0x30   :  { %2164 = vset.pattern.permute.xlu1 %v4388_v1 }
  0x31   :  { %221 = vperm.xlu1 %2164, %v2454_v19  }
  0x35   :  { %232 = vperm.xlu1 %2164, %v2226_v21  }
  0x39   :  { %2165 = vset.pattern.permute.xlu1 %v2357_v0 }
  0x3a   :  { %255 = vperm.xlu1 %2165, %v2444_v16  }
  0x3e   :  { %269 = vperm.xlu1 %2165, %v2226_v21  }
  0x42   :  { %273 = vperm.xlu1 %2165, %v2449_v17  }
  0x46   :  { %2166 = vset.pattern.permute.xlu1 %v2359_v6 }
  0x47   :  { %295 = vperm.xlu1 %2166, %v2454_v19  }
  0x4b   :  { %305 = vperm.xlu1 %2166, %v2226_v21  }
  0x4f   :  { %2167 = vset.pattern.permute.xlu1 %v4400_v7 }
  0x50   :  { %327 = vperm.xlu1 %2167, %v2444_v16  }
  0x54   :  { %341 = vperm.xlu1 %2167, %v2226_v21  }
  0x58   :  { %345 = vperm.xlu1 %2167, %v2449_v17  }
  0x5c   :  { %2168 = vset.pattern.permute.xlu1 %v4401_v14 }
  0x5d   :  { %367 = vperm.xlu1 %2168, %v2454_v19  }
  0x61   :  { %377 = vperm.xlu1 %2168, %v2226_v21  }
  0x65   :  { %2169 = vset.pattern.permute.xlu1 %v4394_v11 }
  0x66   :  { %399 = vperm.xlu1 %2169, %v2444_v16  }
  0x6a   :  { %413 = vperm.xlu1 %2169, %v2226_v21  }
  0x6e   :  { %417 = vperm.xlu1 %2169, %v2449_v17  }
  0x72   :  { %2170 = vset.pattern.permute.xlu1 %v4392_v15 }
  0x73   :  { %439 = vperm.xlu1 %2170, %v2454_v19  }
  0x77   :  { %449 = vperm.xlu1 %2170, %v2226_v21  }
  0x7b   :  { %2171 = vset.pattern.permute.xlu1 %v4390_v20 }
  0x7c   :  { %471 = vperm.xlu1 %2171, %v2444_v16  }
  0x7d   :  { %v2482_v22 = vpop.permute.xlu1 %65  ;;  %v2484_v23 = vpop.permute.xlu0 %46 }
  0x7e   :  { %v72_v24 = vsub.f32 %v2406_v2, %v2482_v22  ;;  %v54_v47 = vsub.f32 %v2406_v2, %v2484_v23 }
  0x80   :  { %485 = vperm.xlu1 %2171, %v2226_v21   ;;  %v74_v27 = vmul.f32 %v72_v24, %v72_v24  ;;  %v56_v55 = vmul.f32 %v54_v47, %v54_v47 }
  0x81   :  { %v2488_v25 = vpop.permute.xlu1 %69  ;;  %v2490_v26 = vpop.permute.xlu0 %51 }
  0x82   :  { %v55_v28 = vsub.f32 %v2413_v3, %v2490_v26  ;;  %v76_v31 = vmul.f32 -0.125, %v74_v27  ;;  %v58_v62 = vmul.f32 -0.125, %v56_v55 }
  0x84   :  { %489 = vperm.xlu1 %2171, %v2449_v17   ;;  %v57_v29 = vmul.f32 %v55_v28, %v55_v28  ;;  %v78_v35 = vmul.f32 1.442695, %v76_v31  ;;  %v60_v10 = vmul.f32 1.442695, %v58_v62 }
  0x86   :  { %v2495_v30 = vpop.permute.xlu0 %105  ;;  %v59_v32 = vmul.f32 -0.125, %v57_v29  ;;  %v2497_v33 = vpop.permute.xlu1 %87 }
  0x87   :  { %v109_v47 = vsub.f32 %v2413_v3, %v2495_v30 }
  0x88   :  { %2174 = vset.pattern.permute.xlu1 %v4388_v1  ;;  %v62_v34 = vmul.f32 1.442695, %v59_v32  ;;  %v73_v32 = vsub.f32 %v2413_v3, %v2488_v25 }
  0x8a   :  { %2227 = vpow2.f32 %v62_v34 }
  0x8b   :  { %v2500_v36 = vpop.permute.xlu0 %137  ;;  %v2502_v37 = vpop.permute.xlu1 %101  ;;  %2229 = vpow2.f32 %v78_v35 }
  0x8c   :  { %v108_v40 = vsub.f32 %v2406_v2, %v2502_v37  ;;  %v144_v50 = vsub.f32 %v2406_v2, %v2500_v36 }
  0x8e   :  { %v110_v43 = vmul.f32 %v108_v40, %v108_v40  ;;  %v146_v57 = vmul.f32 %v144_v50, %v144_v50 }
  0x90   :  { %v2504_v38 = vpop.permute.xlu1 %119  ;;  %v2506_v39 = vpop.permute.xlu0 %159  ;;  %v112_v51 = vmul.f32 -0.125, %v110_v43  ;;  %v148_v63 = vmul.f32 -0.125, %v146_v57  ;;  %v75_v43 = vmul.f32 %v73_v32, %v73_v32  ;;  %v111_v57 = vmul.f32 %v109_v47, %v109_v47 }
  0x91   :  { %v126_v44 = vsub.f32 %v2406_v2, %v2504_v38 }
  0x92   :  { %v114_v58 = vmul.f32 1.442695, %v112_v51  ;;  %v150_v18 = vmul.f32 1.442695, %v148_v63  ;;  %v77_v50 = vmul.f32 -0.125, %v75_v43 }
  0x93   :  { %v128_v52 = vmul.f32 %v126_v44, %v126_v44 }
  0x94   :  { %v2510_v41 = vpop.permute.xlu1 %123 }
  0x95   :  { %v2512_v42 = vpop.permute.xlu0 %83  ;;  %v130_v59 = vmul.f32 -0.125, %v128_v52  ;;  %v127_v51 = vsub.f32 %v2413_v3, %v2510_v41 }
  0x96   :  { %v90_v45 = vsub.f32 %v2406_v2, %v2512_v42 }
  0x97   :  { %v2518_v46 = vpop.eup %2227  ;;  %v132_v4 = vmul.f32 1.442695, %v130_v59  ;;  %v80_v59 = vmul.f32 1.442695, %v77_v50 }
  0x98   :  { %v92_v48 = vmul.f32 %v90_v45, %v90_v45  ;;  %629 = vperm.xlu0 %2173, %v2518_v46   ;;  %507 = vperm.xlu1 %2174, %v2518_v46   ;;  %v2528_v54 = vpop.eup %2229 }
  0x99   :  { %v2524_v49 = vpop.permute.xlu1 %141 }
  0x9a   :  { %v94_v53 = vmul.f32 -0.125, %v92_v48  ;;  %v145_v55 = vsub.f32 %v2413_v3, %v2524_v49 }
  0x9c   :  { %v96_v56 = vmul.f32 1.442695, %v94_v53  ;;  %514 = vperm.xlu1 %2174, %v2528_v54  }
  0x9e   :  { %2231 = vpow2.f32 %v96_v56  ;;  %v2531_v60 = vpop.permute.xlu1 %155 }
  0x9f   :  { %v162_v61 = vsub.f32 %v2406_v2, %v2531_v60  ;;  %2233 = vpow2.f32 %v114_v58 }
  0xa0   :  { %2235 = vpow2.f32 %v132_v4  ;;  %v147_v4 = vmul.f32 %v145_v55, %v145_v55 }
  0xa1   :  { %v164_v8 = vmul.f32 %v162_v61, %v162_v61  ;;  %2237 = vpow2.f32 %v60_v10  ;;  %v129_v61 = vmul.f32 %v127_v51, %v127_v51  ;;  %v113_v10 = vmul.f32 -0.125, %v111_v57 }
  0xa2   :  { %2239 = vpow2.f32 %v150_v18 }
  0xa3   :  { %v2535_v9 = vpop.permute.xlu1 %173  ;;  %v166_v21 = vmul.f32 -0.125, %v164_v8  ;;  %v116_v32 = vmul.f32 1.442695, %v113_v10 }
  0xa4   :  { %v180_v13 = vsub.f32 %v2406_v2, %v2535_v9  ;;  %v91_v2 = vsub.f32 %v2413_v3, %v2497_v33 }
  0xa5   :  { %v168_v28 = vmul.f32 1.442695, %v166_v21 }
  0xa6   :  { %v182_v24 = vmul.f32 %v180_v13, %v180_v13  ;;  %v93_v45 = vmul.f32 %v91_v2, %v91_v2  ;;  %v163_v13 = vsub.f32 %v2413_v3, %v2506_v39 }
  0xa7   :  { %v2539_v27 = vpop.permute.xlu1 %177  ;;  %2241 = vpow2.f32 %v168_v28 }
  0xa8   :  { %v184_v29 = vmul.f32 -0.125, %v182_v24  ;;  %v95_v53 = vmul.f32 -0.125, %v93_v45  ;;  %v131_v24 = vmul.f32 -0.125, %v129_v61  ;;  %v181_v28 = vsub.f32 %v2413_v3, %v2539_v27 }
  0xa9   :  { %v165_v2 = vmul.f32 %v163_v13, %v163_v13 }
  0xaa   :  { %v186_v35 = vmul.f32 1.442695, %v184_v29  ;;  %v98_v63 = vmul.f32 1.442695, %v95_v53  ;;  %v149_v29 = vmul.f32 -0.125, %v147_v4  ;;  %v183_v47 = vmul.f32 %v181_v28, %v181_v28 }
  0xab   :  { %v2541_v31 = vpop.eup %2231  ;;  %v134_v45 = vmul.f32 1.442695, %v131_v24  ;;  %v167_v51 = vmul.f32 -0.125, %v165_v2 }
  0xac   :  { %v2545_v34 = vpop.permute.xlu1 %221  ;;  %647 = vperm.xlu0 %2173, %v2541_v31   ;;  %528 = vperm.xlu1 %2174, %v2541_v31   ;;  %v2551_v40 = vpop.eup %2233  ;;  %2243 = vpow2.f32 %v186_v35  ;;  %v152_v3 = vmul.f32 1.442695, %v149_v29  ;;  %v185_v55 = vmul.f32 -0.125, %v183_v47 }
  0xad   :  { %v2559_v48 = vpop.eup %2235  ;;  %2245 = vpow2.f32 %v80_v59  ;;  %v170_v59 = vmul.f32 1.442695, %v167_v51 }
  0xae   :  { %v2565_v52 = vpop.eup %2237  ;;  %2247 = vpow2.f32 %v98_v63 }
  0xaf   :  { %v2571_v58 = vpop.eup %2239  ;;  %v190_v62 = vadd.f32 %v2565_v52, %v2528_v54  ;;  %2249 = vpow2.f32 %v116_v32 }
  0xb0   :  { %659 = vperm.xlu0 %2173, %v2551_v40   ;;  %542 = vperm.xlu1 %2174, %v2551_v40   ;;  %v2555_v44 = vpop.permute.xlu1 %232  ;;  %2251 = vpow2.f32 %v134_v45 }
  0xb1   :  { %v192_v18 = vadd.f32 %v2541_v31, %v190_v62  ;;  %2253 = vpow2.f32 %v152_v3  ;;  %v188_v62 = vmul.f32 1.442695, %v185_v55 }
  0xb2   :  { %2255 = vpow2.f32 %v170_v59 }
  0xb3   :  { %v194_v35 = vadd.f32 %v2551_v40, %v192_v18  ;;  %2257 = vpow2.f32 %v188_v62 }
  0xb4   :  { %671 = vperm.xlu0 %2173, %v2559_v48   ;;  %556 = vperm.xlu1 %2174, %v2559_v48   ;;  %v2582_v21 = vpop.eup %2241 }
  0xb5   :  { %v2569_v56 = vpop.permute.xlu1 %255  ;;  %v196_v53 = vadd.f32 %v2559_v48, %v194_v35 }
  0xb7   :  { %v198_v61 = vadd.f32 %v2571_v58, %v196_v53 }
  0xb8   :  { %683 = vperm.xlu0 %2173, %v2571_v58   ;;  %570 = vperm.xlu1 %2174, %v2571_v58  }
  0xb9   :  { %v2577_v8 = vpop.permute.xlu1 %269  ;;  %v2589_v43 = vpop.eup %2243  ;;  %v200_v10 = vadd.f32 %v2582_v21, %v198_v61 }
  0xba   :  { %v2603_v63 = vpop.eup %2245 }
  0xbb   :  { %v2607_v4 = vpop.eup %2247  ;;  %v191_v18 = vadd.f32 %v2603_v63, %v2518_v46  ;;  %v202_v24 = vadd.f32 %v2589_v43, %v200_v10 }
  0xbc   :  { %695 = vperm.xlu0 %2173, %v2582_v21   ;;  %584 = vperm.xlu1 %2174, %v2582_v21   ;;  %v2618_v29 = vpop.eup %2249 }
  0xbd   :  { %v2591_v50 = vpop.permute.xlu1 %273  ;;  %v193_v28 = vadd.f32 %v2607_v4, %v191_v18  ;;  %v2620_v32 = vpop.eup %2251  ;;  %2259 = vrcp.f32 %v202_v24 }
  0xbe   :  { %v2627_v45 = vpop.eup %2253 }
  0xbf   :  { %v195_v35 = vadd.f32 %v2618_v29, %v193_v28  ;;  %v2633_v51 = vpop.eup %2255 }
  0xc0   :  { %707 = vperm.xlu0 %2173, %v2589_v43   ;;  %598 = vperm.xlu1 %2174, %v2589_v43   ;;  %v2637_v55 = vpop.eup %2257 }
  0xc1   :  { %v197_v47 = vadd.f32 %v2620_v32, %v195_v35 }
  0xc2   :  { %v2598_v57 = vpop.permute.xlu1 %295 }
  0xc3   :  { %v199_v3 = vadd.f32 %v2627_v45, %v197_v47 }
  0xc4   :  { %2178 = vset.pattern.permute.xlu0 %v4388_v1  ;;  %2175 = vset.pattern.permute.xlu1 %v2357_v0 }
  0xc5   :  { %216 = vperm.xlu0 %2178, %v2444_v16   ;;  %625 = vperm.xlu1 %2175, %v2565_v52   ;;  %v201_v59 = vadd.f32 %v2633_v51, %v199_v3 }
  0xc6   :  { %v2610_v13 = vpop.permute.xlu1 %305 }
  0xc7   :  { %v203_v61 = vadd.f32 %v2637_v55, %v201_v59 }
  0xc9   :  { %237 = vperm.xlu0 %2178, %v2449_v17   ;;  %635 = vperm.xlu1 %2175, %v2528_v54   ;;  %2261 = vrcp.f32 %v203_v61  ;;  %v2694_v61 = vpop.permute.xlu0 %291 }
  0xca   :  { %v2643_v62 = vpop.eup %2259 }
  0xcb   :  { %v2622_v2 = vpop.permute.xlu1 %327 }
  0xcd   :  { %502 = vperm.xlu0 %2178, %v2565_v52   ;;  %639 = vperm.xlu1 %2175, %v2603_v63   ;;  %v2702_v20 = vpop.permute.xlu0 %309 }
  0xcf   :  { %v2635_v53 = vpop.permute.xlu1 %341 }
  0xd1   :  { %519 = vperm.xlu0 %2178, %v2603_v63   ;;  %651 = vperm.xlu1 %2175, %v2607_v4   ;;  %v2706_v15 = vpop.permute.xlu0 %475 }
  0xd3   :  { %v2645_v10 = vpop.permute.xlu1 %345 }
  0xd4   :  { %4540 = vst [vmem:[#allocation4_spill] sm:$0xff] %v2645_v10 }
  0xd5   :  { %533 = vperm.xlu0 %2178, %v2607_v4   ;;  %663 = vperm.xlu1 %2175, %v2618_v29   ;;  %v2716_v12 = vpop.permute.xlu0 %259 }
  0xd6   :  { %v2661_v28 = vpop.eup %2261 }
  0xd8   :  { %v2652_v18 = vpop.permute.xlu1 %367 }
  0xd9   :  { %547 = vperm.xlu0 %2178, %v2618_v29   ;;  %675 = vperm.xlu1 %2175, %v2620_v32  }
  0xdc   :  { %v2657_v24 = vpop.permute.xlu1 %377 }
  0xdd   :  { %561 = vperm.xlu0 %2178, %v2620_v32   ;;  %2176 = vset.pattern.permute.xlu1 %v4388_v1  ;;  %4541 = vst [vmem:[#allocation5_spill] sm:$0xff] %v2657_v24  ;;  %v4562_v24 = vmov 5  }
  0xde   :  { %612 = vperm.xlu1 %2176, %v2643_v62  }
  0xe1   :  { %575 = vperm.xlu0 %2178, %v2627_v45   ;;  %v2664_v35 = vpop.permute.xlu1 %399 }
  0xe2   :  { %2177 = vset.pattern.permute.xlu1 %v2357_v0 }
  0xe3   :  { %687 = vperm.xlu1 %2177, %v2627_v45  }
  0xe5   :  { %589 = vperm.xlu0 %2178, %v2633_v51   ;;  %v2671_v47 = vpop.permute.xlu1 %413 }
  0xe7   :  { %699 = vperm.xlu1 %2177, %v2633_v51  }
  0xe9   :  { %603 = vperm.xlu0 %2178, %v2637_v55   ;;  %v2676_v3 = vpop.permute.xlu1 %417 }
  0xea   :  { %4542 = vst [vmem:[#allocation6_spill] sm:$0xff] %v2676_v3 }
  0xeb   :  { %711 = vperm.xlu1 %2177, %v2637_v55  }
  0xed   :  { %617 = vperm.xlu0 %2178, %v2661_v28  }
  0xef   :  { %723 = vperm.xlu1 %2177, %v2661_v28  }
  0xf1   :  { %2179 = vset.pattern.permute.xlu0 %v2357_v0  ;;  %v2682_v0 = vpop.permute.xlu1 %439 }
  0xf2   :  { %719 = vperm.xlu0 %2179, %v2643_v62   ;;  %4543 = vst [vmem:[#allocation7_spill] sm:$0xff] %v2682_v0 }
  0xf3   :  { %2181 = vset.pattern.permute.xlu1 %v2359_v6 }
  0xf4   :  { %741 = vperm.xlu1 %2181, %v2518_v46  }
  0xf6   :  { %2180 = vset.pattern.permute.xlu0 %v2359_v6  ;;  %v2686_v6 = vpop.permute.xlu1 %449 }
  0xf7   :  { %737 = vperm.xlu0 %2180, %v2565_v52   ;;  %4544 = vst [vmem:[#allocation8_spill] sm:$0xff] %v2686_v6 }
  0xf8   :  { %747 = vperm.xlu1 %2181, %v2528_v54  }
  0xfa   :  { %v2692_v59 = vpop.permute.xlu1 %471 }
  0xfb   :  { %751 = vperm.xlu0 %2180, %v2603_v63  }
  0xfc   :  { %759 = vperm.xlu1 %2181, %v2541_v31  }
  0xfe   :  { %v2698_v1 = vpop.permute.xlu1 %485 }
  0xff   :  { %763 = vperm.xlu0 %2180, %v2607_v4   ;;  %4545 = vst [vmem:[#allocation9_spill] sm:$0xff] %v2698_v1 }
 0x100   :  { %771 = vperm.xlu1 %2181, %v2551_v40  }
 0x102   :  { %v2708_v11 = vpop.permute.xlu1 %489 }
 0x103   :  { %775 = vperm.xlu0 %2180, %v2618_v29   ;;  %4546 = vst [vmem:[#allocation10_spill] sm:$0xff] %v2708_v11 }
 0x104   :  { %783 = vperm.xlu1 %2181, %v2559_v48  }
 0x107   :  { %787 = vperm.xlu0 %2180, %v2620_v32  }
 0x108   :  { %795 = vperm.xlu1 %2181, %v2571_v58  }
 0x10b   :  { %799 = vperm.xlu0 %2180, %v2627_v45  }
 0x10c   :  { %807 = vperm.xlu1 %2181, %v2582_v21  }
 0x10f   :  { %811 = vperm.xlu0 %2180, %v2633_v51  }
 0x110   :  { %819 = vperm.xlu1 %2181, %v2589_v43  }
 0x113   :  { %823 = vperm.xlu0 %2180, %v2637_v55   ;;  %v2713_v5 = vpop.permute.xlu1 %507 }
 0x114   :  { %831 = vperm.xlu1 %2181, %v2643_v62   ;;  %4547 = vst [vmem:[#allocation11_spill] sm:$0xff] %v2713_v5 }
 0x117   :  { %835 = vperm.xlu0 %2180, %v2661_v28   ;;  %v2722_v6 = vpop.permute.xlu1 %514 }
 0x118   :  { %2183 = vset.pattern.permute.xlu1 %v4400_v7  ;;  %v2720_v7 = vpop.permute.xlu0 %629  ;;  %4549 = vst [vmem:[#allocation13_spill] sm:$0xff] %v2722_v6 }
 0x119   :  { %849 = vperm.xlu1 %2183, %v2565_v52   ;;  %4548 = vst [vmem:[#allocation12_spill] sm:$0xff] %v2720_v7 }
 0x11b   :  { %2182 = vset.pattern.permute.xlu0 %v4401_v14 }
 0x11c   :  { %363 = vperm.xlu0 %2182, %v2444_v16  }
 0x11d   :  { %859 = vperm.xlu1 %2183, %v2528_v54  }
 0x120   :  { %381 = vperm.xlu0 %2182, %v2449_v17  }
 0x121   :  { %863 = vperm.xlu1 %2183, %v2603_v63  }
 0x124   :  { %965 = vperm.xlu0 %2182, %v2518_v46  }
 0x125   :  { %875 = vperm.xlu1 %2183, %v2607_v4  }
 0x127   :  { %v2726_v14 = vpop.permute.xlu1 %528  ;;  %v2728_v3 = vpop.permute.xlu0 %647 }
 0x128   :  { %4550 = vst [vmem:[#allocation14_spill] sm:$0xff] %v2726_v14  ;;  %4551 = vst [vmem:[#allocation15_spill] sm:$0xff] %v2728_v3  ;;  %983 = vperm.xlu0 %2182, %v2541_v31  }
 0x129   :  { %887 = vperm.xlu1 %2183, %v2618_v29  }
 0x12b   :  { %v2732_v5 = vpop.permute.xlu1 %542  ;;  %v2734_v10 = vpop.permute.xlu0 %659 }
 0x12c   :  { %4552 = vst [vmem:[#allocation16_spill] sm:$0xff] %v2732_v5  ;;  %4553 = vst [vmem:[#allocation17_spill] sm:$0xff] %v2734_v10  ;;  %999 = vperm.xlu0 %2182, %v2618_v29  }
 0x12d   :  { %899 = vperm.xlu1 %2183, %v2620_v32  }
 0x12f   :  { %v2738_v7 = vpop.permute.xlu1 %556  ;;  %v2740_v6 = vpop.permute.xlu0 %671 }
 0x130   :  { %4554 = vst [vmem:[#allocation18_spill] sm:$0xff] %v2738_v7  ;;  %4555 = vst [vmem:[#allocation19_spill] sm:$0xff] %v2740_v6  ;;  %1011 = vperm.xlu0 %2182, %v2620_v32  }
 0x131   :  { %911 = vperm.xlu1 %2183, %v2627_v45  }
 0x133   :  { %v2744_v3 = vpop.permute.xlu1 %570  ;;  %v2746_v14 = vpop.permute.xlu0 %683 }
 0x134   :  { %4556 = vst [vmem:[#allocation20_spill] sm:$0xff] %v2744_v3  ;;  %4557 = vst [vmem:[#allocation21_spill] sm:$0xff] %v2746_v14  ;;  %1019 = vperm.xlu0 %2182, %v2571_v58   ;;  %v4563_v14 = vmov 4  }
 0x135   :  { %923 = vperm.xlu1 %2183, %v2633_v51  }
 0x137   :  { %v2750_v10 = vpop.permute.xlu1 %584  ;;  %v2752_v5 = vpop.permute.xlu0 %695 }
 0x138   :  { %4558 = vst [vmem:[#allocation22_spill] sm:$0xff] %v2750_v10  ;;  %4559 = vst [vmem:[#allocation23_spill] sm:$0xff] %v2752_v5  ;;  %1035 = vperm.xlu0 %2182, %v2633_v51  }
 0x139   :  { %935 = vperm.xlu1 %2183, %v2637_v55  }
 0x13b   :  { %v2756_v6 = vpop.permute.xlu1 %598  ;;  %v2758_v7 = vpop.permute.xlu0 %707 }
 0x13c   :  { %4560 = vst [vmem:[#allocation24_spill] sm:$0xff] %v2756_v6  ;;  %4561 = vst [vmem:[#allocation25_spill] sm:$0xff] %v2758_v7  ;;  %2198 = vset.pattern.permute.xlu0 %v4562_v24 }
 0x13d   :  { %403 = vperm.xlu0 %2198, %v2454_v19   ;;  %2184 = vset.pattern.permute.xlu1 %v4563_v14 }
 0x13e   :  { %961 = vperm.xlu1 %2184, %v2565_v52  }
 0x140   :  { %v2764_v3 = vpop.permute.xlu1 %625  ;;  %v2766_v10 = vpop.permute.xlu0 %216 }
 0x141   :  { %4564 = vst [vmem:[#allocation26_spill] sm:$0xff] %v2764_v3  ;;  %1073 = vperm.xlu0 %2198, %v2565_v52  }
 0x142   :  { %971 = vperm.xlu1 %2184, %v2528_v54  }
 0x144   :  { %v2770_v5 = vpop.permute.xlu1 %635  ;;  %v2772_v6 = vpop.permute.xlu0 %237 }
 0x145   :  { %4565 = vst [vmem:[#allocation27_spill] sm:$0xff] %v2770_v5  ;;  %1087 = vperm.xlu0 %2198, %v2603_v63  }
 0x146   :  { %975 = vperm.xlu1 %2184, %v2603_v63  }
 0x148   :  { %v2776_v7 = vpop.permute.xlu1 %639  ;;  %v2778_v1 = vpop.permute.xlu0 %502 }
 0x149   :  { %4566 = vst [vmem:[#allocation28_spill] sm:$0xff] %v2776_v7  ;;  %4567 = vst [vmem:[#allocation29_spill] sm:$0xff] %v2778_v1  ;;  %1123 = vperm.xlu0 %2198, %v2620_v32   ;;  %v4572_v7 = vmov 3  }
 0x14a   :  { %987 = vperm.xlu1 %2184, %v2607_v4  }
 0x14c   :  { %v2782_v3 = vpop.permute.xlu1 %651  ;;  %v2784_v0 = vpop.permute.xlu0 %519 }
 0x14d   :  { %4568 = vst [vmem:[#allocation30_spill] sm:$0xff] %v2782_v3  ;;  %4569 = vst [vmem:[#allocation31_spill] sm:$0xff] %v2784_v0  ;;  %1143 = vperm.xlu0 %2198, %v2582_v21  }
 0x14e   :  { %2185 = vset.pattern.permute.xlu1 %v4562_v24 }
 0x14f   :  { %1077 = vperm.xlu1 %2185, %v2518_v46  }
 0x150   :  { %v2789_v5 = vpop.permute.xlu1 %663  ;;  %v2791_v11 = vpop.permute.xlu0 %533 }
 0x151   :  { %4570 = vst [vmem:[#allocation32_spill] sm:$0xff] %v2789_v5  ;;  %4571 = vst [vmem:[#allocation33_spill] sm:$0xff] %v2791_v11  ;;  %2203 = vset.pattern.permute.xlu0 %v4572_v7 }
 0x152   :  { %331 = vperm.xlu0 %2203, %v2454_v19  }
 0x153   :  { %1083 = vperm.xlu1 %2185, %v2528_v54  }
 0x154   :  { %v2796_v1 = vpop.permute.xlu1 %675  ;;  %v2798_v3 = vpop.permute.xlu0 %547 }
 0x155   :  { %4573 = vst [vmem:[#allocation34_spill] sm:$0xff] %v2796_v1  ;;  %4574 = vst [vmem:[#allocation35_spill] sm:$0xff] %v2798_v3 }
 0x156   :  { %853 = vperm.xlu0 %2203, %v2518_v46  }
 0x157   :  { %2186 = vset.pattern.permute.xlu1 %v4563_v14 }
 0x158   :  { %995 = vperm.xlu1 %2186, %v2551_v40   ;;  %v2803_v0 = vpop.permute.xlu0 %561 }
 0x159   :  { %4575 = vst [vmem:[#allocation36_spill] sm:$0xff] %v2803_v0  ;;  %v2805_v5 = vpop.permute.xlu1 %612  ;;  %v4582_v0 = vmov 6  }
 0x15a   :  { %4576 = vst [vmem:[#allocation37_spill] sm:$0xff] %v2805_v5  ;;  %871 = vperm.xlu0 %2203, %v2541_v31  }
 0x15c   :  { %2187 = vset.pattern.permute.xlu1 %v4562_v24  ;;  %v2809_v7 = vpop.permute.xlu0 %575 }
 0x15d   :  { %4577 = vst [vmem:[#allocation38_spill] sm:$0xff] %v2809_v7  ;;  %1095 = vperm.xlu1 %2187, %v2541_v31  }
 0x15e   :  { %883 = vperm.xlu0 %2203, %v2551_v40   ;;  %v2813_v19 = vpop.permute.xlu1 %687 }
 0x15f   :  { %4578 = vst [vmem:[#allocation39_spill] sm:$0xff] %v2813_v19 }
 0x160   :  { %v2815_v1 = vpop.permute.xlu0 %589 }
 0x161   :  { %4579 = vst [vmem:[#allocation40_spill] sm:$0xff] %v2815_v1  ;;  %1099 = vperm.xlu1 %2187, %v2607_v4  }
 0x162   :  { %v2818_v3 = vpop.permute.xlu1 %699  ;;  %895 = vperm.xlu0 %2203, %v2559_v48  }
 0x163   :  { %4580 = vst [vmem:[#allocation41_spill] sm:$0xff] %v2818_v3 }
 0x164   :  { %v2821_v5 = vpop.permute.xlu0 %603 }
 0x165   :  { %4581 = vst [vmem:[#allocation42_spill] sm:$0xff] %v2821_v5  ;;  %2188 = vset.pattern.permute.xlu1 %v4582_v0 }
 0x166   :  { %1189 = vperm.xlu1 %2188, %v2518_v46   ;;  %v2825_v7 = vpop.permute.xlu1 %711  ;;  %907 = vperm.xlu0 %2203, %v2571_v58  }
 0x167   :  { %4583 = vst [vmem:[#allocation43_spill] sm:$0xff] %v2825_v7 }
 0x168   :  { %v2828_v11 = vpop.permute.xlu0 %617 }
 0x169   :  { %4584 = vst [vmem:[#allocation44_spill] sm:$0xff] %v2828_v11 }
 0x16a   :  { %1195 = vperm.xlu1 %2188, %v2528_v54   ;;  %v2831_v19 = vpop.permute.xlu1 %723  ;;  %919 = vperm.xlu0 %2203, %v2582_v21  }
 0x16b   :  { %4585 = vst [vmem:[#allocation45_spill] sm:$0xff] %v2831_v19 }
 0x16d   :  { %v2834_v3 = vpop.permute.xlu0 %719 }
 0x16e   :  { %4586 = vst [vmem:[#allocation46_spill] sm:$0xff] %v2834_v3  ;;  %2189 = vset.pattern.permute.xlu1 %v4563_v14  ;;  %931 = vperm.xlu0 %2203, %v2589_v43  }
 0x16f   :  { %1007 = vperm.xlu1 %2189, %v2559_v48   ;;  %v2839_v1 = vpop.permute.xlu1 %741 }
 0x170   :  { %4587 = vst [vmem:[#allocation47_spill] sm:$0xff] %v2839_v1 }
 0x172   :  { %943 = vperm.xlu0 %2203, %v2643_v62   ;;  %v2842_v7 = vpop.permute.xlu0 %737 }
 0x173   :  { %4588 = vst [vmem:[#allocation48_spill] sm:$0xff] %v2842_v7  ;;  %2190 = vset.pattern.permute.xlu1 %v4562_v24  ;;  %v2845_v11 = vpop.permute.xlu1 %747 }
 0x174   :  { %4589 = vst [vmem:[#allocation49_spill] sm:$0xff] %v2845_v11  ;;  %1107 = vperm.xlu1 %2190, %v2551_v40  }
 0x176   :  { %947 = vperm.xlu0 %2203, %v2661_v28   ;;  %v2849_v3 = vpop.permute.xlu0 %751 }
 0x177   :  { %4590 = vst [vmem:[#allocation50_spill] sm:$0xff] %v2849_v3  ;;  %v2851_v19 = vpop.permute.xlu1 %759 }
 0x178   :  { %4591 = vst [vmem:[#allocation51_spill] sm:$0xff] %v2851_v19  ;;  %1111 = vperm.xlu1 %2190, %v2618_v29   ;;  %v4596_v19 = vmov 7  }
 0x17a   :  { %2207 = vset.pattern.permute.xlu0 %v4582_v0  ;;  %v2855_v5 = vpop.permute.xlu0 %763 }
 0x17b   :  { %4592 = vst [vmem:[#allocation52_spill] sm:$0xff] %v2855_v5  ;;  %v2857_v1 = vpop.permute.xlu1 %771  ;;  %435 = vperm.xlu0 %2207, %v2444_v16  }
 0x17c   :  { %4593 = vst [vmem:[#allocation53_spill] sm:$0xff] %v2857_v1  ;;  %2191 = vset.pattern.permute.xlu1 %v4582_v0 }
 0x17d   :  { %1211 = vperm.xlu1 %2191, %v2607_v4  }
 0x17e   :  { %v2862_v11 = vpop.permute.xlu0 %775 }
 0x17f   :  { %4594 = vst [vmem:[#allocation54_spill] sm:$0xff] %v2862_v11  ;;  %v2864_v7 = vpop.permute.xlu1 %783  ;;  %453 = vperm.xlu0 %2207, %v2449_v17  }
 0x180   :  { %4595 = vst [vmem:[#allocation55_spill] sm:$0xff] %v2864_v7 }
 0x181   :  { %2192 = vset.pattern.permute.xlu1 %v4596_v19 }
 0x182   :  { %1297 = vperm.xlu1 %2192, %v2565_v52   ;;  %v2869_v3 = vpop.permute.xlu0 %787 }
 0x183   :  { %4597 = vst [vmem:[#allocation56_spill] sm:$0xff] %v2869_v3  ;;  %v2871_v5 = vpop.permute.xlu1 %795  ;;  %1185 = vperm.xlu0 %2207, %v2565_v52  }
 0x184   :  { %4598 = vst [vmem:[#allocation57_spill] sm:$0xff] %v2871_v5 }
 0x186   :  { %1307 = vperm.xlu1 %2192, %v2528_v54   ;;  %v2878_v11 = vpop.permute.xlu0 %799 }
 0x187   :  { %v2875_v16 = vpop.permute.xlu1 %807  ;;  %1199 = vperm.xlu0 %2207, %v2603_v63   ;;  %4600 = vst [vmem:[#allocation59_spill] sm:$0xff] %v2878_v11 }
 0x188   :  { %4599 = vst [vmem:[#allocation58_spill] sm:$0xff] %v2875_v16 }
 0x18a   :  { %1311 = vperm.xlu1 %2192, %v2603_v63   ;;  %v2884_v7 = vpop.permute.xlu0 %811 }
 0x18b   :  { %v2881_v17 = vpop.permute.xlu1 %819  ;;  %1207 = vperm.xlu0 %2207, %v2541_v31   ;;  %4602 = vst [vmem:[#allocation61_spill] sm:$0xff] %v2884_v7 }
 0x18c   :  { %4601 = vst [vmem:[#allocation60_spill] sm:$0xff] %v2881_v17 }
 0x18e   :  { %2193 = vset.pattern.permute.xlu1 %v4563_v14  ;;  %v2893_v54 = vpop.permute.xlu0 %823 }
 0x18f   :  { %1023 = vperm.xlu1 %2193, %v2627_v45   ;;  %v2888_v52 = vpop.permute.xlu1 %831  ;;  %1231 = vperm.xlu0 %2207, %v2559_v48   ;;  %4604 = vst [vmem:[#allocation63_spill] sm:$0xff] %v2893_v54 }
 0x190   :  { %4603 = vst [vmem:[#allocation62_spill] sm:$0xff] %v2888_v52 }
 0x192   :  { %v2903_v52 = vpop.permute.xlu0 %835 }
 0x193   :  { %2194 = vset.pattern.permute.xlu1 %v4562_v24  ;;  %1247 = vperm.xlu0 %2207, %v2627_v45   ;;  %4607 = vst [vmem:[#allocation66_spill] sm:$0xff] %v2903_v52 }
 0x194   :  { %1119 = vperm.xlu1 %2194, %v2559_v48   ;;  %v2896_v63 = vpop.permute.xlu1 %849 }
 0x195   :  { %4605 = vst [vmem:[#allocation64_spill] sm:$0xff] %v2896_v63 }
 0x197   :  { %1255 = vperm.xlu0 %2207, %v2582_v21   ;;  %v2910_v11 = vpop.permute.xlu0 %363 }
 0x198   :  { %2195 = vset.pattern.permute.xlu1 %v4582_v0  ;;  %v2900_v16 = vpop.permute.xlu1 %859 }
 0x199   :  { %4606 = vst [vmem:[#allocation65_spill] sm:$0xff] %v2900_v16  ;;  %1219 = vperm.xlu1 %2195, %v2551_v40  }
 0x19b   :  { %1267 = vperm.xlu0 %2207, %v2589_v43   ;;  %v2920_v52 = vpop.permute.xlu0 %381 }
 0x19c   :  { %v2906_v7 = vpop.permute.xlu1 %863 }
 0x19d   :  { %4608 = vst [vmem:[#allocation67_spill] sm:$0xff] %v2906_v7  ;;  %1223 = vperm.xlu1 %2195, %v2618_v29  }
 0x19f   :  { %1279 = vperm.xlu0 %2207, %v2643_v62  }
 0x1a0   :  { %v2912_v3 = vpop.permute.xlu1 %875 }
 0x1a1   :  { %4609 = vst [vmem:[#allocation68_spill] sm:$0xff] %v2912_v3  ;;  %2196 = vset.pattern.permute.xlu1 %v4596_v19  ;;  %v2928_v3 = vpop.permute.xlu0 %965 }
 0x1a2   :  { %1323 = vperm.xlu1 %2196, %v2607_v4   ;;  %4612 = vst [vmem:[#allocation71_spill] sm:$0xff] %v2928_v3 }
 0x1a3   :  { %2216 = vset.pattern.permute.xlu0 %v4596_v19 }
 0x1a4   :  { %v2917_v63 = vpop.permute.xlu1 %887  ;;  %1301 = vperm.xlu0 %2216, %v2518_v46  }
 0x1a5   :  { %4610 = vst [vmem:[#allocation69_spill] sm:$0xff] %v2917_v63  ;;  %v2938_v63 = vpop.permute.xlu0 %983 }
 0x1a6   :  { %2197 = vset.pattern.permute.xlu1 %v4563_v14  ;;  %4615 = vst [vmem:[#allocation74_spill] sm:$0xff] %v2938_v63 }
 0x1a7   :  { %1031 = vperm.xlu1 %2197, %v2582_v21  }
 0x1a8   :  { %v2924_v7 = vpop.permute.xlu1 %899  ;;  %1319 = vperm.xlu0 %2216, %v2541_v31  }
 0x1a9   :  { %4611 = vst [vmem:[#allocation70_spill] sm:$0xff] %v2924_v7  ;;  %v2945_v7 = vpop.permute.xlu0 %999 }
 0x1aa   :  { %4617 = vst [vmem:[#allocation76_spill] sm:$0xff] %v2945_v7 }
 0x1ab   :  { %2199 = vset.pattern.permute.xlu1 %v4562_v24 }
 0x1ac   :  { %1131 = vperm.xlu1 %2199, %v2571_v58   ;;  %v2931_v4 = vpop.permute.xlu1 %911  ;;  %1335 = vperm.xlu0 %2216, %v2618_v29  }
 0x1ad   :  { %4613 = vst [vmem:[#allocation72_spill] sm:$0xff] %v2931_v4 }
 0x1b0   :  { %1135 = vperm.xlu1 %2199, %v2627_v45   ;;  %v2935_v46 = vpop.permute.xlu1 %923  ;;  %1359 = vperm.xlu0 %2216, %v2627_v45  }
 0x1b1   :  { %4614 = vst [vmem:[#allocation73_spill] sm:$0xff] %v2935_v46  ;;  %v2955_v46 = vpop.permute.xlu0 %1011 }
 0x1b2   :  { %4620 = vst [vmem:[#allocation79_spill] sm:$0xff] %v2955_v46 }
 0x1b4   :  { %2200 = vset.pattern.permute.xlu1 %v4582_v0  ;;  %v2941_v31 = vpop.permute.xlu1 %935  ;;  %1371 = vperm.xlu0 %2216, %v2633_v51  }
 0x1b5   :  { %4616 = vst [vmem:[#allocation75_spill] sm:$0xff] %v2941_v31  ;;  %1235 = vperm.xlu1 %2200, %v2620_v32   ;;  %v2962_v7 = vpop.permute.xlu0 %1019 }
 0x1b6   :  { %4622 = vst [vmem:[#allocation81_spill] sm:$0xff] %v2962_v7 }
 0x1b8   :  { %1379 = vperm.xlu0 %2216, %v2589_v43  }
 0x1b9   :  { %2201 = vset.pattern.permute.xlu1 %v4596_v19  ;;  %v2949_v29 = vpop.permute.xlu1 %961 }
 0x1ba   :  { %4618 = vst [vmem:[#allocation77_spill] sm:$0xff] %v2949_v29  ;;  %1331 = vperm.xlu1 %2201, %v2551_v40   ;;  %v2968_v40 = vpop.permute.xlu0 %1035 }
 0x1bb   :  { %4624 = vst [vmem:[#allocation83_spill] sm:$0xff] %v2968_v40 }
 0x1bc   :  { %1395 = vperm.xlu0 %2216, %v2661_v28  }
 0x1bd   :  { %v2953_v45 = vpop.permute.xlu1 %971 }
 0x1be   :  { %4619 = vst [vmem:[#allocation78_spill] sm:$0xff] %v2953_v45  ;;  %2202 = vset.pattern.permute.xlu1 %v4563_v14 }
 0x1bf   :  { %1043 = vperm.xlu1 %2202, %v2589_v43  }
 0x1c1   :  { %v2959_v4 = vpop.permute.xlu1 %975 }
 0x1c2   :  { %4621 = vst [vmem:[#allocation80_spill] sm:$0xff] %v2959_v4  ;;  %v2976_v4 = vpop.permute.xlu0 %403 }
 0x1c3   :  { %1047 = vperm.xlu1 %2202, %v2637_v55  }
 0x1c5   :  { %v2964_v31 = vpop.permute.xlu1 %987 }
 0x1c6   :  { %4623 = vst [vmem:[#allocation82_spill] sm:$0xff] %v2964_v31  ;;  %v2982_v7 = vpop.permute.xlu0 %1073 }
 0x1c7   :  { %2204 = vset.pattern.permute.xlu1 %v4562_v24  ;;  %4628 = vst [vmem:[#allocation87_spill] sm:$0xff] %v2982_v7 }
 0x1c8   :  { %1147 = vperm.xlu1 %2204, %v2633_v51  }
 0x1ca   :  { %v2970_v29 = vpop.permute.xlu1 %1077 }
 0x1cb   :  { %4625 = vst [vmem:[#allocation84_spill] sm:$0xff] %v2970_v29  ;;  %v2989_v29 = vpop.permute.xlu0 %1087 }
 0x1cc   :  { %2205 = vset.pattern.permute.xlu1 %v4582_v0  ;;  %4630 = vst [vmem:[#allocation89_spill] sm:$0xff] %v2989_v29 }
 0x1cd   :  { %1243 = vperm.xlu1 %2205, %v2571_v58  }
 0x1ce   :  { %v2974_v46 = vpop.permute.xlu1 %1083 }
 0x1cf   :  { %4626 = vst [vmem:[#allocation85_spill] sm:$0xff] %v2974_v46 }
 0x1d1   :  { %2206 = vset.pattern.permute.xlu1 %v4596_v19 }
 0x1d2   :  { %1343 = vperm.xlu1 %2206, %v2559_v48   ;;  %v2996_v48 = vpop.permute.xlu0 %1123 }
 0x1d3   :  { %v2980_v31 = vpop.permute.xlu1 %995  ;;  %4633 = vst [vmem:[#allocation92_spill] sm:$0xff] %v2996_v48 }
 0x1d4   :  { %4627 = vst [vmem:[#allocation86_spill] sm:$0xff] %v2980_v31 }
 0x1d6   :  { %1347 = vperm.xlu1 %2206, %v2620_v32  }
 0x1d8   :  { %v2985_v40 = vpop.permute.xlu1 %1095 }
 0x1d9   :  { %4629 = vst [vmem:[#allocation88_spill] sm:$0xff] %v2985_v40  ;;  %v3002_v40 = vpop.permute.xlu0 %1143 }
 0x1da   :  { %2208 = vset.pattern.permute.xlu1 %v4562_v24  ;;  %4635 = vst [vmem:[#allocation94_spill] sm:$0xff] %v3002_v40 }
 0x1db   :  { %1155 = vperm.xlu1 %2208, %v2589_v43  }
 0x1dc   :  { %v2991_v46 = vpop.permute.xlu1 %1099 }
 0x1dd   :  { %4631 = vst [vmem:[#allocation90_spill] sm:$0xff] %v2991_v46  ;;  %v3009_v46 = vpop.permute.xlu0 %331 }
 0x1df   :  { %1159 = vperm.xlu1 %2208, %v2637_v55  }
 0x1e1   :  { %v2994_v45 = vpop.permute.xlu1 %1189 }
 0x1e2   :  { %4632 = vst [vmem:[#allocation91_spill] sm:$0xff] %v2994_v45 }
 0x1e3   :  { %2209 = vset.pattern.permute.xlu1 %v4582_v0 }
 0x1e4   :  { %1259 = vperm.xlu1 %2209, %v2633_v51  }
 0x1e5   :  { %v3000_v32 = vpop.permute.xlu1 %1195 }
 0x1e6   :  { %4634 = vst [vmem:[#allocation93_spill] sm:$0xff] %v3000_v32  ;;  %v3017_v32 = vpop.permute.xlu0 %853 }
 0x1e7   :  { %4639 = vst [vmem:[#allocation98_spill] sm:$0xff] %v3017_v32 }
 0x1e8   :  { %2210 = vset.pattern.permute.xlu1 %v4596_v19 }
 0x1e9   :  { %1355 = vperm.xlu1 %2210, %v2571_v58  }
 0x1ea   :  { %v3006_v43 = vpop.permute.xlu1 %1007  ;;  %v3023_v40 = vpop.permute.xlu0 %871 }
 0x1eb   :  { %4636 = vst [vmem:[#allocation95_spill] sm:$0xff] %v3006_v43  ;;  %4641 = vst [vmem:[#allocation100_spill] sm:$0xff] %v3023_v40 }
 0x1ed   :  { %2211 = vset.pattern.permute.xlu1 %v4563_v14 }
 0x1ee   :  { %1055 = vperm.xlu1 %2211, %v2643_v62  }
 0x1ef   :  { %v3012_v45 = vpop.permute.xlu1 %1107 }
 0x1f0   :  { %4637 = vst [vmem:[#allocation96_spill] sm:$0xff] %v3012_v45  ;;  %v3029_v45 = vpop.permute.xlu0 %883 }
 0x1f1   :  { %4643 = vst [vmem:[#allocation102_spill] sm:$0xff] %v3029_v45 }
 0x1f2   :  { %1059 = vperm.xlu1 %2211, %v2661_v28  }
 0x1f3   :  { %v3015_v51 = vpop.permute.xlu1 %1111 }
 0x1f4   :  { %4638 = vst [vmem:[#allocation97_spill] sm:$0xff] %v3015_v51 }
 0x1f6   :  { %2212 = vset.pattern.permute.xlu1 %v4582_v0 }
 0x1f7   :  { %1271 = vperm.xlu1 %2212, %v2637_v55  }
 0x1f8   :  { %v3021_v58 = vpop.permute.xlu1 %1211 }
 0x1f9   :  { %4640 = vst [vmem:[#allocation99_spill] sm:$0xff] %v3021_v58  ;;  %v3038_v58 = vld [vmem:[%s4383_s2] sm:$0xff] }
 0x1fb   :  { %2213 = vset.pattern.permute.xlu1 %v4596_v19 }
 0x1fc   :  { %1367 = vperm.xlu1 %2213, %v2582_v21   ;;  %v284_v21 = vsub.f32 %v2512_v42, %v3038_v58  ;;  %v208_v42 = vsub.f32 %v2484_v23, %v3038_v58  ;;  %v392_v23 = vsub.f32 %v2500_v36, %v3038_v58 }
 0x1fd   :  { %v3027_v14 = vpop.permute.xlu1 %1297 }
 0x1fe   :  { %4642 = vst [vmem:[#allocation101_spill] sm:$0xff] %v3027_v14  ;;  %v3045_v14 = vpop.permute.xlu0 %895  ;;  %v286_v45 = vmul.f32 %v284_v21, %v284_v21  ;;  %v394_v36 = vmul.f32 %v392_v23, %v392_v23 }
 0x1ff   :  { %4646 = vst [vmem:[#allocation105_spill] sm:$0xff] %v3045_v14  ;;  %v248_v14 = vsub.f32 %v2482_v22, %v3038_v58 }
 0x200   :  { %2214 = vset.pattern.permute.xlu1 %v4562_v24  ;;  %v3050_v24 = vld [vmem:[%s4383_s2 + $0x8] sm:$0xff]  ;;  %v288_v21 = vsub.f32 0.0, %v286_v45 }
 0x201   :  { %1167 = vperm.xlu1 %2214, %v2643_v62   ;;  %v3033_v51 = vpop.permute.xlu1 %1307  ;;  %v209_v31 = vsub.f32 %v2490_v26, %v3050_v24  ;;  %v320_v26 = vsub.f32 %v2502_v37, %v3038_v58  ;;  %v465_v22 = vsub.f32 %v2539_v27, %v3050_v24 }
 0x202   :  { %4644 = vst [vmem:[#allocation103_spill] sm:$0xff] %v3033_v51  ;;  %v249_v51 = vsub.f32 %v2488_v25, %v3050_v24  ;;  %v3064_v48 = vpop.permute.xlu0 %907  ;;  %v285_v25 = vsub.f32 %v2497_v33, %v3050_v24  ;;  %v464_v33 = vsub.f32 %v2535_v9, %v3038_v58 }
 0x203   :  { %4648 = vst [vmem:[#allocation107_spill] sm:$0xff] %v3064_v48  ;;  %v211_v29 = vmul.f32 %v209_v31, %v209_v31  ;;  %v322_v45 = vmul.f32 %v320_v26, %v320_v26  ;;  %v467_v7 = vmul.f32 %v465_v22, %v465_v22 }
 0x204   :  { %v251_v40 = vmul.f32 %v249_v51, %v249_v51  ;;  %v287_v31 = vmul.f32 %v285_v25, %v285_v25 }
 0x205   :  { %1171 = vperm.xlu1 %2214, %v2661_v28   ;;  %v3041_v43 = vpop.permute.xlu1 %1311  ;;  %v324_v26 = vsub.f32 0.0, %v322_v45 }
 0x206   :  { %4645 = vst [vmem:[#allocation104_spill] sm:$0xff] %v3041_v43  ;;  %v253_v37 = vsub.f32 0.0, %v251_v40  ;;  %v3081_v48 = vpop.permute.xlu0 %919  ;;  %v289_v40 = vsub.f32 0.0, %v287_v31 }
 0x207   :  { %4650 = vst [vmem:[#allocation109_spill] sm:$0xff] %v3081_v48 }
 0x208   :  { %v263_v27 = vmul.f32 %v2716_v12, %v253_v37 }
 0x209   :  { %2215 = vset.pattern.permute.xlu1 %v4596_v19 }
 0x20a   :  { %1383 = vperm.xlu1 %2215, %v2637_v55   ;;  %v3058_v43 = vpop.permute.xlu1 %1023  ;;  %v210_v55 = vmul.f32 %v208_v42, %v208_v42  ;;  %v213_v42 = vsub.f32 0.0, %v211_v29  ;;  %v266_v12 = vmul.f32 1.442695, %v263_v27  ;;  %v3093_v22 = vpop.permute.xlu0 %931 }
 0x20b   :  { %4647 = vst [vmem:[#allocation106_spill] sm:$0xff] %v3058_v43  ;;  %v250_v43 = vmul.f32 %v248_v14, %v248_v14  ;;  %4652 = vst [vmem:[#allocation111_spill] sm:$0xff] %v3093_v22 }
 0x20c   :  { %v212_v32 = vsub.f32 0.0, %v210_v55  ;;  %v225_v14 = vmul.f32 %v2545_v34, %v213_v42  ;;  %v299_v55 = vmul.f32 %v2598_v57, %v289_v40  ;;  %v334_v34 = vmul.f32 %v2622_v2, %v324_v26 }
 0x20d   :  { %v321_v2 = vsub.f32 %v2495_v30, %v3050_v24  ;;  %v393_v40 = vsub.f32 %v2524_v49, %v3050_v24 }
 0x20e   :  { %2217 = vset.pattern.permute.xlu1 %v4582_v0  ;;  %v298_v0 = vmul.f32 %v2694_v61, %v288_v21  ;;  %v224_v61 = vmul.f32 %v2766_v10, %v212_v32  ;;  %v469_v21 = vsub.f32 0.0, %v467_v7  ;;  %v228_v23 = vmul.f32 1.442695, %v225_v14 }
 0x20f   :  { %1283 = vperm.xlu1 %2217, %v2661_v28   ;;  %v3076_v51 = vpop.permute.xlu1 %1119  ;;  %v466_v28 = vmul.f32 %v464_v33, %v464_v33  ;;  %v356_v7 = vsub.f32 %v2504_v38, %v3038_v58  ;;  %v336_v31 = vmul.f32 1.442695, %v334_v34  ;;  %v323_v38 = vmul.f32 %v321_v2, %v321_v2 }
 0x210   :  { %4649 = vst [vmem:[#allocation108_spill] sm:$0xff] %v3076_v51  ;;  %v252_v51 = vsub.f32 0.0, %v250_v43  ;;  %v300_v29 = vmul.f32 1.442695, %v298_v0  ;;  %v226_v10 = vmul.f32 1.442695, %v224_v61  ;;  %v479_v57 = vmul.f32 %v2706_v15, %v469_v21  ;;  %v3106_v0 = vpop.permute.xlu0 %943 }
 0x211   :  { %v468_v43 = vsub.f32 0.0, %v466_v28  ;;  %4655 = vst [vmem:[#allocation114_spill] sm:$0xff] %v3106_v0  ;;  %v357_v15 = vsub.f32 %v2510_v41, %v3050_v24  ;;  %v325_v27 = vsub.f32 0.0, %v323_v38  ;;  %v429_v21 = vsub.f32 %v2506_v39, %v3050_v24  ;;  %v27_v39 = vld [vmem:[%s4384_s3 + $0x8] sm:$0xff] }
 0x212   :  { %v262_v25 = vmul.f32 %v2569_v56, %v252_v51  ;;  %2263 = vpow2.f32 %v300_v29  ;;  %v302_v51 = vmul.f32 1.442695, %v299_v55  ;;  %v482_v42 = vmul.f32 1.442695, %v479_v57 }
 0x213   :  { %2218 = vset.pattern.permute.xlu1 %v4596_v19  ;;  %v396_v19 = vsub.f32 0.0, %v394_v36  ;;  %v478_v56 = vmul.f32 %v2692_v59, %v468_v43  ;;  %2265 = vpow2.f32 %v266_v12  ;;  %v358_v59 = vmul.f32 %v356_v7, %v356_v7 }
 0x214   :  { %1391 = vperm.xlu1 %2218, %v2643_v62   ;;  %v3087_v9 = vpop.permute.xlu1 %1219  ;;  %v264_v32 = vmul.f32 1.442695, %v262_v25  ;;  %2267 = vpow2.f32 %v228_v23  ;;  %v3112_v28 = vpop.permute.xlu0 %947  ;;  %v359_v14 = vmul.f32 %v357_v15, %v357_v15  ;;  %v335_v29 = vmul.f32 %v3009_v46, %v325_v27 }
 0x215   :  { %4651 = vst [vmem:[#allocation110_spill] sm:$0xff] %v3087_v9  ;;  %v406_v33 = vmul.f32 %v2664_v35, %v396_v19  ;;  %2269 = vpow2.f32 %v226_v10  ;;  %v480_v45 = vmul.f32 1.442695, %v478_v56  ;;  %v360_v36 = vsub.f32 0.0, %v358_v59  ;;  %4657 = vst [vmem:[#allocation116_spill] sm:$0xff] %v3112_v28 }
 0x216   :  { %2271 = vpow2.f32 %v264_v32  ;;  %v395_v55 = vmul.f32 %v393_v40, %v393_v40  ;;  %v361_v19 = vsub.f32 0.0, %v359_v14  ;;  %v338_v43 = vmul.f32 1.442695, %v335_v29 }
 0x217   :  { %v408_v37 = vmul.f32 1.442695, %v406_v33  ;;  %2273 = vpow2.f32 %v302_v51  ;;  %v370_v61 = vmul.f32 %v2910_v11, %v360_v36  ;;  %v26_v11 = vld [vmem:[%s4384_s3] sm:$0xff]  ;;  %v431_v56 = vmul.f32 %v429_v21, %v429_v21  ;;  %v4663_v21 = vld [vmem:[#allocation9_spill] sm:$0xff] }
 0x218   :  { %v3095_v62 = vpop.permute.xlu1 %1223  ;;  %2275 = vpow2.f32 %v336_v31  ;;  %v436_v33 = vpop.permute.xlu0 %435  ;;  %v371_v49 = vmul.f32 %v2652_v18, %v361_v19  ;;  %v397_v57 = vsub.f32 0.0, %v395_v55  ;;  %v428_v51 = vsub.f32 %v2531_v60, %v3038_v58 }
 0x219   :  { %4653 = vst [vmem:[#allocation112_spill] sm:$0xff] %v3095_v62  ;;  %2277 = vpow2.f32 %v408_v37  ;;  %v372_v23 = vmul.f32 1.442695, %v370_v61  ;;  %v3134_v31 = vadd.f32 1e-08, %v26_v11  ;;  %v433_v27 = vsub.f32 0.0, %v431_v56 }
 0x21a   :  { %2279 = vpow2.f32 %v480_v45  ;;  %v3141_v36 = vadd.f32 1e-08, %v27_v39 }
 0x21b   :  { %2281 = vpow2.f32 %v482_v42  ;;  %v374_v42 = vmul.f32 1.442695, %v371_v49 }
 0x21c   :  { %2283 = vpow2.f32 %v372_v23 }
 0x21d   :  { %v3104_v35 = vpop.permute.xlu1 %1323  ;;  %2285 = vpow2.f32 %v338_v43 }
 0x21e   :  { %4654 = vst [vmem:[#allocation113_spill] sm:$0xff] %v3104_v35  ;;  %2287 = vpow2.f32 %v374_v42 }
 0x21f   :  { %v2264_v25 = vpop.eup %2263 }
 0x220   :  { %v2266_v41 = vpop.eup %2265  ;;  %v312_v37 = vmul.f32 %v2264_v25, %v2610_v13  ;;  %v4662_v25 = vld [vmem:[#allocation7_spill] sm:$0xff] }
 0x221   :  { %v2268_v12 = vpop.eup %2267  ;;  %v277_v18 = vmul.f32 %v2266_v41, %v2591_v50  ;;  %v3145_v50 = vpop.permute.xlu0 %453  ;;  %v443_v41 = vmul.f32 %v4662_v25, %v433_v27 }
 0x222   :  { %v3110_v30 = vpop.permute.xlu1 %1031  ;;  %v2270_v34 = vpop.eup %2269  ;;  %v241_v38 = vmul.f32 %v2268_v12, %v2772_v6  ;;  %v430_v6 = vmul.f32 %v428_v51, %v428_v51 }
 0x223   :  { %4656 = vst [vmem:[#allocation115_spill] sm:$0xff] %v3110_v30  ;;  %v2272_v10 = vpop.eup %2271  ;;  %v240_v24 = vmul.f32 %v2270_v34, %v2555_v44  ;;  %v407_v44 = vmul.f32 %v2976_v4, %v397_v57  ;;  %v279_v29 = vadd.f32 1e-05, %v277_v18  ;;  %v314_v4 = vadd.f32 1e-05, %v312_v37 }
 0x224   :  { %v2274_v32 = vpop.eup %2273  ;;  %v276_v59 = vmul.f32 %v2272_v10, %v2577_v8  ;;  %v4661_v8 = vld [vmem:[#allocation10_spill] sm:$0xff]  ;;  %v446_v49 = vmul.f32 1.442695, %v443_v41  ;;  %v432_v56 = vsub.f32 0.0, %v430_v6  ;;  %v4675_v41 = vld [vmem:[#allocation5_spill] sm:$0xff] }
 0x225   :  { %v2276_v7 = vpop.eup %2275  ;;  %v313_v60 = vmul.f32 %v2274_v32, %v2702_v20  ;;  %v242_v61 = vadd.f32 1e-05, %v240_v24  ;;  %v410_v55 = vmul.f32 1.442695, %v407_v44  ;;  %v281_v11 = vmul.f32 %v279_v29, %v3141_v36 }
 0x226   :  { %v2278_v2 = vpop.eup %2277  ;;  %v348_v58 = vmul.f32 %v2276_v7, %v2635_v53  ;;  %v278_v20 = vadd.f32 1e-05, %v276_v59  ;;  %v243_v53 = vadd.f32 1e-05, %v241_v38  ;;  %v3157_v7 = vpop.permute.xlu0 %1185  ;;  %v316_v24 = vmul.f32 %v314_v4, %v3134_v31  ;;  %v4674_v4 = vld [vmem:[#allocation26_spill] sm:$0xff] }
 0x227   :  { %v3118_v26 = vpop.permute.xlu1 %1131  ;;  %v2280_v45 = vpop.eup %2279  ;;  %v420_v14 = vmul.f32 %v2278_v2, %v2671_v47  ;;  %v315_v19 = vadd.f32 1e-05, %v313_v60  ;;  %v244_v47 = vmul.f32 %v242_v61, %v3134_v31  ;;  %4665 = vst [vmem:[#allocation7_spill] sm:$0xff] %v3157_v7  ;;  %2289 = vpow2.f32 %v410_v55  ;;  %v4678_v55 = vld [vmem:[#allocation29_spill] sm:$0xff] }
 0x228   :  { %4658 = vst [vmem:[#allocation117_spill] sm:$0xff] %v3118_v26  ;;  %v2282_v15 = vpop.eup %2281  ;;  %v492_v12 = vmul.f32 %v2280_v45, %v4663_v21  ;;  %v350_v23 = vadd.f32 1e-05, %v348_v58  ;;  %v280_v39 = vmul.f32 %v278_v20, %v3134_v31  ;;  %v245_v57 = vmul.f32 %v243_v53, %v3141_v36  ;;  %v4677_v20 = vld [vmem:[#allocation13_spill] sm:$0xff] }
 0x229   :  { %v493_v40 = vmul.f32 %v2282_v15, %v4661_v8  ;;  %v422_v34 = vadd.f32 1e-05, %v420_v14  ;;  %v317_v51 = vmul.f32 %v315_v19, %v3141_v36  ;;  %v442_v18 = vmul.f32 %v436_v33, %v432_v56  ;;  %v2284_v42 = vpop.eup %2283  ;;  %v4683_v56 = vld [vmem:[#allocation27_spill] sm:$0xff] }
 0x22a   :  { %v494_v32 = vadd.f32 1e-05, %v492_v12  ;;  %v352_v2 = vmul.f32 %v350_v23, %v3134_v31  ;;  %v3166_v59 = vadd.f32 1e-08, %v244_v47  ;;  %v3168_v38 = vadd.f32 1e-08, %v281_v11  ;;  %v2286_v60 = vpop.eup %2285  ;;  %v3183_v61 = vpop.permute.xlu0 %1199 }
 0x22b   :  { %v3126_v46 = vpop.permute.xlu1 %1135  ;;  %v495_v43 = vadd.f32 1e-05, %v493_v40  ;;  %v424_v37 = vmul.f32 %v422_v34, %v3134_v31  ;;  %2291 = vpow2.f32 %v446_v49  ;;  %v3173_v58 = vadd.f32 1e-08, %v280_v39  ;;  %4672 = vst [vmem:[#allocation125_spill] sm:$0xff] %v3183_v61  ;;  %v4679_v23 = vld [vmem:[#allocation4_spill] sm:$0xff] }
 0x22c   :  { %4659 = vst [vmem:[#allocation118_spill] sm:$0xff] %v3126_v46  ;;  %4666 = vst [vmem:[#allocation9_spill] sm:$0xff] %v3166_v59  ;;  %v496_v44 = vmul.f32 %v494_v32, %v3134_v31  ;;  %v3175_v27 = vadd.f32 1e-08, %v316_v24  ;;  %v3177_v33 = vadd.f32 1e-08, %v245_v57  ;;  %v632_v25 = vmul.f32 %v4674_v4, %v3166_v59 }
 0x22d   :  { %v497_v45 = vmul.f32 %v495_v43, %v3141_v36  ;;  %4667 = vst [vmem:[#allocation120_spill] sm:$0xff] %v3168_v38  ;;  %4669 = vst [vmem:[#allocation122_spill] sm:$0xff] %v3173_v58  ;;  %v3179_v14 = vadd.f32 1e-08, %v317_v51  ;;  %v3181_v8 = vadd.f32 1e-08, %v352_v2  ;;  %v384_v21 = vmul.f32 %v2284_v42, %v4675_v41  ;;  %v2288_v51 = vpop.eup %2287 }
 0x22e   :  { %4670 = vst [vmem:[#allocation123_spill] sm:$0xff] %v3175_v27  ;;  %v444_v40 = vmul.f32 1.442695, %v442_v18  ;;  %v3185_v6 = vadd.f32 1e-08, %v424_v37  ;;  %v522_v53 = vmul.f32 %v4677_v20, %v3173_v58  ;;  %v510_v19 = vmul.f32 %v4678_v55, %v3166_v59  ;;  %v4681_v47 = vld [vmem:[#allocation14_spill] sm:$0xff]  ;;  %v3224_v55 = vpop.permute.xlu0 %1207 }
 0x22f   :  { %4671 = vst [vmem:[#allocation124_spill] sm:$0xff] %v3179_v14  ;;  %v3187_v29 = vadd.f32 1e-08, %v497_v45  ;;  %v3192_v12 = vadd.f32 1e-08, %v496_v44  ;;  %v349_v34 = vmul.f32 %v2286_v60, %v4679_v23  ;;  %v536_v11 = vmul.f32 %v4681_v47, %v3175_v27  ;;  %v4682_v49 = vld [vmem:[#allocation15_spill] sm:$0xff] }
 0x230   :  { %v3147_v13 = vpop.permute.xlu1 %1235  ;;  %v654_v32 = vmul.f32 %v4682_v49, %v3175_v27  ;;  %v642_v39 = vmul.f32 %v4683_v56, %v3173_v58  ;;  %v4684_v24 = vld [vmem:[#allocation12_spill] sm:$0xff]  ;;  %v4686_v37 = vld [vmem:[#allocation17_spill] sm:$0xff]  ;;  %2293 = vpow2.f32 %v444_v40  ;;  %v386_v49 = vadd.f32 1e-05, %v384_v21  ;;  %4691 = vst [vmem:[#allocation127_spill] sm:$0xff] %v3224_v55 }
 0x231   :  { %4660 = vst [vmem:[#allocation119_spill] sm:$0xff] %v3147_v13  ;;  %4673 = vst [vmem:[#allocation126_spill] sm:$0xff] %v3187_v29  ;;  %v633_v57 = vmul.f32 %v4684_v24, %v3177_v33  ;;  %v4685_v2 = vld [vmem:[#allocation16_spill] sm:$0xff]  ;;  %v666_v45 = vmul.f32 %v4686_v37, %v3181_v8  ;;  %v385_v56 = vmul.f32 %v2288_v51, %v2920_v52  ;;  %v4689_v24 = vld [vmem:[#allocation11_spill] sm:$0xff]  ;;  %v351_v37 = vadd.f32 1e-05, %v349_v34 }
 0x232   :  { %4676 = vst [vmem:[#allocation5_spill] sm:$0xff] %v3192_v12  ;;  %v550_v18 = vmul.f32 %v4685_v2, %v3181_v8  ;;  %v4687_v42 = vld [vmem:[#allocation20_spill] sm:$0xff]  ;;  %v644_v60 = vadd.f32 %v642_v39, %v632_v25  ;;  %v524_v4 = vadd.f32 %v522_v53, %v510_v19  ;;  %v511_v47 = vmul.f32 %v4689_v24, %v3177_v33  ;;  %v4690_v2 = vld [vmem:[#allocation31_spill] sm:$0xff]  ;;  %v4694_v52 = vld [vmem:[#allocation25_spill] sm:$0xff] }
 0x233   :  { %v3215_v44 = vmul.f32 %v4687_v42, %v3185_v6  ;;  %v4688_v41 = vld [vmem:[#allocation28_spill] sm:$0xff]  ;;  %v523_v20 = vmul.f32 %v4690_v2, %v3168_v38  ;;  %v4692_v42 = vld [vmem:[#allocation21_spill] sm:$0xff]  ;;  %v3236_v21 = vmul.f32 %v4694_v52, %v3192_v12  ;;  %v4696_v34 = vld [vmem:[#allocation30_spill] sm:$0xff] }
 0x234   :  { %v643_v23 = vmul.f32 %v4688_v41, %v3168_v38  ;;  %v3228_v40 = vmul.f32 %v4692_v42, %v3185_v6  ;;  %v4693_v25 = vld [vmem:[#allocation24_spill] sm:$0xff]  ;;  %v2290_v51 = vpop.eup %2289  ;;  %v655_v41 = vmul.f32 %v4696_v34, %v3179_v14  ;;  %v4697_v2 = vld [vmem:[#allocation33_spill] sm:$0xff]  ;;  %v4700_v52 = vld [vmem:[#allocation50_spill] sm:$0xff] }
 0x235   :  { %v3154_v10 = vpop.permute.xlu1 %1331  ;;  %v3232_v39 = vmul.f32 %v4693_v25, %v3192_v12  ;;  %v537_v24 = vmul.f32 %v4697_v2, %v3179_v14  ;;  %v4698_v42 = vld [vmem:[#allocation48_spill] sm:$0xff]  ;;  %v4699_v25 = vld [vmem:[#allocation49_spill] sm:$0xff]  ;;  %v755_v62 = vmul.f32 %v4700_v52, %v3168_v38  ;;  %v4701_v34 = vld [vmem:[#allocation51_spill] sm:$0xff]  ;;  %v353_v2 = vmul.f32 %v351_v37, %v3141_v36 }
 0x236   :  { %4664 = vst [vmem:[#allocation10_spill] sm:$0xff] %v3154_v10  ;;  %v645_v53 = vadd.f32 %v643_v23, %v633_v57  ;;  %v744_v10 = vmul.f32 %v4698_v42, %v3166_v59  ;;  %v754_v13 = vmul.f32 %v4699_v25, %v3173_v58  ;;  %v388_v57 = vmul.f32 %v386_v49, %v3134_v31  ;;  %v4702_v42 = vld [vmem:[#allocation47_spill] sm:$0xff]  ;;  %v4704_v25 = vld [vmem:[#allocation6_spill] sm:$0xff] }
 0x237   :  { %v387_v23 = vadd.f32 1e-05, %v385_v56  ;;  %v766_v46 = vmul.f32 %v4701_v34, %v3175_v27  ;;  %v745_v26 = vmul.f32 %v4702_v42, %v3177_v33  ;;  %v421_v52 = vmul.f32 %v2290_v51, %v4704_v25  ;;  %v4707_v25 = vld [vmem:[#allocation42_spill] sm:$0xff]  ;;  %v4711_v51 = vld [vmem:[#allocation64_spill] sm:$0xff] }
 0x238   :  { %v2292_v35 = vpop.eup %2291  ;;  %v657_v0 = vadd.f32 %v655_v41, %v645_v53  ;;  %v756_v49 = vadd.f32 %v754_v13, %v744_v10  ;;  %v3266_v41 = vadd.f32 1e-08, %v388_v57  ;;  %v3273_v10 = vadd.f32 1e-08, %v353_v2 }
 0x239   :  { %v757_v37 = vadd.f32 %v755_v62, %v745_v26  ;;  %v389_v53 = vmul.f32 %v387_v23, %v3141_v36  ;;  %v866_v62 = vmul.f32 %v2900_v16, %v3173_v58  ;;  %v423_v26 = vadd.f32 1e-05, %v421_v52  ;;  %v4717_v16 = vld [vmem:[#allocation35_spill] sm:$0xff] }
 0x23a   :  { %v3171_v15 = vpop.permute.xlu1 %1043  ;;  %v768_v13 = vadd.f32 %v766_v46, %v756_v49  ;;  %4708 = vst [vmem:[#allocation130_spill] sm:$0xff] %v3273_v10  ;;  %v856_v57 = vmul.f32 %v4711_v51, %v3166_v59  ;;  %v4718_v51 = vld [vmem:[#allocation32_spill] sm:$0xff]  ;;  %v969_v42 = vmul.f32 %v2928_v3, %v3177_v33  ;;  %v4724_v3 = vld [vmem:[#allocation34_spill] sm:$0xff] }
 0x23b   :  { %4668 = vst [vmem:[#allocation121_spill] sm:$0xff] %v3171_v15  ;;  %v525_v15 = vadd.f32 %v523_v20, %v511_v47  ;;  %v457_v20 = vmul.f32 %v2292_v35, %v3145_v50  ;;  %v3262_v47 = vpop.permute.xlu0 %1231  ;;  %v4709_v35 = vld [vmem:[#allocation43_spill] sm:$0xff]  ;;  %v3295_v23 = vadd.f32 1e-08, %v389_v53  ;;  %v667_v53 = vmul.f32 %v4718_v51, %v3273_v10 }
 0x23c   :  { %4705 = vst [vmem:[#allocation6_spill] sm:$0xff] %v3262_v47  ;;  %v3277_v50 = vmul.f32 %v4709_v35, %v3187_v29  ;;  %v425_v35 = vmul.f32 %v423_v26, %v3141_v36  ;;  %v4725_v26 = vld [vmem:[#allocation56_spill] sm:$0xff] }
 0x23d   :  { %v539_v30 = vadd.f32 %v537_v24, %v525_v15  ;;  %v3271_v15 = vmul.f32 %v4707_v25, %v3187_v29  ;;  %v459_v46 = vadd.f32 1e-05, %v457_v20  ;;  %v2294_v2 = vpop.eup %2293  ;;  %v4721_v25 = vld [vmem:[#allocation8_spill] sm:$0xff] }
 0x23e   :  { %v3199_v43 = vpop.permute.xlu1 %1047 }
 0x23f   :  { %4680 = vst [vmem:[#allocation4_spill] sm:$0xff] %v3199_v43  ;;  %v656_v43 = vadd.f32 %v654_v32, %v644_v60  ;;  %v4703_v32 = vld [vmem:[#allocation52_spill] sm:$0xff]  ;;  %v461_v51 = vmul.f32 %v459_v46, %v3141_v36  ;;  %v3334_v36 = vadd.f32 1e-08, %v425_v35  ;;  %v4733_v35 = vld [vmem:[#allocation75_spill] sm:$0xff] }
 0x240   :  { %v767_v60 = vmul.f32 %v4703_v32, %v3179_v14 }
 0x241   :  { %v668_v56 = vadd.f32 %v666_v45, %v656_v43  ;;  %v3287_v45 = vmul.f32 %v2881_v17, %v3192_v12 }
 0x242   :  { %v3279_v24 = vadd.f32 %v767_v60, %v757_v37  ;;  %v4713_v60 = vld [vmem:[#allocation18_spill] sm:$0xff]  ;;  %v4715_v37 = vld [vmem:[#allocation19_spill] sm:$0xff] }
 0x243   :  { %v3238_v19 = vpop.permute.xlu1 %1147  ;;  %4710 = vst [vmem:[#allocation131_spill] sm:$0xff] %v3287_v45  ;;  %v564_v49 = vmul.f32 %v4713_v60, %v3266_v41  ;;  %v678_v20 = vmul.f32 %v4715_v37, %v3266_v41  ;;  %v4720_v37 = vld [vmem:[#allocation68_spill] sm:$0xff] }
 0x244   :  { %4695 = vst [vmem:[#allocation128_spill] sm:$0xff] %v3238_v19  ;;  %v538_v19 = vadd.f32 %v536_v11, %v524_v4  ;;  %v778_v4 = vmul.f32 %v2857_v1, %v3181_v8  ;;  %v4719_v1 = vld [vmem:[#allocation67_spill] sm:$0xff]  ;;  %v879_v60 = vmul.f32 %v4720_v37, %v3179_v14 }
 0x245   :  { %v867_v32 = vmul.f32 %v4719_v1, %v3168_v38  ;;  %v4723_v1 = vld [vmem:[#allocation36_spill] sm:$0xff]  ;;  %v680_v37 = vadd.f32 %v678_v20, %v668_v56  ;;  %v4730_v56 = vld [vmem:[#allocation81_spill] sm:$0xff] }
 0x246   :  { %v552_v34 = vadd.f32 %v550_v18, %v538_v19  ;;  %v780_v43 = vadd.f32 %v778_v4, %v768_v13  ;;  %v802_v18 = vmul.f32 %v2871_v5, %v3185_v6  ;;  %v3291_v19 = vmul.f32 %v2893_v54, %v3187_v29  ;;  %v3301_v4 = vpop.permute.xlu0 %1247  ;;  %v4716_v13 = vld [vmem:[#allocation55_spill] sm:$0xff]  ;;  %v4734_v20 = vld [vmem:[#allocation77_spill] sm:$0xff] }
 0x247   :  { %4714 = vst [vmem:[#allocation133_spill] sm:$0xff] %v3301_v4  ;;  %v790_v17 = vmul.f32 %v4716_v13, %v3266_v41  ;;  %v551_v5 = vmul.f32 %v4717_v16, %v3273_v10  ;;  %v3311_v54 = vadd.f32 %v866_v62, %v856_v57  ;;  %v990_v13 = vmul.f32 %v2938_v63, %v3175_v27 }
 0x248   :  { %v3264_v11 = vpop.permute.xlu1 %1243  ;;  %v456_v16 = vmul.f32 %v2294_v2, %v4721_v25  ;;  %v566_v57 = vadd.f32 %v564_v49, %v552_v34  ;;  %v791_v4 = vmul.f32 %v4725_v26, %v3295_v23  ;;  %v669_v63 = vadd.f32 %v667_v53, %v657_v0  ;;  %v4726_v25 = vld [vmem:[#allocation70_spill] sm:$0xff] }
 0x249   :  { %4706 = vst [vmem:[#allocation129_spill] sm:$0xff] %v3264_v11  ;;  %v679_v11 = vmul.f32 %v4724_v3, %v3295_v23  ;;  %v792_v47 = vadd.f32 %v790_v17, %v780_v43  ;;  %v553_v9 = vadd.f32 %v551_v5, %v539_v30  ;;  %v903_v2 = vmul.f32 %v4726_v25, %v3295_v23  ;;  %v4727_v34 = vld [vmem:[#allocation78_spill] sm:$0xff]  ;;  %v4729_v3 = vld [vmem:[#allocation79_spill] sm:$0xff] }
 0x24a   :  { %v978_v46 = vmul.f32 %v4727_v34, %v3173_v58  ;;  %v4728_v49 = vld [vmem:[#allocation98_spill] sm:$0xff]  ;;  %v3346_v17 = vmul.f32 %v4730_v56, %v3185_v6  ;;  %v458_v5 = vadd.f32 1e-05, %v456_v16  ;;  %v3348_v0 = vadd.f32 1e-08, %v461_v51  ;;  %v3350_v30 = vpop.permute.xlu0 %1255 }
 0x24b   :  { %4732 = vst [vmem:[#allocation135_spill] sm:$0xff] %v3350_v30  ;;  %v3354_v43 = vmul.f32 %v4733_v35, %v3187_v29  ;;  %v968_v53 = vmul.f32 %v4734_v20, %v3166_v59  ;;  %v3359_v34 = vadd.f32 %v3215_v44, %v566_v57  ;;  %v692_v16 = vadd.f32 %v3228_v40, %v680_v37  ;;  %v4738_v35 = vld [vmem:[#allocation80_spill] sm:$0xff]  ;;  %v4739_v20 = vld [vmem:[#allocation38_spill] sm:$0xff] }
 0x24c   :  { %4731 = vst [vmem:[#allocation134_spill] sm:$0xff] %v3346_v17  ;;  %v3366_v51 = vadd.f32 %v802_v18, %v792_v47  ;;  %v681_v26 = vadd.f32 %v679_v11, %v669_v63  ;;  %v979_v29 = vmul.f32 %v4738_v35, %v3168_v38  ;;  %v579_v44 = vmul.f32 %v4739_v20, %v3334_v36  ;;  %v4742_v47 = vld [vmem:[#allocation41_spill] sm:$0xff]  ;;  %v4743_v63 = vld [vmem:[#allocation87_spill] sm:$0xff]  ;;  %v4744_v18 = vld [vmem:[#allocation82_spill] sm:$0xff] }
 0x24d   :  { %v3297_v52 = vpop.permute.xlu1 %1343  ;;  %v980_v30 = vadd.f32 %v978_v46, %v968_v53  ;;  %v460_v57 = vmul.f32 %v458_v5, %v3134_v31  ;;  %v1080_v11 = vmul.f32 %v4743_v63, %v3166_v59  ;;  %v4746_v37 = vld [vmem:[#allocation84_spill] sm:$0xff]  ;;  %v4747_v5 = vld [vmem:[#allocation85_spill] sm:$0xff] }
 0x24e   :  { %4712 = vst [vmem:[#allocation132_spill] sm:$0xff] %v3297_v52  ;;  %v565_v52 = vmul.f32 %v4723_v1, %v3295_v23  ;;  %v857_v1 = vmul.f32 %v4728_v49, %v3177_v33  ;;  %4737 = vst [vmem:[#allocation137_spill] sm:$0xff] %v3366_v51  ;;  %v1081_v46 = vmul.f32 %v4746_v37, %v3177_v33  ;;  %v3390_v35 = vpop.permute.xlu0 %1267 }
 0x24f   :  { %v1090_v53 = vmul.f32 %v4747_v5, %v3173_v58  ;;  %4748 = vst [vmem:[#allocation138_spill] sm:$0xff] %v3390_v35  ;;  %v992_v55 = vadd.f32 %v990_v13, %v980_v30  ;;  %v3398_v51 = vadd.f32 1e-08, %v460_v57  ;;  %v4752_v5 = vld [vmem:[#allocation92_spill] sm:$0xff]  ;;  %v4754_v13 = vld [vmem:[#allocation59_spill] sm:$0xff] }
 0x250   :  { %v567_v49 = vadd.f32 %v565_v52, %v553_v9  ;;  %v869_v45 = vadd.f32 %v867_v32, %v857_v1  ;;  %v703_v9 = vmul.f32 %v4742_v47, %v3348_v0  ;;  %v991_v1 = vmul.f32 %v4744_v18, %v3179_v14  ;;  %v4745_v32 = vld [vmem:[#allocation69_spill] sm:$0xff] }
 0x251   :  { %v3324_v62 = vpop.permute.xlu1 %1347  ;;  %v891_v52 = vmul.f32 %v4745_v32, %v3273_v10  ;;  %v4751_v32 = vld [vmem:[#allocation100_spill] sm:$0xff]  ;;  %v3402_v35 = vmul.f32 %v4752_v5, %v3295_v23  ;;  %v803_v30 = vmul.f32 %v4754_v13, %v3334_v36 }
 0x252   :  { %4722 = vst [vmem:[#allocation8_spill] sm:$0xff] %v3324_v62  ;;  %v3342_v62 = vmul.f32 %v4729_v3, %v3295_v23  ;;  %v4735_v3 = vld [vmem:[#allocation54_spill] sm:$0xff]  ;;  %v881_v20 = vadd.f32 %v879_v60, %v869_v45  ;;  %v1092_v60 = vadd.f32 %v1090_v53, %v1080_v11  ;;  %v4760_v53 = vld [vmem:[#allocation88_spill] sm:$0xff] }
 0x253   :  { %v779_v25 = vmul.f32 %v4735_v3, %v3273_v10  ;;  %v4740_v3 = vld [vmem:[#allocation40_spill] sm:$0xff]  ;;  %v4758_v11 = vld [vmem:[#allocation22_spill] sm:$0xff] }
 0x254   :  { %v593_v28 = vmul.f32 %v4740_v3, %v3348_v0  ;;  %v4750_v3 = vld [vmem:[#allocation89_spill] sm:$0xff]  ;;  %v4764_v13 = vld [vmem:[#allocation76_spill] sm:$0xff] }
 0x255   :  { %v781_v31 = vadd.f32 %v779_v25, %v3279_v24  ;;  %v1091_v18 = vmul.f32 %v4750_v3, %v3168_v38  ;;  %v878_v24 = vmul.f32 %v4751_v32, %v3175_v27  ;;  %v981_v25 = vadd.f32 %v979_v29, %v969_v42  ;;  %v4755_v29 = vld [vmem:[#allocation86_spill] sm:$0xff]  ;;  %v4761_v3 = vld [vmem:[#allocation72_spill] sm:$0xff]  ;;  %v4763_v32 = vld [vmem:[#allocation107_spill] sm:$0xff] }
 0x256   :  { %v3363_v56 = vpop.permute.xlu1 %1155  ;;  %v1002_v42 = vmul.f32 %v4755_v29, %v3181_v8  ;;  %v915_v29 = vmul.f32 %v4761_v3, %v3334_v36 }
 0x257   :  { %4736 = vst [vmem:[#allocation136_spill] sm:$0xff] %v3363_v56  ;;  %v4741_v56 = vld [vmem:[#allocation39_spill] sm:$0xff]  ;;  %v1093_v45 = vadd.f32 %v1091_v18, %v1081_v46  ;;  %v592_v18 = vmul.f32 %v4758_v11, %v3398_v51 }
 0x258   :  { %v691_v40 = vmul.f32 %v4741_v56, %v3334_v36  ;;  %v581_v56 = vadd.f32 %v579_v44, %v567_v49  ;;  %v793_v44 = vadd.f32 %v791_v4, %v781_v31  ;;  %v3417_v4 = vpop.permute.xlu0 %1279  ;;  %v4768_v11 = vld [vmem:[#allocation95_spill] sm:$0xff] }
 0x25a   :  { %v3392_v47 = vpop.permute.xlu1 %1159  ;;  %v693_v63 = vadd.f32 %v691_v40, %v681_v26  ;;  %v595_v37 = vadd.f32 %v593_v28, %v581_v56  ;;  %v4753_v26 = vld [vmem:[#allocation102_spill] sm:$0xff]  ;;  %v993_v40 = vadd.f32 %v991_v1, %v981_v25  ;;  %v880_v28 = vadd.f32 %v878_v24, %v3311_v54  ;;  %v4756_v56 = vld [vmem:[#allocation105_spill] sm:$0xff]  ;;  %v4759_v1 = vld [vmem:[#allocation23_spill] sm:$0xff] }
 0x25b   :  { %4749 = vst [vmem:[#allocation139_spill] sm:$0xff] %v3392_v47  ;;  %v893_v47 = vadd.f32 %v891_v52, %v881_v20  ;;  %v890_v49 = vmul.f32 %v4753_v26, %v3181_v8  ;;  %v902_v57 = vmul.f32 %v4756_v56, %v3266_v41  ;;  %v4757_v20 = vld [vmem:[#allocation61_spill] sm:$0xff]  ;;  %v702_v52 = vmul.f32 %v4759_v1, %v3398_v51  ;;  %v4762_v56 = vld [vmem:[#allocation90_spill] sm:$0xff] }
 0x25c   :  { %v705_v17 = vadd.f32 %v703_v9, %v693_v63  ;;  %v815_v63 = vmul.f32 %v4757_v20, %v3348_v0  ;;  %v609_v31 = vadd.f32 %v3271_v15, %v595_v37  ;;  %v1102_v24 = vmul.f32 %v4760_v53, %v3175_v27 }
 0x25d   :  { %v905_v46 = vadd.f32 %v903_v2, %v893_v47  ;;  %v892_v25 = vadd.f32 %v890_v49, %v880_v28  ;;  %v805_v5 = vadd.f32 %v803_v30, %v793_v44  ;;  %v1103_v26 = vmul.f32 %v4762_v56, %v3179_v14  ;;  %v4766_v28 = vld [vmem:[#allocation44_spill] sm:$0xff]  ;;  %v4767_v56 = vld [vmem:[#allocation45_spill] sm:$0xff] }
 0x25e   :  { %v717_v54 = vadd.f32 %v3277_v50, %v705_v17  ;;  %v914_v20 = vmul.f32 %v4763_v32, %v3185_v6  ;;  %v1003_v15 = vmul.f32 %v4764_v13, %v3273_v10  ;;  %v1004_v37 = vadd.f32 %v1002_v42, %v992_v55  ;;  %v4765_v17 = vld [vmem:[#allocation73_spill] sm:$0xff] }
 0x25f   :  { %v3413_v9 = vpop.permute.xlu1 %1259  ;;  %v904_v50 = vadd.f32 %v902_v57, %v892_v25  ;;  %v817_v2 = vadd.f32 %v815_v63, %v805_v5  ;;  %v927_v47 = vmul.f32 %v4765_v17, %v3348_v0  ;;  %v594_v44 = vadd.f32 %v592_v18, %v3359_v34  ;;  %v4769_v55 = vld [vmem:[#allocation97_spill] sm:$0xff]  ;;  %v4770_v57 = vld [vmem:[#allocation91_spill] sm:$0xff]  ;;  %v3448_v34 = vpop.permute.xlu0 %1301 }
 0x260   :  { %v704_v30 = vadd.f32 %v702_v52, %v692_v16  ;;  %v621_v53 = vmul.f32 %v4766_v28, %v609_v31  ;;  %v727_v3 = vmul.f32 %v4767_v56, %v717_v54  ;;  %v917_v1 = vadd.f32 %v915_v29, %v905_v46  ;;  %4771 = vst [vmem:[#allocation44_spill] sm:$0xff] %v3448_v34  ;;  %v4772_v16 = vld [vmem:[#allocation93_spill] sm:$0xff] }
 0x261   :  { %v1104_v32 = vadd.f32 %v1102_v24, %v1092_v60  ;;  %v1014_v13 = vmul.f32 %v4768_v11, %v3266_v41  ;;  %v1115_v5 = vmul.f32 %v4769_v55, %v3273_v10  ;;  %v1105_v42 = vadd.f32 %v1103_v26, %v1093_v45  ;;  %v4805_v11 = vld [vmem:[#allocation121_spill] sm:$0xff] }
 0x262   :  { %v1193_v63 = vmul.f32 %v4770_v57, %v3177_v33  ;;  %v916_v25 = vadd.f32 %v914_v20, %v904_v50  ;;  %v1005_v17 = vadd.f32 %v1003_v15, %v993_v40  ;;  %v1202_v18 = vmul.f32 %v4772_v16, %v3173_v58  ;;  %v4773_v40 = vld [vmem:[#allocation96_spill] sm:$0xff]  ;;  %v4774_v15 = vld [vmem:[#allocation58_spill] sm:$0xff]  ;;  %v4783_v57 = vld [vmem:[#allocation137_spill] sm:$0xff] }
 0x263   :  { %v938_v60 = vmul.f32 %v3093_v22, %v3192_v12  ;;  %v829_v29 = vadd.f32 %v3291_v19, %v817_v2  ;;  %v929_v56 = vadd.f32 %v927_v47, %v917_v1  ;;  %v608_v52 = vadd.f32 %v3232_v39, %v594_v44  ;;  %v4775_v1 = vld [vmem:[#allocation103_spill] sm:$0xff]  ;;  %v4777_v2 = vld [vmem:[#allocation66_spill] sm:$0xff] }
 0x264   :  { %v3437_v49 = vpop.permute.xlu1 %1355  ;;  %v716_v26 = vadd.f32 %v3236_v21, %v704_v30  ;;  %v623_v45 = vadd.f32 8e-08, %v621_v53  ;;  %v729_v31 = vadd.f32 8e-08, %v727_v3  ;;  %v1016_v54 = vadd.f32 %v1014_v13, %v1004_v37  ;;  %v4776_v13 = vld [vmem:[#allocation101_spill] sm:$0xff]  ;;  %v4778_v30 = vld [vmem:[#allocation106_spill] sm:$0xff] }
 0x265   :  { %v1114_v20 = vmul.f32 %v4773_v40, %v3181_v8  ;;  %v1117_v46 = vadd.f32 %v1115_v5, %v1105_v42  ;;  %v814_v50 = vmul.f32 %v4774_v15, %v3398_v51  ;;  %v1192_v19 = vmul.f32 %v3157_v7, %v3166_v59  ;;  %v3478_v5 = vpop.permute.xlu0 %1319  ;;  %v4780_v42 = vld [vmem:[#allocation37_spill] sm:$0xff]  ;;  %v4781_v16 = vld [vmem:[#allocation46_spill] sm:$0xff] }
 0x266   :  { %v1314_v39 = vmul.f32 %v4775_v1, %v3173_v58  ;;  %v1203_v21 = vmul.f32 %v3183_v61, %v3168_v38  ;;  %v1017_v3 = vadd.f32 %v3342_v62, %v1005_v17  ;;  %v1304_v53 = vmul.f32 %v4776_v13, %v3166_v59  ;;  %4779 = vst [vmem:[#allocation45_spill] sm:$0xff] %v3478_v5  ;;  %v4782_v17 = vld [vmem:[#allocation134_spill] sm:$0xff]  ;;  %v4809_v15 = vld [vmem:[#allocation129_spill] sm:$0xff] }
 0x267   :  { %v926_v37 = vmul.f32 %v3081_v48, %v3398_v51  ;;  %v839_v47 = vmul.f32 %v4777_v2, %v829_v29  ;;  %v941_v44 = vadd.f32 %v3354_v43, %v929_v56  ;;  %v1027_v28 = vmul.f32 %v4778_v30, %v3334_v36  ;;  %v4784_v43 = vld [vmem:[#allocation99_spill] sm:$0xff]  ;;  %v4806_v30 = vld [vmem:[#allocation112_spill] sm:$0xff] }
 0x268   :  { %v620_v1 = vmul.f32 %v4780_v42, %v608_v52  ;;  %v726_v7 = vmul.f32 %v4781_v16, %v716_v26  ;;  %vm731_vm0 = vcmp.gt.f32.partialorder %v729_v31, %v623_v45  ;;  %v1116_v62 = vadd.f32 %v1114_v20, %v1104_v32  ;;  %v4785_v16 = vld [vmem:[#allocation127_spill] sm:$0xff] }
 0x269   :  { %v3459_v24 = vpop.permute.xlu1 %1055  ;;  %v1028_v13 = vadd.f32 %v4782_v17, %v1016_v54  ;;  %v3484_v61 = vadd.f32 %v3402_v35, %v1117_v46  ;;  %v816_v29 = vadd.f32 %v814_v50, %v4783_v57  ;;  %v1215_v56 = vmul.f32 %v4784_v43, %v3179_v14  ;;  %v4786_v35 = vld [vmem:[#allocation116_spill] sm:$0xff] }
 0x26a   :  { %v1204_v40 = vadd.f32 %v1202_v18, %v1192_v19  ;;  %v3491_v55 = vadd.f32 %v1314_v39, %v1304_v53  ;;  %v1205_v52 = vadd.f32 %v1203_v21, %v1193_v63  ;;  %v1214_v26 = vmul.f32 %v4785_v16, %v3175_v27  ;;  %v4787_v18 = vld [vmem:[#allocation104_spill] sm:$0xff]  ;;  %v4789_v21 = vld [vmem:[#allocation131_spill] sm:$0xff] }
 0x26b   :  { %v928_v32 = vadd.f32 %v926_v37, %v916_v25  ;;  %v3496_v54 = vsel %vm731_vm0, %v729_v31, %v623_v45  ;;  %v951_v20 = vmul.f32 %v4786_v35, %v941_v44  ;;  %v1029_v46 = vadd.f32 %v1027_v28, %v1017_v3  ;;  %v4788_v63 = vld [vmem:[#allocation108_spill] sm:$0xff]  ;;  %v4790_v53 = vld [vmem:[#allocation83_spill] sm:$0xff]  ;;  %v4791_v3 = vld [vmem:[#allocation110_spill] sm:$0xff] }
 0x26c   :  { %v3499_v57 = vadd.f32 8e-08, %v620_v1  ;;  %v3501_v50 = vadd.f32 8e-08, %v726_v7  ;;  %v3503_v42 = vadd.f32 8e-08, %v839_v47  ;;  %v1315_v19 = vmul.f32 %v4787_v18, %v3168_v38  ;;  %v3516_v47 = vpop.permute.xlu0 %1335 }
 0x26d   :  { %v3487_v2 = vpop.permute.xlu1 %1059  ;;  %v1126_v39 = vmul.f32 %v4788_v63, %v3266_v41  ;;  %v828_v25 = vadd.f32 %v4789_v21, %v816_v29  ;;  %v1039_v37 = vmul.f32 %v4790_v53, %v3348_v0  ;;  %v1217_v17 = vadd.f32 %v1215_v56, %v1205_v52  ;;  %4792 = vst [vmem:[#allocation66_spill] sm:$0xff] %v3516_v47  ;;  %v4793_v29 = vld [vmem:[#allocation6_spill] sm:$0xff]  ;;  %v4794_v56 = vld [vmem:[#allocation133_spill] sm:$0xff]  ;;  %v4810_v38 = vld [vmem:[#allocation8_spill] sm:$0xff] }
 0x26e   :  { %v1226_v1 = vmul.f32 %v4791_v3, %v3181_v8  ;;  %v1305_v7 = vmul.f32 %v3448_v34, %v3177_v33  ;;  %vm843_vm1 = vcmp.gt.f32.partialorder %v3503_v42, %v3496_v54  ;;  %v1216_v28 = vadd.f32 %v1214_v26, %v1204_v40  ;;  %v4796_v40 = vld [vmem:[#allocation62_spill] sm:$0xff] }
 0x26f   :  { %v1238_v35 = vmul.f32 %v4793_v29, %v3266_v41  ;;  %v940_v21 = vadd.f32 %v938_v60, %v928_v32  ;;  %v3524_v18 = vadd.f32 8e-08, %v951_v20  ;;  %v3528_v52 = vmul.f32 %v4794_v56, %v3334_v36  ;;  %v4797_v32 = vld [vmem:[#allocation94_spill] sm:$0xff]  ;;  %v4798_v29 = vld [vmem:[#allocation135_spill] sm:$0xff] }
 0x270   :  { %vm730_vm2 = vcmp.gt.f32.partialorder %v3501_v50, %v3499_v57  ;;  %v4795_v34 = vmov 0   ;;  %v1041_v16 = vadd.f32 %v1039_v37, %v1029_v46  ;;  %v1128_v43 = vadd.f32 %v1126_v39, %v1116_v62  ;;  %v4799_v46 = vld [vmem:[#allocation115_spill] sm:$0xff]  ;;  %v4800_v39 = vld [vmem:[#allocation138_spill] sm:$0xff]  ;;  %v4801_v37 = vld [vmem:[#allocation117_spill] sm:$0xff] }
 0x271   :  { %v3534_v3 = vsel %vm731_vm0, 1, %v4795_v34  ;;  %v838_v26 = vmul.f32 %v4796_v40, %v828_v25  ;;  %v3542_v60 = vsel %vm843_vm1, %v3503_v42, %v3496_v54  ;;  %v1150_v20 = vmul.f32 %v4797_v32, %v3398_v51  ;;  %v4804_v63 = vld [vmem:[#allocation118_spill] sm:$0xff] }
 0x272   :  { %v3520_v44 = vpop.permute.xlu1 %1271  ;;  %v1262_v56 = vmul.f32 %v4798_v29, %v3398_v51  ;;  %v1228_v45 = vadd.f32 %v1226_v1, %v1216_v28  ;;  %v1317_v31 = vadd.f32 %v1315_v19, %v1305_v7  ;;  %v1038_v62 = vmul.f32 %v4799_v46, %v3398_v51  ;;  %v4802_v29 = vld [vmem:[#allocation114_spill] sm:$0xff]  ;;  %v4803_v7 = vld [vmem:[#allocation113_spill] sm:$0xff]  ;;  %v3572_v46 = vpop.permute.xlu0 %1359 }
 0x273   :  { %v3552_v25 = vmul.f32 %v4800_v39, %v3192_v12  ;;  %v1138_v40 = vmul.f32 %v4801_v37, %v3185_v6  ;;  %v3561_v32 = vsel %vm730_vm2, %v3501_v50, %v3499_v57  ;;  %v950_v1 = vmul.f32 %v4802_v29, %v940_v21  ;;  %v4807_v29 = vld [vmem:[#allocation126_spill] sm:$0xff]  ;;  %v4808_v21 = vld [vmem:[#allocation4_spill] sm:$0xff] }
 0x274   :  { %v1327_v28 = vmul.f32 %v4803_v7, %v3179_v14  ;;  %v1339_v39 = vmul.f32 %v3516_v47, %v3273_v10  ;;  %v1139_v37 = vmul.f32 %v4804_v63, %v3334_v36  ;;  %v1050_v53 = vmul.f32 %v4805_v11, %v3192_v12 }
 0x275   :  { %v1227_v22 = vmul.f32 %v4806_v30, %v3273_v10  ;;  %v1051_v48 = vmul.f32 %v4808_v21, %v4807_v29  ;;  %v1250_v7 = vmul.f32 %v4809_v15, %v3185_v6  ;;  %v3582_v14 = vadd.f32 8e-08, %v838_v26  ;;  %v4811_v21 = vld [vmem:[#allocation128_spill] sm:$0xff] }
 0x276   :  { %vm955_vm3 = vcmp.gt.f32.partialorder %v3524_v18, %v3542_v60  ;;  %v1040_v47 = vadd.f32 %v1038_v62, %v1028_v13  ;;  %v1329_v63 = vadd.f32 %v1327_v28, %v1317_v31  ;;  %v1240_v58 = vadd.f32 %v1238_v35, %v1228_v45  ;;  %v4812_v13 = vld [vmem:[#allocation119_spill] sm:$0xff]  ;;  %v4813_v28 = vld [vmem:[#allocation136_spill] sm:$0xff] }
 0x277   :  { %v3564_v19 = vpop.permute.xlu1 %1367  ;;  %v1351_v11 = vmul.f32 %v4810_v38, %v3295_v23  ;;  %v1326_v30 = vmul.f32 %v3478_v5, %v3175_v27  ;;  %v1140_v10 = vadd.f32 %v1138_v40, %v1128_v43  ;;  %v1151_v59 = vmul.f32 %v4811_v21, %v3348_v0  ;;  %v4814_v43 = vld [vmem:[#allocation139_spill] sm:$0xff]  ;;  %v3601_v27 = vpop.permute.xlu0 %1371 }
 0x278   :  { %vm842_vm4 = vcmp.gt.f32.partialorder %v3582_v14, %v3561_v32  ;;  %v1341_v26 = vadd.f32 %v1339_v39, %v1329_v63  ;;  %v1141_v15 = vadd.f32 %v1139_v37, %v3484_v61  ;;  %v1239_v31 = vmul.f32 %v4812_v13, %v3295_v23  ;;  %v4815_v63 = vld [vmem:[#allocation10_spill] sm:$0xff] }
 0x279   :  { %v1052_v35 = vadd.f32 %v1050_v53, %v1040_v47  ;;  %v1252_v62 = vadd.f32 %v1250_v7, %v1240_v58  ;;  %v1162_v38 = vmul.f32 %v4813_v28, %v3192_v12  ;;  %v1163_v40 = vmul.f32 %v4814_v43, %v4807_v29 }
 0x27a   :  { %v1053_v5 = vadd.f32 %v1051_v48, %v1041_v16  ;;  %v1229_v21 = vadd.f32 %v1227_v22, %v1217_v17  ;;  %v1338_v39 = vmul.f32 %v4815_v63, %v3181_v8  ;;  %v1353_v61 = vadd.f32 %v1351_v11, %v1341_v26  ;;  %v4816_v63 = vld [vmem:[#allocation132_spill] sm:$0xff] }
 0x27b   :  { %v3610_v58 = vsel %vm842_vm4, %v3582_v14, %v3561_v32  ;;  %v1153_v53 = vadd.f32 %v1151_v59, %v1141_v15  ;;  %v1062_v47 = vmul.f32 %v3459_v24, %v1052_v35  ;;  %v1152_v48 = vadd.f32 %v1150_v20, %v1140_v10 }
 0x27c   :  { %v1168_v45 = vpop.permute.xlu1 %1167  ;;  %v1063_v37 = vmul.f32 %v3487_v2, %v1053_v5  ;;  %v1328_v22 = vadd.f32 %v1326_v30, %v3491_v55  ;;  %v1363_v16 = vmul.f32 %v3572_v46, %v3334_v36  ;;  %v1241_v17 = vadd.f32 %v1239_v31, %v1229_v21 }
 0x27d   :  { %v952_v11 = vadd.f32 8e-08, %v950_v1  ;;  %v1264_v26 = vadd.f32 %v1262_v56, %v1252_v62  ;;  %v1350_v13 = vmul.f32 %v4816_v63, %v3266_v41  ;;  %v1164_v28 = vadd.f32 %v1162_v38, %v1152_v48  ;;  %v3624_v56 = vpop.permute.xlu0 %1379 }
 0x27e   :  { %v1165_v43 = vadd.f32 %v1163_v40, %v1153_v53  ;;  %v1340_v59 = vadd.f32 %v1338_v39, %v1328_v22  ;;  %v1365_v15 = vadd.f32 %v1363_v16, %v1353_v61  ;;  %v1263_v24 = vmul.f32 %v3413_v9, %v3348_v0  ;;  %4817 = vst [vmem:[#allocation37_spill] sm:$0xff] %v3624_v56 }
 0x27f   :  { %vm954_vm5 = vcmp.gt.f32.partialorder %v952_v11, %v3610_v58  ;;  %v1064_v10 = vadd.f32 8e-08, %v1062_v47  ;;  %v1065_v55 = vadd.f32 8e-08, %v1063_v37  ;;  %v1174_v30 = vmul.f32 %v1168_v45, %v1164_v28 }
 0x280   :  { %v1172_v7 = vpop.permute.xlu1 %1171  ;;  %v1375_v2 = vmul.f32 %v3601_v27, %v3348_v0  ;;  %v1253_v20 = vadd.f32 %v3528_v52, %v1241_v17  ;;  %v1362_v38 = vmul.f32 %v3437_v49, %v3185_v6  ;;  %v957_v1 = vsel %vm955_vm3, %v3524_v18, %v3542_v60 }
 0x281   :  { %v1175_v5 = vmul.f32 %v1172_v7, %v1165_v43  ;;  %v1276_v21 = vadd.f32 %v3552_v25, %v1264_v26  ;;  %v1352_v31 = vadd.f32 %v1350_v13, %v1340_v59  ;;  %v956_v35 = vsel %vm954_vm5, %v952_v11, %v3610_v58  ;;  %v1396_v48 = vpop.permute.xlu0 %1395 }
 0x282   :  { %v1275_v45 = vmul.f32 %v3520_v44, %v4807_v29  ;;  %v1265_v62 = vadd.f32 %v1263_v24, %v1253_v20  ;;  %v1374_v28 = vmul.f32 %v3564_v19, %v3398_v51  ;;  %v1377_v43 = vadd.f32 %v1375_v2, %v1365_v15 }
 0x283   :  { %vm1066_vm6 = vcmp.gt.f32.partialorder %v1064_v10, %v956_v35  ;;  %vm1067_vm7 = vcmp.gt.f32.partialorder %v1065_v55, %v957_v1  ;;  %v1176_v25 = vadd.f32 8e-08, %v1174_v30  ;;  %v1177_v13 = vadd.f32 8e-08, %v1175_v5 }
 0x284   :  { %v1364_v39 = vadd.f32 %v1362_v38, %v1352_v31  ;;  %v734_v53 = vsel %vm730_vm2, 1, %v4795_v34  ;;  %v847_v47 = vsel %vm843_vm1, 2, %v3534_v3  ;;  %v1277_v37 = vadd.f32 %v1275_v45, %v1265_v62 }
 0x285   :  { %v3640_v52 = vpop.permute.xlu1 %1383  ;;  %v1068_v16 = vsel %vm1066_vm6, %v1064_v10, %v956_v35  ;;  %v1069_v17 = vsel %vm1067_vm7, %v1065_v55, %v957_v1  ;;  %v1286_v26 = vmul.f32 %v3417_v4, %v1276_v21  ;;  %v1386_v34 = vmul.f32 %v3624_v56, %v3192_v12  ;;  %v4844_v56 = vld [vmem:[#allocation43_spill] sm:$0xff] }
 0x286   :  { %v1387_v40 = vmul.f32 %v3640_v52, %v4807_v29  ;;  %v1376_v22 = vadd.f32 %v1374_v28, %v1364_v39  ;;  %vm1178_vm8 = vcmp.gt.f32.partialorder %v1176_v25, %v1068_v16  ;;  %vm1179_vm9 = vcmp.gt.f32.partialorder %v1177_v13, %v1069_v17  ;;  %v4818_v39 = vld [vmem:[#allocation11_spill] sm:$0xff]  ;;  %v4853_v29 = vld [vmem:[#allocation48_spill] sm:$0xff] }
 0x287   :  { %v846_v54 = vsel %vm842_vm4, 2, %v734_v53  ;;  %v959_v50 = vsel %vm955_vm3, 3, %v847_v47  ;;  %v1180_v4 = vsel %vm1178_vm8, %v1176_v25, %v1068_v16  ;;  %v1181_v15 = vsel %vm1179_vm9, %v1177_v13, %v1069_v17  ;;  %v4819_v47 = vld [vmem:[#allocation31_spill] sm:$0xff]  ;;  %v4820_v17 = vld [vmem:[#allocation33_spill] sm:$0xff] }
 0x288   :  { %v1389_v61 = vadd.f32 %v1387_v40, %v1377_v43  ;;  %v1071_v3 = vsel %vm1067_vm7, 4, %v959_v50  ;;  %v1388_v24 = vadd.f32 %v1386_v34, %v1376_v22  ;;  %v1288_v20 = vadd.f32 8e-08, %v1286_v26  ;;  %v4821_v26 = vld [vmem:[#allocation35_spill] sm:$0xff] }
 0x289   :  { %v1183_v30 = vsel %vm1179_vm9, 5, %v1071_v3  ;;  %v958_v14 = vsel %vm954_vm5, 3, %v846_v54  ;;  %v4531_v58 = vmov 0.0  }
 0x28a   :  { %v1284_v7 = vpop.permute.xlu1 %1283  ;;  %v1399_v59 = vmul.f32 %v1396_v48, %v1389_v61  ;;  %v1070_v18 = vsel %vm1066_vm6, 4, %v958_v14  ;;  %vm1290_vm12 = vcmp.gt.f32.partialorder %v1288_v20, %v1180_v4 }
 0x28b   :  { %v1287_v57 = vmul.f32 %v1284_v7, %v1277_v37  ;;  %v1182_v60 = vsel %vm1178_vm8, 5, %v1070_v18  ;;  %v1292_v45 = vsel %vm1290_vm12, %v1288_v20, %v1180_v4  ;;  %v4822_v4 = vld [vmem:[#allocation29_spill] sm:$0xff]  ;;  %v4824_v20 = vld [vmem:[#allocation36_spill] sm:$0xff] }
 0x28c   :  { %v1401_v5 = vadd.f32 8e-08, %v1399_v59  ;;  %v1294_v62 = vsel %vm1290_vm12, 6, %v1182_v60  ;;  %v4827_v60 = vld [vmem:[#allocation42_spill] sm:$0xff] }
 0x28d   :  { %v1289_v42 = vadd.f32 8e-08, %v1287_v57 }
 0x28f   :  { %vm1291_vm10 = vcmp.gt.f32.partialorder %v1289_v42, %v1181_v15  ;;  %v1392_v2 = vpop.permute.xlu1 %1391 }
 0x290   :  { %v1293_v32 = vsel %vm1291_vm10, %v1289_v42, %v1181_v15  ;;  %v1295_v38 = vsel %vm1291_vm10, 6, %v1183_v30  ;;  %v1398_v21 = vmul.f32 %v1392_v2, %v1388_v24  ;;  %v4823_v24 = vld [vmem:[#allocation13_spill] sm:$0xff] }
 0x291   :  { %vm1403_vm11 = vcmp.gt.f32.partialorder %v1401_v5, %v1293_v32 }
 0x292   :  { %v1405_v55 = vsel %vm1403_vm11, %v1401_v5, %v1293_v32  ;;  %v1407_v1 = vsel %vm1403_vm11, 7, %v1295_v38  ;;  %v1400_v31 = vadd.f32 8e-08, %v1398_v21  ;;  %v4825_v32 = vld [vmem:[#allocation38_spill] sm:$0xff]  ;;  %v4826_v21 = vld [vmem:[#allocation40_spill] sm:$0xff] }
 0x293   :  { %vm1413_vm13 = vcmp.eq.s32.totalorder %v1407_v1, 0  ;;  %vm1419_vm14 = vcmp.eq.s32.totalorder %v1407_v1, 1  ;;  %vm1425_vm15 = vcmp.eq.s32.totalorder %v1407_v1, 2  ;;  %vm1431_vm0 = vcmp.eq.s32.totalorder %v1407_v1, 3 }
 0x294   :  { %v3673_v11 = vsel %vm1413_vm13, 1.0, %v4531_v58  ;;  %vm1437_vm1 = vcmp.eq.s32.totalorder %v1407_v1, 4  ;;  %vm1443_vm2 = vcmp.eq.s32.totalorder %v1407_v1, 5  ;;  %vm1449_vm3 = vcmp.eq.s32.totalorder %v1407_v1, 6 }
 0x295   :  { %2295 = vrcp.f32 %v1405_v55  ;;  %v3676_v10 = vsel %vm1419_vm14, 1.0, %v4531_v58  ;;  %v3679_v35 = vsel %vm1425_vm15, 1.0, %v4531_v58  ;;  %v3683_v28 = vsel %vm1431_vm0, 1.0, %v4531_v58 }
 0x296   :  { %v3686_v43 = vsel %vm1437_vm1, 1.0, %v4531_v58  ;;  %vm1455_vm4 = vcmp.eq.s32.totalorder %v1407_v1, 7  ;;  %vm1402_vm5 = vcmp.gt.f32.partialorder %v1400_v31, %v1292_v45  ;;  %v3689_v40 = vsel %vm1443_vm2, 1.0, %v4531_v58 }
 0x297   :  { %v3692_v25 = vsel %vm1449_vm3, 1.0, %v4531_v58  ;;  %v1406_v13 = vsel %vm1402_vm5, 7, %v1294_v62  ;;  %v1463_v61 = vmul.f32 %v3673_v11, %v4818_v39  ;;  %v1404_v53 = vsel %vm1402_vm5, %v1400_v31, %v1292_v45  ;;  %v4828_v31 = vld [vmem:[#allocation14_spill] sm:$0xff] }
 0x298   :  { %vm1412_vm6 = vcmp.eq.s32.totalorder %v1406_v13, 0  ;;  %vm1418_vm7 = vcmp.eq.s32.totalorder %v1406_v13, 1  ;;  %v1465_v37 = vmul.f32 %v3676_v10, %v4819_v47  ;;  %v3699_v48 = vsel %vm1455_vm4, 1.0, %v4531_v58  ;;  %v4831_v47 = vld [vmem:[#allocation28_spill] sm:$0xff] }
 0x299   :  { %v3702_v22 = vsel %vm1412_vm6, 1.0, %v4531_v58  ;;  %vm1424_vm8 = vcmp.eq.s32.totalorder %v1406_v13, 2  ;;  %vm1430_vm9 = vcmp.eq.s32.totalorder %v1406_v13, 3  ;;  %v3705_v16 = vsel %vm1418_vm7, 1.0, %v4531_v58 }
 0x29a   :  { %vm1436_vm10 = vcmp.eq.s32.totalorder %v1406_v13, 4  ;;  %vm1442_vm11 = vcmp.eq.s32.totalorder %v1406_v13, 5  ;;  %vm1448_vm12 = vcmp.eq.s32.totalorder %v1406_v13, 6  ;;  %2297 = vrcp.f32 %v1404_v53 }
 0x29b   :  { %vm1454_vm13 = vcmp.eq.s32.totalorder %v1406_v13, 7  ;;  %v1469_v7 = vmul.f32 %v3679_v35, %v4820_v17  ;;  %v1473_v59 = vmul.f32 %v3683_v28, %v4821_v26  ;;  %v3712_v57 = vsel %vm1424_vm8, 1.0, %v4531_v58  ;;  %v4829_v13 = vld [vmem:[#allocation16_spill] sm:$0xff] }
 0x29c   :  { %v3715_v34 = vsel %vm1430_vm9, 1.0, %v4531_v58  ;;  %v3718_v54 = vsel %vm1436_vm10, 1.0, %v4531_v58  ;;  %v1467_v50 = vadd.f32 %v1465_v37, %v1463_v61  ;;  %v3721_v42 = vsel %vm1442_vm11, 1.0, %v4531_v58  ;;  %v4830_v61 = vld [vmem:[#allocation12_spill] sm:$0xff] }
 0x29d   :  { %v3724_v3 = vsel %vm1448_vm12, 1.0, %v4531_v58  ;;  %v1462_v15 = vmul.f32 %v3702_v22, %v4822_v4  ;;  %v1464_v30 = vmul.f32 %v3705_v16, %v4823_v24  ;;  %v3731_v5 = vsel %vm1454_vm13, 1.0, %v4531_v58 }
 0x29e   :  { %v1471_v2 = vadd.f32 %v1469_v7, %v1467_v50  ;;  %v1477_v14 = vmul.f32 %v3686_v43, %v4824_v20  ;;  %v1481_v38 = vmul.f32 %v3689_v40, %v4825_v32  ;;  %v1485_v18 = vmul.f32 %v3692_v25, %v4826_v21  ;;  %v4832_v7 = vld [vmem:[#allocation18_spill] sm:$0xff]  ;;  %v4833_v50 = vld [vmem:[#allocation20_spill] sm:$0xff] }
 0x29f   :  { %v1489_v55 = vmul.f32 %v3699_v48, %v4827_v60  ;;  %v1466_v1 = vadd.f32 %v1464_v30, %v1462_v15  ;;  %v1468_v45 = vmul.f32 %v3712_v57, %v4828_v31  ;;  %v1472_v39 = vmul.f32 %v3715_v34, %v4829_v13  ;;  %v4834_v15 = vld [vmem:[#allocation22_spill] sm:$0xff]  ;;  %v4837_v31 = vld [vmem:[#allocation32_spill] sm:$0xff] }
 0x2a0   :  { %v1475_v62 = vadd.f32 %v1473_v59, %v1471_v2  ;;  %v1532_v53 = vmul.f32 %v3673_v11, %v4830_v61  ;;  %v1534_v37 = vmul.f32 %v3676_v10, %v4831_v47  ;;  %v1476_v26 = vmul.f32 %v3718_v54, %v4832_v7  ;;  %v4835_v2 = vld [vmem:[#allocation24_spill] sm:$0xff]  ;;  %v4836_v21 = vld [vmem:[#allocation30_spill] sm:$0xff]  ;;  %v4839_v47 = vld [vmem:[#allocation27_spill] sm:$0xff] }
 0x2a1   :  { %v1470_v17 = vadd.f32 %v1468_v45, %v1466_v1  ;;  %v1480_v4 = vmul.f32 %v3721_v42, %v4833_v50  ;;  %v1484_v24 = vmul.f32 %v3724_v3, %v4834_v15  ;;  %v1488_v20 = vmul.f32 %v3731_v5, %v4835_v2  ;;  %v4838_v13 = vld [vmem:[#allocation26_spill] sm:$0xff]  ;;  %v4841_v2 = vld [vmem:[#allocation39_spill] sm:$0xff] }
 0x2a2   :  { %v3755_v59 = vpop.eup %2295  ;;  %v1479_v30 = vadd.f32 %v1477_v14, %v1475_v62  ;;  %v1536_v32 = vadd.f32 %v1534_v37, %v1532_v53  ;;  %v1538_v60 = vmul.f32 %v3679_v35, %v4836_v21  ;;  %v1542_v45 = vmul.f32 %v3683_v28, %v4837_v31  ;;  %v4840_v14 = vld [vmem:[#allocation34_spill] sm:$0xff]  ;;  %v4842_v21 = vld [vmem:[#allocation41_spill] sm:$0xff]  ;;  %v4843_v31 = vld [vmem:[#allocation15_spill] sm:$0xff] }
 0x2a3   :  { %v1474_v1 = vadd.f32 %v1472_v39, %v1470_v17  ;;  %v1531_v61 = vmul.f32 %v3702_v22, %v4838_v13  ;;  %v1533_v7 = vmul.f32 %v3705_v16, %v4839_v47  ;;  %v1546_v62 = vmul.f32 %v3686_v43, %v4840_v14  ;;  %v4846_v14 = vld [vmem:[#allocation17_spill] sm:$0xff] }
 0x2a4   :  { %v1483_v50 = vadd.f32 %v1481_v38, %v1479_v30  ;;  %v1540_v15 = vadd.f32 %v1538_v60, %v1536_v32  ;;  %v1550_v53 = vmul.f32 %v3689_v40, %v4841_v2  ;;  %v1554_v39 = vmul.f32 %v3692_v25, %v4842_v21  ;;  %v4845_v30 = vld [vmem:[#allocation47_spill] sm:$0xff] }
 0x2a5   :  { %v1478_v37 = vadd.f32 %v1476_v26, %v1474_v1  ;;  %v1535_v17 = vadd.f32 %v1533_v7, %v1531_v61  ;;  %v1537_v58 = vmul.f32 %v3712_v57, %v4843_v31  ;;  %v1558_v38 = vmul.f32 %v3699_v48, %v4844_v56  ;;  %v4847_v1 = vld [vmem:[#allocation50_spill] sm:$0xff] }
 0x2a6   :  { %v1487_v13 = vadd.f32 %v1485_v18, %v1483_v50  ;;  %v1544_v12 = vadd.f32 %v1542_v45, %v1540_v15  ;;  %v1601_v32 = vmul.f32 %v3673_v11, %v4845_v30  ;;  %v1541_v26 = vmul.f32 %v3715_v34, %v4846_v14  ;;  %v4848_v18 = vld [vmem:[#allocation19_spill] sm:$0xff]  ;;  %v4849_v50 = vld [vmem:[#allocation21_spill] sm:$0xff] }
 0x2a7   :  { %v1482_v60 = vadd.f32 %v1480_v4, %v1478_v37  ;;  %v1539_v47 = vadd.f32 %v1537_v58, %v1535_v17  ;;  %v1603_v2 = vmul.f32 %v3676_v10, %v4847_v1  ;;  %v3783_v61 = vpop.eup %2297  ;;  %v1545_v45 = vmul.f32 %v3718_v54, %v4848_v18  ;;  %v4850_v58 = vld [vmem:[#allocation52_spill] sm:$0xff]  ;;  %v4851_v14 = vld [vmem:[#allocation23_spill] sm:$0xff] }
 0x2a8   :  { %v1491_v7 = vadd.f32 %v1489_v55, %v1487_v13  ;;  %v1548_v21 = vadd.f32 %v1546_v62, %v1544_v12  ;;  %v1549_v56 = vmul.f32 %v3721_v42, %v4849_v50  ;;  %v1607_v37 = vmul.f32 %v3679_v35, %v4850_v58  ;;  %v4852_v55 = vld [vmem:[#allocation54_spill] sm:$0xff]  ;;  %v4857_v58 = vld [vmem:[#allocation56_spill] sm:$0xff] }
 0x2a9   :  { %v1486_v15 = vadd.f32 %v1484_v24, %v1482_v60  ;;  %v1543_v31 = vadd.f32 %v1541_v26, %v1539_v47  ;;  %v1605_v4 = vadd.f32 %v1603_v2, %v1601_v32  ;;  %v1553_v1 = vmul.f32 %v3724_v3, %v4851_v14  ;;  %v4854_v47 = vld [vmem:[#allocation25_spill] sm:$0xff] }
 0x2aa   :  { %v1493_v17 = vmul.f32 %v1491_v7, %v3177_v33  ;;  %v1552_v30 = vadd.f32 %v1550_v53, %v1548_v21  ;;  %v1611_v12 = vmul.f32 %v3683_v28, %v4852_v55  ;;  %v1600_v24 = vmul.f32 %v3702_v22, %v4853_v29  ;;  %v4855_v33 = vld [vmem:[#allocation49_spill] sm:$0xff] }
 0x2ab   :  { %v1490_v62 = vadd.f32 %v1488_v20, %v1486_v15  ;;  %v1547_v13 = vadd.f32 %v1545_v45, %v1543_v31  ;;  %v1609_v18 = vadd.f32 %v1607_v37, %v1605_v4  ;;  %v1557_v26 = vmul.f32 %v3731_v5, %v4854_v47  ;;  %v4856_v2 = vld [vmem:[#allocation9_spill] sm:$0xff]  ;;  %v4858_v31 = vld [vmem:[#allocation51_spill] sm:$0xff] }
 0x2ac   :  { %v1495_v32 = vmul.f32 %v3755_v59, %v1493_v17  ;;  %v1556_v60 = vadd.f32 %v1554_v39, %v1552_v30  ;;  %v1602_v53 = vmul.f32 %v3705_v16, %v4855_v33  ;;  %v1615_v20 = vmul.f32 %v3686_v43, %v4857_v58  ;;  %v4859_v30 = vld [vmem:[#allocation59_spill] sm:$0xff]  ;;  %v4866_v58 = vld [vmem:[#allocation122_spill] sm:$0xff] }
 0x2ad   :  { %v1492_v7 = vmul.f32 %v1490_v62, %v4856_v2  ;;  %v1551_v21 = vadd.f32 %v1549_v56, %v1547_v13  ;;  %v1613_v50 = vadd.f32 %v1611_v12, %v1609_v18  ;;  %v1606_v39 = vmul.f32 %v3712_v57, %v4858_v31  ;;  %v4860_v56 = vld [vmem:[#allocation120_spill] sm:$0xff]  ;;  %v4861_v12 = vld [vmem:[#allocation61_spill] sm:$0xff]  ;;  %v4864_v2 = vld [vmem:[#allocation55_spill] sm:$0xff] }
 0x2ae   :  { %v3806_v45 = vadd.f32 1e-05, %v1495_v32  ;;  %v1560_v15 = vadd.f32 %v1558_v38, %v1556_v60  ;;  %v1604_v29 = vadd.f32 %v1602_v53, %v1600_v24  ;;  %v1619_v14 = vmul.f32 %v3689_v40, %v4859_v30  ;;  %v4862_v38 = vld [vmem:[#allocation53_spill] sm:$0xff]  ;;  %v4869_v30 = vld [vmem:[#allocation68_spill] sm:$0xff] }
 0x2af   :  { %v1494_v4 = vmul.f32 %v3783_v61, %v1492_v7  ;;  %v1555_v37 = vadd.f32 %v1553_v1, %v1551_v21  ;;  %v1617_v17 = vadd.f32 %v1615_v20, %v1613_v50  ;;  %v1623_v62 = vmul.f32 %v3692_v25, %v4861_v12  ;;  %v4863_v1 = vld [vmem:[#allocation98_spill] sm:$0xff]  ;;  %v4865_v21 = vld [vmem:[#allocation67_spill] sm:$0xff]  ;;  %v4868_v31 = vld [vmem:[#allocation57_spill] sm:$0xff] }
 0x2b0   :  { %1500 = vadd.xlane.f32.xlu0 %v3806_v45  ;;  %v1562_v55 = vmul.f32 %v1560_v15, %v4860_v56  ;;  %v1608_v13 = vadd.f32 %v1606_v39, %v1604_v29  ;;  %v1610_v18 = vmul.f32 %v3715_v34, %v4862_v38  ;;  %v1670_v47 = vmul.f32 %v3673_v11, %v4863_v1  ;;  %v4867_v29 = vld [vmem:[#allocation63_spill] sm:$0xff]  ;;  %v4870_v12 = vld [vmem:[#allocation58_spill] sm:$0xff] }
 0x2b1   :  { %v3819_v24 = vadd.f32 1e-05, %v1494_v4  ;;  %v1559_v32 = vadd.f32 %v1557_v26, %v1555_v37  ;;  %v1621_v60 = vadd.f32 %v1619_v14, %v1617_v17  ;;  %v1614_v7 = vmul.f32 %v3718_v54, %v4864_v2  ;;  %v4874_v2 = vld [vmem:[#allocation124_spill] sm:$0xff] }
 0x2b2   :  { %v1564_v33 = vmul.f32 %v3755_v59, %v1562_v55  ;;  %v1612_v53 = vadd.f32 %v1610_v18, %v1608_v13  ;;  %v1672_v50 = vmul.f32 %v3676_v10, %v4865_v21  ;;  %v1627_v26 = vmul.f32 %v3699_v48, %v4867_v29  ;;  %v4875_v21 = vld [vmem:[#allocation60_spill] sm:$0xff] }
 0x2b3   :  { %1498 = vadd.xlane.f32.xlu1 %v3819_v24  ;;  %v1561_v20 = vmul.f32 %v1559_v32, %v4866_v58  ;;  %v1625_v15 = vadd.f32 %v1623_v62, %v1621_v60  ;;  %v1618_v39 = vmul.f32 %v3721_v42, %v4868_v31  ;;  %v1676_v14 = vmul.f32 %v3679_v35, %v4869_v30  ;;  %v4871_v62 = vld [vmem:[#allocation69_spill] sm:$0xff]  ;;  %v4872_v60 = vld [vmem:[#allocation64_spill] sm:$0xff]  ;;  %v4876_v58 = vld [vmem:[#allocation70_spill] sm:$0xff] }
 0x2b4   :  { %v3834_v4 = vadd.f32 1e-05, %v1564_v33  ;;  %v1616_v37 = vadd.f32 %v1614_v7, %v1612_v53  ;;  %v1674_v17 = vadd.f32 %v1672_v50, %v1670_v47  ;;  %v1622_v13 = vmul.f32 %v3724_v3, %v4870_v12  ;;  %v4873_v47 = vld [vmem:[#allocation65_spill] sm:$0xff]  ;;  %v4877_v31 = vld [vmem:[#allocation100_spill] sm:$0xff] }
 0x2b5   :  { %v1563_v56 = vmul.f32 %v3783_v61, %v1561_v20  ;;  %v1629_v55 = vadd.f32 %v1627_v26, %v1625_v15  ;;  %v1680_v38 = vmul.f32 %v3683_v28, %v4871_v62  ;;  %v1669_v1 = vmul.f32 %v3702_v22, %v4872_v60  ;;  %v4880_v60 = vld [vmem:[#allocation71_spill] sm:$0xff] }
 0x2b6   :  { %1569 = vadd.xlane.f32.xlu0 %v3834_v4  ;;  %v1620_v18 = vadd.f32 %v1618_v39, %v1616_v37  ;;  %v1678_v32 = vadd.f32 %v1676_v14, %v1674_v17  ;;  %v1671_v33 = vmul.f32 %v3705_v16, %v4873_v47  ;;  %v1626_v50 = vmul.f32 %v3731_v5, %v4875_v21  ;;  %v4878_v17 = vld [vmem:[#allocation72_spill] sm:$0xff]  ;;  %v4879_v14 = vld [vmem:[#allocation102_spill] sm:$0xff] }
 0x2b7   :  { %v3848_v53 = vadd.f32 1e-05, %v1563_v56  ;;  %v1631_v7 = vmul.f32 %v1629_v55, %v4874_v2  ;;  %v1684_v20 = vmul.f32 %v3686_v43, %v4876_v58  ;;  %v1675_v39 = vmul.f32 %v3712_v57, %v4877_v31  ;;  %v4887_v31 = vld [vmem:[#allocation109_spill] sm:$0xff] }
 0x2b8   :  { %v1624_v15 = vadd.f32 %v1622_v13, %v1620_v18  ;;  %v1682_v29 = vadd.f32 %v1680_v38, %v1678_v32  ;;  %v1673_v26 = vadd.f32 %v1671_v33, %v1669_v1  ;;  %v1688_v30 = vmul.f32 %v3689_v40, %v4878_v17  ;;  %v4881_v18 = vld [vmem:[#allocation73_spill] sm:$0xff]  ;;  %v4882_v1 = vld [vmem:[#allocation75_spill] sm:$0xff]  ;;  %v4883_v33 = vld [vmem:[#allocation80_spill] sm:$0xff] }
 0x2b9   :  { %1567 = vadd.xlane.f32.xlu1 %v3848_v53  ;;  %v1633_v37 = vmul.f32 %v3755_v59, %v1631_v7  ;;  %v1679_v56 = vmul.f32 %v3715_v34, %v4879_v14  ;;  %v1739_v13 = vmul.f32 %v3673_v11, %v4880_v60  ;;  %v1692_v32 = vmul.f32 %v3692_v25, %v4881_v18  ;;  %v4884_v7 = vld [vmem:[#allocation123_spill] sm:$0xff]  ;;  %v4888_v17 = vld [vmem:[#allocation82_spill] sm:$0xff] }
 0x2ba   :  { %v1628_v55 = vadd.f32 %v1626_v50, %v1624_v15  ;;  %v1686_v12 = vadd.f32 %v1684_v20, %v1682_v29  ;;  %v1677_v62 = vadd.f32 %v1675_v39, %v1673_v26  ;;  %v1696_v47 = vmul.f32 %v3699_v48, %v4882_v1  ;;  %v4885_v20 = vld [vmem:[#allocation105_spill] sm:$0xff]  ;;  %v4886_v29 = vld [vmem:[#allocation107_spill] sm:$0xff] }
 0x2bb   :  { %v3865_v38 = vadd.f32 1e-05, %v1633_v37  ;;  %v1741_v2 = vmul.f32 %v3676_v10, %v4883_v33  ;;  %v1683_v15 = vmul.f32 %v3718_v54, %v4885_v20  ;;  %v1687_v26 = vmul.f32 %v3721_v42, %v4886_v29  ;;  %v4891_v33 = vld [vmem:[#allocation76_spill] sm:$0xff]  ;;  %v4892_v20 = vld [vmem:[#allocation78_spill] sm:$0xff] }
 0x2bc   :  { %v1630_v21 = vmul.f32 %v1628_v55, %v4884_v7  ;;  %v1690_v58 = vadd.f32 %v1688_v30, %v1686_v12  ;;  %v1681_v50 = vadd.f32 %v1679_v56, %v1677_v62  ;;  %v1691_v39 = vmul.f32 %v3724_v3, %v4887_v31  ;;  %v4889_v56 = vld [vmem:[#allocation77_spill] sm:$0xff]  ;;  %v4890_v62 = vld [vmem:[#allocation111_spill] sm:$0xff] }
 0x2bd   :  { %1638 = vadd.xlane.f32.xlu0 %v3865_v38  ;;  %v1743_v37 = vadd.f32 %v1741_v2, %v1739_v13  ;;  %v1745_v14 = vmul.f32 %v3679_v35, %v4888_v17  ;;  %v1738_v12 = vmul.f32 %v3702_v22, %v4889_v56  ;;  %v1695_v18 = vmul.f32 %v3731_v5, %v4890_v62  ;;  %v4896_v56 = vld [vmem:[#allocation74_spill] sm:$0xff] }
 0x2be   :  { %v1632_v60 = vmul.f32 %v3783_v61, %v1630_v21  ;;  %v1694_v55 = vadd.f32 %v1692_v32, %v1690_v58  ;;  %v1685_v30 = vadd.f32 %v1683_v15, %v1681_v50  ;;  %v1749_v7 = vmul.f32 %v3683_v28, %v4891_v33  ;;  %v4894_v21 = vld [vmem:[#allocation79_spill] sm:$0xff]  ;;  %v4895_v50 = vld [vmem:[#allocation106_spill] sm:$0xff] }
 0x2bf   :  { %v1747_v1 = vadd.f32 %v1745_v14, %v1743_v37  ;;  %v1740_v13 = vmul.f32 %v3705_v16, %v4892_v20  ;;  %v1753_v32 = vmul.f32 %v3686_v43, %v4894_v21  ;;  %v1757_v15 = vmul.f32 %v3689_v40, %v4895_v50  ;;  %v4897_v14 = vld [vmem:[#allocation130_spill] sm:$0xff] }
 0x2c0   :  { %v3892_v2 = vadd.f32 1e-05, %v1632_v60  ;;  %v1698_v29 = vadd.f32 %v1696_v47, %v1694_v55  ;;  %v1689_v31 = vadd.f32 %v1687_v26, %v1685_v30  ;;  %v1744_v37 = vmul.f32 %v3712_v57, %v4896_v56  ;;  %v4898_v60 = vld [vmem:[#allocation83_spill] sm:$0xff]  ;;  %v4899_v26 = vld [vmem:[#allocation84_spill] sm:$0xff] }
 0x2c1   :  { %v1751_v58 = vadd.f32 %v1749_v7, %v1747_v1  ;;  %v1742_v17 = vadd.f32 %v1740_v13, %v1738_v12  ;;  %v1761_v47 = vmul.f32 %v3692_v25, %v4898_v60  ;;  %v1808_v55 = vmul.f32 %v3673_v11, %v4899_v26  ;;  %v4900_v7 = vld [vmem:[#allocation86_spill] sm:$0xff]  ;;  %v4901_v12 = vld [vmem:[#allocation89_spill] sm:$0xff]  ;;  %v4902_v56 = vld [vmem:[#allocation4_spill] sm:$0xff] }
 0x2c2   :  { %4893 = vst [vmem:[#allocation46_spill] sm:$0xff] %v3892_v2  ;;  %1636 = vadd.xlane.f32.xlu1 %v3892_v2  ;;  %v1700_v62 = vmul.f32 %v1698_v29, %v4897_v14  ;;  %v1693_v33 = vadd.f32 %v1691_v39, %v1689_v31  ;;  %v1748_v20 = vmul.f32 %v3715_v34, %v4900_v7  ;;  %v4903_v29 = vld [vmem:[#allocation95_spill] sm:$0xff]  ;;  %v4905_v7 = vld [vmem:[#allocation81_spill] sm:$0xff]  ;;  %vm2094_vm6 = vcmask 64512  }
 0x2c3   :  { %v1755_v30 = vadd.f32 %v1753_v32, %v1751_v58  ;;  %v1746_v1 = vadd.f32 %v1744_v37, %v1742_v17  ;;  %v1810_v13 = vmul.f32 %v3676_v10, %v4901_v12  ;;  %v1765_v39 = vmul.f32 %v3699_v48, %v4902_v56  ;;  %v4904_v32 = vld [vmem:[#allocation90_spill] sm:$0xff] }
 0x2c4   :  { %v1702_v21 = vmul.f32 %v3755_v59, %v1700_v62  ;;  %v1697_v50 = vadd.f32 %v1695_v18, %v1693_v33  ;;  %v1752_v31 = vmul.f32 %v3718_v54, %v4903_v29  ;;  %v1814_v58 = vmul.f32 %v3679_v35, %v4904_v32  ;;  %v4906_v18 = vld [vmem:[#allocation97_spill] sm:$0xff]  ;;  %v4907_v29 = vld [vmem:[#allocation87_spill] sm:$0xff]  ;;  %v4912_v32 = vld [vmem:[#allocation118_spill] sm:$0xff] }
 0x2c5   :  { %v1759_v14 = vadd.f32 %v1757_v15, %v1755_v30  ;;  %v1750_v60 = vadd.f32 %v1748_v20, %v1746_v1  ;;  %v1812_v26 = vadd.f32 %v1810_v13, %v1808_v55  ;;  %v1756_v62 = vmul.f32 %v3721_v42, %v4905_v7  ;;  %v4908_v30 = vld [vmem:[#allocation115_spill] sm:$0xff]  ;;  %v4910_v13 = vld [vmem:[#allocation85_spill] sm:$0xff]  ;;  %v4913_v7 = vld [vmem:[#allocation88_spill] sm:$0xff] }
 0x2c6   :  { %v3917_v17 = vadd.f32 1e-05, %v1702_v21  ;;  %v1699_v37 = vmul.f32 %v1697_v50, %v3181_v8  ;;  %v1818_v33 = vmul.f32 %v3683_v28, %v4906_v18  ;;  %v1807_v15 = vmul.f32 %v3702_v22, %v4907_v29  ;;  %v4909_v8 = vld [vmem:[#allocation121_spill] sm:$0xff] }
 0x2c7   :  { %v1763_v12 = vadd.f32 %v1761_v47, %v1759_v14  ;;  %v1754_v56 = vadd.f32 %v1752_v31, %v1750_v60  ;;  %v1816_v2 = vadd.f32 %v1814_v58, %v1812_v26  ;;  %v1760_v1 = vmul.f32 %v3724_v3, %v4908_v30  ;;  %v4911_v14 = vld [vmem:[#allocation92_spill] sm:$0xff] }
 0x2c8   :  { %1707 = vadd.xlane.f32.xlu0 %v3917_v17  ;;  %v1701_v55 = vmul.f32 %v3783_v61, %v1699_v37  ;;  %v1764_v20 = vmul.f32 %v3731_v5, %v4909_v8  ;;  %v1809_v21 = vmul.f32 %v3705_v16, %v4910_v13  ;;  %v1822_v60 = vmul.f32 %v3686_v43, %v4911_v14  ;;  %v4914_v13 = vld [vmem:[#allocation128_spill] sm:$0xff] }
 0x2c9   :  { %v1767_v50 = vadd.f32 %v1765_v39, %v1763_v12  ;;  %v1758_v47 = vadd.f32 %v1756_v62, %v1754_v56  ;;  %v1820_v31 = vadd.f32 %v1818_v33, %v1816_v2  ;;  %v1826_v58 = vmul.f32 %v3689_v40, %v4912_v32  ;;  %v4915_v62 = vld [vmem:[#allocation96_spill] sm:$0xff]  ;;  %v4916_v12 = vld [vmem:[#allocation91_spill] sm:$0xff] }
 0x2ca   :  { %v3936_v26 = vadd.f32 1e-05, %v1701_v55  ;;  %v1811_v37 = vadd.f32 %v1809_v21, %v1807_v15  ;;  %v1813_v18 = vmul.f32 %v3712_v57, %v4913_v7  ;;  %v1830_v39 = vmul.f32 %v3692_v25, %v4914_v13  ;;  %v4917_v15 = vld [vmem:[#allocation125_spill] sm:$0xff]  ;;  %v4919_v14 = vld [vmem:[#allocation108_spill] sm:$0xff] }
 0x2cb   :  { %v1769_v29 = vmul.f32 %v1767_v50, %v3295_v23  ;;  %v1762_v30 = vadd.f32 %v1760_v1, %v1758_v47  ;;  %v1824_v8 = vadd.f32 %v1822_v60, %v1820_v31  ;;  %v1817_v33 = vmul.f32 %v3715_v34, %v4915_v62  ;;  %v4918_v50 = vld [vmem:[#allocation139_spill] sm:$0xff] }
 0x2cc   :  { %1705 = vadd.xlane.f32.xlu1 %v3936_v26  ;;  %v1815_v2 = vadd.f32 %v1813_v18, %v1811_v37  ;;  %v1877_v56 = vmul.f32 %v3673_v11, %v4916_v12  ;;  %v1879_v55 = vmul.f32 %v3676_v10, %v4917_v15  ;;  %v1834_v47 = vmul.f32 %v3699_v48, %v4918_v50  ;;  %v4920_v37 = vld [vmem:[#allocation99_spill] sm:$0xff]  ;;  %v4921_v12 = vld [vmem:[#allocation117_spill] sm:$0xff] }
 0x2cd   :  { %v1771_v21 = vmul.f32 %v3755_v59, %v1769_v29  ;;  %v1766_v23 = vadd.f32 %v1764_v20, %v1762_v30  ;;  %v1828_v1 = vadd.f32 %v1826_v58, %v1824_v8  ;;  %v1821_v60 = vmul.f32 %v3718_v54, %v4919_v14  ;;  %v4922_v30 = vld [vmem:[#allocation112_spill] sm:$0xff]  ;;  %v4927_v14 = vld [vmem:[#allocation119_spill] sm:$0xff] }
 0x2ce   :  { %v1819_v31 = vadd.f32 %v1817_v33, %v1815_v2  ;;  %v1881_v32 = vadd.f32 %v1879_v55, %v1877_v56  ;;  %v1883_v7 = vmul.f32 %v3679_v35, %v4920_v37  ;;  %v1825_v20 = vmul.f32 %v3721_v42, %v4921_v12  ;;  %v4923_v2 = vld [vmem:[#allocation7_spill] sm:$0xff]  ;;  %v4924_v55 = vld [vmem:[#allocation94_spill] sm:$0xff] }
 0x2cf   :  { %v3959_v18 = vadd.f32 1e-05, %v1771_v21  ;;  %v1768_v13 = vmul.f32 %v1766_v23, %v3266_v41  ;;  %v1832_v62 = vadd.f32 %v1830_v39, %v1828_v1  ;;  %v1887_v8 = vmul.f32 %v3683_v28, %v4922_v30  ;;  %v4925_v39 = vld [vmem:[#allocation93_spill] sm:$0xff]  ;;  %v4926_v1 = vld [vmem:[#allocation136_spill] sm:$0xff] }
 0x2d0   :  { %v1823_v58 = vadd.f32 %v1821_v60, %v1819_v31  ;;  %v1885_v29 = vadd.f32 %v1883_v7, %v1881_v32  ;;  %v1876_v33 = vmul.f32 %v3702_v22, %v4923_v2  ;;  %v1829_v41 = vmul.f32 %v3724_v3, %v4924_v55  ;;  %v4929_v30 = vld [vmem:[#allocation133_spill] sm:$0xff] }
 0x2d1   :  { %1776 = vadd.xlane.f32.xlu0 %v3959_v18  ;;  %v1770_v56 = vmul.f32 %v3783_v61, %v1768_v13  ;;  %v1836_v15 = vadd.f32 %v1834_v47, %v1832_v62  ;;  %v1878_v21 = vmul.f32 %v3705_v16, %v4925_v39  ;;  %v1833_v50 = vmul.f32 %v3731_v5, %v4926_v1  ;;  %v4928_v47 = vld [vmem:[#allocation127_spill] sm:$0xff] }
 0x2d2   :  { %v1827_v23 = vadd.f32 %v1825_v20, %v1823_v58  ;;  %v1889_v31 = vadd.f32 %v1887_v8, %v1885_v29  ;;  %v1891_v60 = vmul.f32 %v3686_v43, %v4927_v14  ;;  %v1882_v13 = vmul.f32 %v3712_v57, %v4928_v47  ;;  %v4930_v58 = vld [vmem:[#allocation110_spill] sm:$0xff] }
 0x2d3   :  { %v3978_v32 = vadd.f32 1e-05, %v1770_v56  ;;  %v1838_v37 = vmul.f32 %v1836_v15, %v3334_v36  ;;  %v1880_v7 = vadd.f32 %v1878_v21, %v1876_v33  ;;  %v1895_v20 = vmul.f32 %v3689_v40, %v4929_v30  ;;  %v4931_v56 = vld [vmem:[#allocation44_spill] sm:$0xff]  ;;  %v4933_v21 = vld [vmem:[#allocation6_spill] sm:$0xff]  ;;  %v4937_v30 = vld [vmem:[#allocation101_spill] sm:$0xff] }
 0x2d4   :  { %v1831_v62 = vadd.f32 %v1829_v41, %v1827_v23  ;;  %v1893_v12 = vadd.f32 %v1891_v60, %v1889_v31  ;;  %v1886_v2 = vmul.f32 %v3715_v34, %v4930_v58  ;;  %v1946_v36 = vmul.f32 %v3673_v11, %v4931_v56  ;;  %v4932_v33 = vld [vmem:[#allocation104_spill] sm:$0xff]  ;;  %v4934_v60 = vld [vmem:[#allocation113_spill] sm:$0xff]  ;;  %v4938_v58 = vld [vmem:[#allocation103_spill] sm:$0xff] }
 0x2d5   :  { %1774 = vadd.xlane.f32.xlu1 %v3978_v32  ;;  %v1840_v29 = vmul.f32 %v3755_v59, %v1838_v37  ;;  %v1884_v8 = vadd.f32 %v1882_v13, %v1880_v7  ;;  %v1948_v15 = vmul.f32 %v3676_v10, %v4932_v33  ;;  %v1899_v39 = vmul.f32 %v3692_v25, %v3413_v9 }
 0x2d6   :  { %v1835_v55 = vadd.f32 %v1833_v50, %v1831_v62  ;;  %v1897_v41 = vadd.f32 %v1895_v20, %v1893_v12  ;;  %v1890_v23 = vmul.f32 %v3718_v54, %v4933_v21  ;;  %v1952_v37 = vmul.f32 %v3679_v35, %v4934_v60  ;;  %v4935_v50 = vld [vmem:[#allocation129_spill] sm:$0xff]  ;;  %v4936_v62 = vld [vmem:[#allocation66_spill] sm:$0xff] }
 0x2d7   :  { %v3997_v1 = vadd.f32 1e-05, %v1840_v29  ;;  %v1888_v31 = vadd.f32 %v1886_v2, %v1884_v8  ;;  %v1950_v14 = vadd.f32 %v1948_v15, %v1946_v36  ;;  %v1903_v10 = vmul.f32 %v3699_v48, %v3520_v44  ;;  %v4939_v29 = vld [vmem:[#allocation135_spill] sm:$0xff]  ;;  %v4940_v36 = vld [vmem:[#allocation8_spill] sm:$0xff]  ;;  %v4942_v21 = vld [vmem:[#allocation138_spill] sm:$0xff] }
 0x2d8   :  { %v1837_v11 = vmul.f32 %v1835_v55, %v3185_v6  ;;  %v1901_v7 = vadd.f32 %v1899_v39, %v1897_v41  ;;  %v1894_v47 = vmul.f32 %v3721_v42, %v4935_v50  ;;  %v1956_v12 = vmul.f32 %v3683_v28, %v4936_v62  ;;  %v4943_v60 = vld [vmem:[#allocation10_spill] sm:$0xff] }
 0x2d9   :  { %1845 = vadd.xlane.f32.xlu0 %v3997_v1  ;;  %v1892_v9 = vadd.f32 %v1890_v23, %v1888_v31  ;;  %v1954_v13 = vadd.f32 %v1952_v37, %v1950_v14  ;;  %v1945_v20 = vmul.f32 %v3702_v22, %v4937_v30  ;;  %v1947_v2 = vmul.f32 %v3705_v16, %v4938_v58  ;;  %v4941_v22 = vld [vmem:[#allocation45_spill] sm:$0xff] }
 0x2da   :  { %v1839_v35 = vmul.f32 %v3783_v61, %v1837_v11  ;;  %v1905_v6 = vadd.f32 %v1903_v10, %v1901_v7  ;;  %v1898_v8 = vmul.f32 %v3724_v3, %v4939_v29  ;;  %v1960_v33 = vmul.f32 %v3686_v43, %v4940_v36  ;;  %v4945_v30 = vld [vmem:[#allocation37_spill] sm:$0xff] }
 0x2db   :  { %v1896_v44 = vadd.f32 %v1894_v47, %v1892_v9  ;;  %v1958_v56 = vadd.f32 %v1956_v12, %v1954_v13  ;;  %v1949_v55 = vadd.f32 %v1947_v2, %v1945_v20  ;;  %v1951_v41 = vmul.f32 %v3712_v57, %v4941_v22  ;;  %v4946_v20 = vld [vmem:[#allocation5_spill] sm:$0xff] }
 0x2dc   :  { %v4018_v15 = vadd.f32 1e-05, %v1839_v35  ;;  %v1907_v28 = vmul.f32 %v1905_v6, %v3348_v0  ;;  %v1902_v16 = vmul.f32 %v3731_v5, %v4942_v21  ;;  %v1964_v31 = vmul.f32 %v3689_v40, %v3572_v46 }
 0x2dd   :  { %v1900_v39 = vadd.f32 %v1898_v8, %v1896_v44  ;;  %v1962_v23 = vadd.f32 %v1960_v33, %v1958_v56  ;;  %v1953_v14 = vadd.f32 %v1951_v41, %v1949_v55  ;;  %v1955_v0 = vmul.f32 %v3715_v34, %v4943_v60  ;;  %v4947_v8 = vld [vmem:[#allocation46_spill] sm:$0xff] }
 0x2de   :  { %1843 = vadd.xlane.f32.xlu1 %v4018_v15  ;;  %v1909_v43 = vmul.f32 %v3755_v59, %v1907_v28  ;;  %v1968_v57 = vmul.f32 %v3692_v25, %v3601_v27  ;;  %v1959_v50 = vmul.f32 %v3718_v54, %v4816_v63  ;;  %v1972_v47 = vmul.f32 %v3699_v48, %v3640_v52 }
 0x2df   :  { %v1904_v37 = vadd.f32 %v1902_v16, %v1900_v39  ;;  %v1966_v11 = vadd.f32 %v1964_v31, %v1962_v23  ;;  %v1957_v10 = vadd.f32 %v1955_v0, %v1953_v14  ;;  %v1963_v9 = vmul.f32 %v3721_v42, %v3437_v49 }
 0x2e0   :  { %v4033_v7 = vadd.f32 1e-05, %v1909_v43  ;;  %v1967_v62 = vmul.f32 %v3724_v3, %v3564_v19  ;;  %v1971_v52 = vmul.f32 %v3731_v5, %v4945_v30  ;;  %v4061_v3 = vld [vmem:[%s4383_s2 + $0x8] sm:$0xff] }
 0x2e1   :  { %v1906_v46 = vmul.f32 %v1904_v37, %v3398_v51  ;;  %v1970_v40 = vadd.f32 %v1968_v57, %v1966_v11  ;;  %v1961_v34 = vadd.f32 %v1959_v50, %v1957_v10  ;;  %v4944_v51 = vld [vmem:[#allocation126_spill] sm:$0xff]  ;;  %v1507_v5 = vmul.f32 %v4061_v3, %v3806_v45 }
 0x2e2   :  { %1914 = vadd.xlane.f32.xlu0 %v4033_v7  ;;  %v1645_v2 = vmul.f32 %v4061_v3, %v3865_v38  ;;  %v1714_v29 = vmul.f32 %v4061_v3, %v3917_v17  ;;  %v1783_v36 = vmul.f32 %v4061_v3, %v3959_v18  ;;  %v1852_v28 = vmul.f32 %v4061_v3, %v3997_v1 }
 0x2e3   :  { %v1908_v27 = vmul.f32 %v3783_v61, %v1906_v46  ;;  %v1974_v25 = vadd.f32 %v1972_v47, %v1970_v40  ;;  %v1965_v13 = vadd.f32 %v1963_v9, %v1961_v34  ;;  %v1921_v22 = vmul.f32 %v4061_v3, %v4033_v7 }
 0x2e5   :  { %v4046_v63 = vadd.f32 1e-05, %v1908_v27  ;;  %v1976_v54 = vmul.f32 %v1974_v25, %v4944_v51  ;;  %v1969_v12 = vadd.f32 %v1967_v62, %v1965_v13 }
 0x2e7   :  { %1912 = vadd.xlane.f32.xlu1 %v4046_v63  ;;  %v1978_v48 = vmul.f32 %v3755_v59, %v1976_v54  ;;  %v1973_v49 = vadd.f32 %v1971_v52, %v1969_v12  ;;  %v1576_v59 = vmul.f32 %v4061_v3, %v3834_v4 }
 0x2e9   :  { %v4053_v42 = vadd.f32 1e-05, %v1978_v48  ;;  %v1975_v35 = vmul.f32 %v1973_v49, %v4946_v20 }
 0x2eb   :  { %1983 = vadd.xlane.f32.xlu0 %v4053_v42  ;;  %v1977_v19 = vmul.f32 %v3783_v61, %v1975_v35  ;;  %v4073_v61 = vld [vmem:[%s4383_s2] sm:$0xff]  ;;  %v1990_v39 = vmul.f32 %v4061_v3, %v4053_v42 }
 0x2ec   :  { %v1506_v58 = vmul.f32 %v4073_v61, %v3819_v24  ;;  %v1575_v44 = vmul.f32 %v4073_v61, %v3848_v53  ;;  %v1644_v56 = vmul.f32 %v4073_v61, %v4947_v8  ;;  %v1713_v33 = vmul.f32 %v4073_v61, %v3936_v26 }
 0x2ed   :  { %v4065_v6 = vadd.f32 1e-05, %v1977_v19  ;;  %v1782_v55 = vmul.f32 %v4073_v61, %v3978_v32  ;;  %v1851_v41 = vmul.f32 %v4073_v61, %v4018_v15  ;;  %v1920_v21 = vmul.f32 %v4073_v61, %v4046_v63 }
 0x2ef   :  { %1510 = vadd.xlane.f32.xlu0 %v1507_v5  ;;  %1981 = vadd.xlane.f32.xlu1 %v4065_v6  ;;  %v1989_v16 = vmul.f32 %v4073_v61, %v4065_v6 }
 0x2f3   :  { %1579 = vadd.xlane.f32.xlu0 %v1576_v59  ;;  %1508 = vadd.xlane.f32.xlu1 %v1506_v58 }
 0x2f7   :  { %1648 = vadd.xlane.f32.xlu0 %v1645_v2  ;;  %1577 = vadd.xlane.f32.xlu1 %v1575_v44 }
 0x2fb   :  { %1717 = vadd.xlane.f32.xlu0 %v1714_v29  ;;  %1646 = vadd.xlane.f32.xlu1 %v1644_v56 }
 0x2ff   :  { %1786 = vadd.xlane.f32.xlu0 %v1783_v36  ;;  %1715 = vadd.xlane.f32.xlu1 %v1713_v33 }
 0x303   :  { %1855 = vadd.xlane.f32.xlu0 %v1852_v28  ;;  %1784 = vadd.xlane.f32.xlu1 %v1782_v55 }
 0x307   :  { %1924 = vadd.xlane.f32.xlu0 %v1921_v22  ;;  %1853 = vadd.xlane.f32.xlu1 %v1851_v41 }
 0x30b   :  { %1993 = vadd.xlane.f32.xlu0 %v1990_v39  ;;  %1922 = vadd.xlane.f32.xlu1 %v1920_v21  ;;  %v1460_v39 = vlaneseq }
 0x30f   :  { %1991 = vadd.xlane.f32.xlu1 %v1989_v16 }
 0x339   :  { %v1501_v23 = vpop.xlane.xlu0 %1500 }
 0x33a   :  { %2299 = vrcp.f32 %v1501_v23 }
 0x33c   :  { %v1499_v31 = vpop.xlane.xlu1 %1498 }
 0x33f   :  { %v1570_v43 = vpop.xlane.xlu0 %1569 }
 0x340   :  { %2301 = vrcp.f32 %v1570_v43 }
 0x341   :  { %2303 = vrcp.f32 %v1499_v31 }
 0x342   :  { %v1568_v14 = vpop.xlane.xlu1 %1567 }
 0x346   :  { %v1639_v60 = vpop.xlane.xlu0 %1638 }
 0x347   :  { %2305 = vrcp.f32 %v1639_v60  ;;  %v4103_v9 = vpop.eup %2299 }
 0x348   :  { %2307 = vrcp.f32 %v1568_v14 }
 0x34b   :  { %v1637_v0 = vpop.xlane.xlu1 %1636 }
 0x34d   :  { %v4110_v51 = vpop.eup %2301 }
 0x34e   :  { %v4112_v12 = vpop.eup %2303 }
 0x351   :  { %v1708_v37 = vpop.xlane.xlu0 %1707 }
 0x352   :  { %2309 = vrcp.f32 %v1708_v37 }
 0x353   :  { %2311 = vrcp.f32 %v1637_v0 }
 0x354   :  { %v4123_v19 = vpop.eup %2305 }
 0x355   :  { %v1706_v11 = vpop.xlane.xlu1 %1705 }
 0x35a   :  { %v1777_v57 = vpop.xlane.xlu0 %1776 }
 0x35b   :  { %2313 = vrcp.f32 %v1777_v57  ;;  %v4158_v57 = vand.u32 127, %v1460_v39 }
 0x35c   :  { %2315 = vrcp.f32 %v1706_v11 }
 0x35d   :  { %vm1526_vm14 = vcmp.eq.s32.totalorder %v4158_v57, 0  ;;  %vm1595_vm15 = vcmp.eq.s32.totalorder %v4158_v57, 1  ;;  %vm1664_vm0 = vcmp.eq.s32.totalorder %v4158_v57, 2  ;;  %vm1733_vm1 = vcmp.eq.s32.totalorder %v4158_v57, 3 }
 0x35e   :  { %v1775_v10 = vpop.xlane.xlu1 %1774  ;;  %vm1802_vm2 = vcmp.eq.s32.totalorder %v4158_v57, 4  ;;  %vm1871_vm3 = vcmp.eq.s32.totalorder %v4158_v57, 5  ;;  %vm1940_vm4 = vcmp.eq.s32.totalorder %v4158_v57, 6  ;;  %vm2009_vm5 = vcmp.eq.s32.totalorder %v4158_v57, 7  ;;  %v2354_v57 = vld [vmem:[%s4382_s1] sm:$0xff] }
 0x362   :  { %v1846_v50 = vpop.xlane.xlu0 %1845 }
 0x363   :  { %2317 = vrcp.f32 %v1846_v50 }
 0x364   :  { %2319 = vrcp.f32 %v1775_v10 }
 0x367   :  { %v1844_v46 = vpop.xlane.xlu1 %1843 }
 0x36b   :  { %v1915_v40 = vpop.xlane.xlu0 %1914 }
 0x36c   :  { %2321 = vrcp.f32 %v1915_v40 }
 0x36d   :  { %2323 = vrcp.f32 %v1844_v46 }
 0x370   :  { %v1913_v47 = vpop.xlane.xlu1 %1912 }
 0x374   :  { %v1984_v34 = vpop.xlane.xlu0 %1983 }
 0x375   :  { %2325 = vrcp.f32 %v1984_v34 }
 0x376   :  { %2327 = vrcp.f32 %v1913_v47 }
 0x378   :  { %v1511_v27 = vpop.xlane.xlu0 %1510  ;;  %v1982_v25 = vpop.xlane.xlu1 %1981 }
 0x379   :  { %v4106_v13 = vmul.f32 %v4103_v9, %v1511_v27  ;;  %2329 = vrcp.f32 %v1982_v25 }
 0x37b   :  { %v1515_v62 = vsub.f32 %v4061_v3, %v4106_v13 }
 0x37c   :  { %v1580_v54 = vpop.xlane.xlu0 %1579  ;;  %v1509_v52 = vpop.xlane.xlu1 %1508 }
 0x37d   :  { %v1517_v30 = vmul.f32 %v1515_v62, %v3806_v45  ;;  %v4116_v48 = vmul.f32 %v4110_v51, %v1580_v54  ;;  %v4119_v49 = vmul.f32 %v4112_v12, %v1509_v52  ;;  %v4127_v45 = vpop.eup %2307 }
 0x37e   :  { %v4139_v28 = vpop.eup %2309 }
 0x37f   :  { %v1584_v20 = vsub.f32 %v4061_v3, %v4116_v48  ;;  %v1519_v35 = vmul.f32 %v1517_v30, %v1515_v62  ;;  %v1514_v5 = vsub.f32 %v4073_v61, %v4119_v49  ;;  %v4143_v41 = vpop.eup %2311 }
 0x380   :  { %v1649_v59 = vpop.xlane.xlu0 %1648  ;;  %v1578_v2 = vpop.xlane.xlu1 %1577 }
 0x381   :  { %v1586_v58 = vmul.f32 %v1584_v20, %v3834_v4  ;;  %v4131_v44 = vmul.f32 %v4123_v19, %v1649_v59  ;;  %1522 = vadd.xlane.f32.xlu0 %v1519_v35  ;;  %v1516_v29 = vmul.f32 %v1514_v5, %v3819_v24  ;;  %v4135_v56 = vmul.f32 %v4127_v45, %v1578_v2  ;;  %v4152_v60 = vpop.eup %2313 }
 0x382   :  { %v4156_v11 = vpop.eup %2315 }
 0x383   :  { %v1653_v36 = vsub.f32 %v4061_v3, %v4131_v44  ;;  %v1588_v33 = vmul.f32 %v1586_v58, %v1584_v20  ;;  %v1583_v4 = vsub.f32 %v4073_v61, %v4135_v56  ;;  %v1518_v55 = vmul.f32 %v1516_v29, %v1514_v5  ;;  %v4167_v27 = vpop.eup %2317 }
 0x384   :  { %v1718_v22 = vpop.xlane.xlu0 %1717  ;;  %v1647_v21 = vpop.xlane.xlu1 %1646 }
 0x385   :  { %v1655_v24 = vmul.f32 %v1653_v36, %v3865_v38  ;;  %v1720_v16 = vmul.f32 %v4139_v28, %v1718_v22  ;;  %1591 = vadd.xlane.f32.xlu0 %v1588_v33  ;;  %v1585_v23 = vmul.f32 %v1583_v4, %v3848_v53  ;;  %v4149_v31 = vmul.f32 %v4143_v41, %v1647_v21  ;;  %v4171_v30 = vpop.eup %2319 }
 0x386   :  { %1520 = vadd.xlane.f32.xlu1 %v1518_v55  ;;  %v4182_v58 = vpop.eup %2321 }
 0x387   :  { %v1722_v43 = vsub.f32 %v4061_v3, %v1720_v16  ;;  %v1657_v14 = vmul.f32 %v1655_v24, %v1653_v36  ;;  %v1652_v38 = vsub.f32 %v4073_v61, %v4149_v31  ;;  %v1587_v0 = vmul.f32 %v1585_v23, %v1583_v4  ;;  %v4189_v36 = vpop.eup %2323 }
 0x388   :  { %v1787_v37 = vpop.xlane.xlu0 %1786  ;;  %v1716_v10 = vpop.xlane.xlu1 %1715 }
 0x389   :  { %v1724_v53 = vmul.f32 %v1722_v43, %v3917_v17  ;;  %v1789_v50 = vmul.f32 %v4152_v60, %v1787_v37  ;;  %1660 = vadd.xlane.f32.xlu0 %v1657_v14  ;;  %v1654_v46 = vmul.f32 %v1652_v38, %v4947_v8  ;;  %v4164_v40 = vmul.f32 %v4156_v11, %v1716_v10  ;;  %v4207_v23 = vpop.eup %2325 }
 0x38a   :  { %1589 = vadd.xlane.f32.xlu1 %v1587_v0 }
 0x38b   :  { %v1791_v47 = vsub.f32 %v4061_v3, %v1789_v50  ;;  %v1726_v34 = vmul.f32 %v1724_v53, %v1722_v43  ;;  %v1721_v62 = vsub.f32 %v4073_v61, %v4164_v40  ;;  %v1656_v17 = vmul.f32 %v1654_v46, %v1652_v38  ;;  %v4212_v38 = vpop.eup %2327 }
 0x38c   :  { %v1856_v54 = vpop.xlane.xlu0 %1855  ;;  %v1785_v52 = vpop.xlane.xlu1 %1784 }
 0x38d   :  { %v1793_v8 = vmul.f32 %v1791_v47, %v3959_v18  ;;  %v1858_v20 = vmul.f32 %v4167_v27, %v1856_v54  ;;  %1729 = vadd.xlane.f32.xlu0 %v1726_v34  ;;  %v1723_v35 = vmul.f32 %v1721_v62, %v3936_v26  ;;  %v1788_v25 = vmul.f32 %v4171_v30, %v1785_v52  ;;  %v4245_v54 = vpop.eup %2329 }
 0x38e   :  { %1658 = vadd.xlane.f32.xlu1 %v1656_v17  ;;  %v1528_v18 = vsel %vm1526_vm14, %v4106_v13, 0.0 }
 0x38f   :  { %v1860_v5 = vsub.f32 %v4061_v3, %v1858_v20  ;;  %v1795_v59 = vmul.f32 %v1793_v8, %v1791_v47  ;;  %v1790_v26 = vsub.f32 %v4073_v61, %v1788_v25  ;;  %v1725_v2 = vmul.f32 %v1723_v35, %v1721_v62 }
 0x390   :  { %v1925_v29 = vpop.xlane.xlu0 %1924  ;;  %v1597_v33 = vsel %vm1595_vm15, %v4116_v48, %v1528_v18  ;;  %v1854_v55 = vpop.xlane.xlu1 %1853 }
 0x391   :  { %v1862_v4 = vmul.f32 %v1860_v5, %v3997_v1  ;;  %v1927_v22 = vmul.f32 %v4182_v58, %v1925_v29  ;;  %1798 = vadd.xlane.f32.xlu0 %v1795_v59  ;;  %v1666_v13 = vsel %vm1664_vm0, %v4131_v44, %v1597_v33  ;;  %v1792_v39 = vmul.f32 %v1790_v26, %v3978_v32 }
 0x392   :  { %v1857_v24 = vmul.f32 %v4189_v36, %v1854_v55  ;;  %1727 = vadd.xlane.f32.xlu1 %v1725_v2  ;;  %v1735_v48 = vsel %vm1733_vm1, %v1720_v16, %v1666_v13  ;;  %v1527_v16 = vsel %vm1526_vm14, %v4119_v49, 0.0 }
 0x393   :  { %v1929_v1 = vsub.f32 %v4061_v3, %v1927_v22  ;;  %v1864_v21 = vmul.f32 %v1862_v4, %v1860_v5  ;;  %v1804_v44 = vsel %vm1802_vm2, %v1789_v50, %v1735_v48  ;;  %v1794_v43 = vmul.f32 %v1792_v39, %v1790_v26 }
 0x394   :  { %v1859_v32 = vsub.f32 %v4073_v61, %v1857_v24  ;;  %v1994_v14 = vpop.xlane.xlu0 %1993  ;;  %v1873_v0 = vsel %vm1871_vm3, %v1858_v20, %v1804_v44  ;;  %v1923_v53 = vpop.xlane.xlu1 %1922  ;;  %v1596_v50 = vsel %vm1595_vm15, %v4135_v56, %v1527_v16 }
 0x395   :  { %v1931_v37 = vmul.f32 %v1929_v1, %v4033_v7  ;;  %v1996_v10 = vmul.f32 %v4207_v23, %v1994_v14  ;;  %1867 = vadd.xlane.f32.xlu0 %v1864_v21  ;;  %v1942_v47 = vsel %vm1940_vm4, %v1927_v22, %v1873_v0  ;;  %v1926_v49 = vmul.f32 %v4212_v38, %v1923_v53 }
 0x396   :  { %v1861_v46 = vmul.f32 %v1859_v32, %v4018_v15  ;;  %1796 = vadd.xlane.f32.xlu1 %v1794_v43  ;;  %v1665_v7 = vsel %vm1664_vm0, %v4149_v31, %v1596_v50 }
 0x397   :  { %v1998_v34 = vsub.f32 %v4061_v3, %v1996_v10  ;;  %v4234_v62 = vsel %vm2009_vm5, %v1996_v10, %v1942_v47  ;;  %v1933_v17 = vmul.f32 %v1931_v37, %v1929_v1  ;;  %v1734_v15 = vsel %vm1733_vm1, %v4164_v40, %v1665_v7 }
 0x398   :  { %v1928_v56 = vsub.f32 %v4073_v61, %v1926_v49  ;;  %2108 = vst.msk [vmem:[%s4385_s5 + $0x8] sm:$0xff] %vm2094_vm6, %v4234_v62  ;;  %v1863_v31 = vmul.f32 %v1861_v46, %v1859_v32  ;;  %v1803_v3 = vsel %vm1802_vm2, %v1788_v25, %v1734_v15  ;;  %v1992_v52 = vpop.xlane.xlu1 %1991 }
 0x399   :  { %v2000_v8 = vmul.f32 %v1998_v34, %v4053_v42  ;;  %1936 = vadd.xlane.f32.xlu0 %v1933_v17  ;;  %v1872_v40 = vsel %vm1871_vm3, %v1857_v24, %v1803_v3  ;;  %v1995_v35 = vmul.f32 %v4245_v54, %v1992_v52 }
 0x39a   :  { %v1930_v20 = vmul.f32 %v1928_v56, %v4046_v63  ;;  %1865 = vadd.xlane.f32.xlu1 %v1863_v31  ;;  %v1941_v5 = vsel %vm1940_vm4, %v1926_v49, %v1872_v40  ;;  %v4948_v31 = vld [vmem:[#allocation3_spill] sm:$0xff] }
 0x39b   :  { %v2002_v59 = vmul.f32 %v2000_v8, %v1998_v34  ;;  %v1997_v18 = vsub.f32 %v4073_v61, %v1995_v35  ;;  %v4259_v25 = vsel %vm2009_vm5, %v1995_v35, %v1941_v5  ;;  %v2353_v8 = vld [vmem:[%s4382_s1 + $0x8] sm:$0xff]  ;;  %vm2041_vm10 = vcmp.eq.f32.partialorder %v4948_v31, inf }
 0x39c   :  { %v1932_v42 = vmul.f32 %v1930_v20, %v1928_v56  ;;  %2107 = vst.msk [vmem:[%s4385_s5] sm:$0xff] %vm2094_vm6, %v4259_v25  ;;  %vm2043_vm12 = vcmp.eq.f32.partialorder %v4948_v31, 0.0 }
 0x39d   :  { %2005 = vadd.xlane.f32.xlu0 %v2002_v59  ;;  %v1999_v63 = vmul.f32 %v1997_v18, %v4065_v6 }
 0x39e   :  { %1934 = vadd.xlane.f32.xlu1 %v1932_v42 }
 0x39f   :  { %v2001_v26 = vmul.f32 %v1999_v63, %v1997_v18 }
 0x3a2   :  { %2003 = vadd.xlane.f32.xlu1 %v2001_v26 }
 0x40a   :  { %v1523_v2 = vpop.xlane.xlu0 %1522 }
 0x40b   :  { %v1525_v24 = vmul.f32 %v4103_v9, %v1523_v2 }
 0x40d   :  { %v1530_v32 = vsel %vm1526_vm14, %v1525_v24, 0.0 }
 0x40e   :  { %v1592_v29 = vpop.xlane.xlu0 %1591 }
 0x40f   :  { %v1521_v61 = vpop.xlane.xlu1 %1520  ;;  %v1594_v1 = vmul.f32 %v4110_v51, %v1592_v29 }
 0x410   :  { %v1524_v16 = vmul.f32 %v4112_v12, %v1521_v61 }
 0x411   :  { %v1599_v0 = vsel %vm1595_vm15, %v1594_v1, %v1530_v32 }
 0x412   :  { %v1661_v33 = vpop.xlane.xlu0 %1660 }
 0x413   :  { %v1590_v4 = vpop.xlane.xlu1 %1589  ;;  %v1663_v6 = vmul.f32 %v4123_v19, %v1661_v33 }
 0x414   :  { %v1593_v51 = vmul.f32 %v4127_v45, %v1590_v4 }
 0x415   :  { %v1668_v19 = vsel %vm1664_vm0, %v1663_v6, %v1599_v0 }
 0x416   :  { %v1730_v55 = vpop.xlane.xlu0 %1729 }
 0x417   :  { %v1659_v22 = vpop.xlane.xlu1 %1658  ;;  %v1732_v44 = vmul.f32 %v4139_v28, %v1730_v55 }
 0x418   :  { %v1662_v53 = vmul.f32 %v4143_v41, %v1659_v22 }
 0x41a   :  { %v1799_v13 = vpop.xlane.xlu0 %1798 }
 0x41b   :  { %v1728_v39 = vpop.xlane.xlu1 %1727  ;;  %v1801_v43 = vmul.f32 %v4152_v60, %v1799_v13  ;;  %v1737_v60 = vsel %vm1733_vm1, %v1732_v44, %v1668_v19 }
 0x41c   :  { %v1731_v12 = vmul.f32 %v4156_v11, %v1728_v39 }
 0x41d   :  { %v1806_v10 = vsel %vm1802_vm2, %v1801_v43, %v1737_v60  ;;  %v2356_v60 = vld [vmem:[%s4381_s0] sm:$0xff] }
 0x41e   :  { %v1868_v48 = vpop.xlane.xlu0 %1867 }
 0x41f   :  { %v1797_v21 = vpop.xlane.xlu1 %1796  ;;  %v1870_v9 = vmul.f32 %v4167_v27, %v1868_v48  ;;  %v1529_v27 = vsel %vm1526_vm14, %v1524_v16, 0.0  ;;  %v2044_v48 = vand.u32 2147483648, %v4948_v31 }
 0x420   :  { %v1800_v45 = vmul.f32 %v4171_v30, %v1797_v21  ;;  %v1598_v47 = vsel %vm1595_vm15, %v1593_v51, %v1529_v27 }
 0x421   :  { %v1875_v46 = vsel %vm1871_vm3, %v1870_v9, %v1806_v10  ;;  %v1667_v7 = vsel %vm1664_vm0, %v1662_v53, %v1598_v47  ;;  %v2355_v9 = vld [vmem:[%s4381_s0 + $0x8] sm:$0xff] }
 0x422   :  { %v1937_v14 = vpop.xlane.xlu0 %1936 }
 0x423   :  { %v1866_v37 = vpop.xlane.xlu1 %1865  ;;  %v1939_v28 = vmul.f32 %v4182_v58, %v1937_v14 }
 0x424   :  { %v1869_v11 = vmul.f32 %v4189_v36, %v1866_v37  ;;  %v2029_v37 = vsub.f32 %v2355_v9, %v4234_v62 }
 0x425   :  { %v1944_v49 = vsel %vm1940_vm4, %v1939_v28, %v1875_v46 }
 0x426   :  { %v2006_v50 = vpop.xlane.xlu0 %2005  ;;  %v2077_v53 = vmul.f32 %v2029_v37, %v2029_v37 }
 0x427   :  { %v1935_v58 = vpop.xlane.xlu1 %1934  ;;  %v2008_v41 = vmul.f32 %v4207_v23, %v2006_v50  ;;  %v1736_v23 = vsel %vm1733_vm1, %v1731_v12, %v1667_v7  ;;  %v2028_v12 = vsub.f32 %v2356_v60, %v4259_v25  ;;  %v2031_v50 = vand.u32 2147483647, %v2029_v37 }
 0x428   :  { %v1938_v34 = vmul.f32 %v4212_v38, %v1935_v58  ;;  %v1805_v36 = vsel %vm1802_vm2, %v1800_v45, %v1736_v23  ;;  %v2079_v62 = vadd.f32 %v2077_v53, %v4948_v31 }
 0x429   :  { %v4304_v30 = vsel %vm2009_vm5, %v2008_v41, %v1944_v49  ;;  %v1874_v38 = vsel %vm1871_vm3, %v1869_v11, %v1805_v36  ;;  %v2076_v58 = vmul.f32 %v2028_v12, %v2028_v12  ;;  %vm2053_vm1 = vcmp.gt.f32.partialorder %v2031_v50, 0.1 }
 0x42a   :  { %2331 = vrsqrt.f32 %v4304_v30  ;;  %2110 = vst.msk [vmem:[%s4386_s6 + $0x8] sm:$0xff] %vm2094_vm6, %v4304_v30  ;;  %v1943_v56 = vsel %vm1940_vm4, %v1938_v34, %v1874_v38  ;;  %vm2023_vm7 = vcmp.eq.f32.partialorder %v4304_v30, inf  ;;  %v2026_v20 = vand.u32 2147483648, %v4304_v30 }
 0x42b   :  { %v2004_v17 = vpop.xlane.xlu1 %2003  ;;  %2333 = vrsqrt.f32 %v4948_v31  ;;  %vm2025_vm8 = vcmp.eq.f32.partialorder %v4304_v30, 0.0  ;;  %vm2051_vm15 = vcmp.gt.f32.partialorder %v4304_v30, 0.0  ;;  %v2030_v49 = vand.u32 2147483647, %v2028_v12 }
 0x42c   :  { %v2007_v15 = vmul.f32 %v4245_v54, %v2004_v17  ;;  %2335 = vrcp.f32 %v2353_v8  ;;  %v4949_v54 = vld [vmem:[#allocation2_spill] sm:$0xff]  ;;  %vm2055_vm2 = vmand %vm2053_vm1, %vm2051_vm15  ;;  %v4950_v17 = vmov 0.0  }
 0x42d   :  { %vm2034_vm13 = vcmp.eq.f32.partialorder %v4949_v54, inf  ;;  %v2037_v0 = vand.u32 2147483648, %v4949_v54  ;;  %vm2036_vm14 = vcmp.eq.f32.partialorder %v4949_v54, 0.0  ;;  %v2078_v34 = vadd.f32 %v2076_v58, %v4949_v54 }
 0x42e   :  { %v4324_v3 = vsel %vm2009_vm5, %v2007_v15, %v1943_v56 }
 0x42f   :  { %2337 = vrsqrt.f32 %v4324_v3  ;;  %2109 = vst.msk [vmem:[%s4386_s6] sm:$0xff] %vm2094_vm6, %v4324_v3  ;;  %vm2016_vm9 = vcmp.eq.f32.partialorder %v4324_v3, inf  ;;  %v2019_v33 = vand.u32 2147483648, %v4324_v3  ;;  %vm2018_vm11 = vcmp.eq.f32.partialorder %v4324_v3, 0.0 }
 0x430   :  { %2339 = vrsqrt.f32 %v4949_v54  ;;  %vm2050_vm4 = vcmp.gt.f32.partialorder %v4324_v3, 0.0 }
 0x431   :  { %2341 = vrcp.f32 %v2354_v57 }
 0x437   :  { %v2332_v52 = vpop.eup %2331 }
 0x438   :  { %v2022_v40 = vmul.f32 %v2332_v52, %v4304_v30  ;;  %v2334_v35 = vpop.eup %2333 }
 0x439   :  { %v2336_v59 = vpop.eup %2335  ;;  %v2040_v26 = vmul.f32 %v2334_v35, %v4948_v31 }
 0x43a   :  { %v2024_v5 = vsel %vm2023_vm7, %v4304_v30, %v2022_v40  ;;  %vm2052_vm7 = vcmp.gt.f32.partialorder %v2030_v49, 0.1 }
 0x43b   :  { %v2027_v18 = vsel %vm2025_vm8, %v2026_v20, %v2024_v5  ;;  %v2042_v21 = vsel %vm2041_vm10, %v4948_v31, %v2040_v26  ;;  %vm2054_vm8 = vmand %vm2052_vm7, %vm2050_vm4  ;;  %vm2104_vm10 = vcmask 7168  }
 0x43c   :  { %v2338_v42 = vpop.eup %2337  ;;  %v2065_v63 = vmax.f32 %v2027_v18, 1.5  ;;  %v2045_v43 = vsel %vm2043_vm12, %v2044_v48, %v2042_v21 }
 0x43d   :  { %v2015_v2 = vmul.f32 %v2338_v42, %v4324_v3  ;;  %v2340_v4 = vpop.eup %2339  ;;  %v2047_v19 = vsub.f32 %v2045_v43, %v2027_v18 }
 0x43e   :  { %v2069_v29 = vmul.f32 %v2336_v59, %v2065_v63  ;;  %v2081_v61 = vmul.f32 2.0, %v2065_v63  ;;  %v2342_v22 = vpop.eup %2341  ;;  %v2033_v6 = vmul.f32 %v2340_v4, %v4949_v54 }
 0x43f   :  { %v2017_v55 = vsel %vm2016_vm9, %v4324_v3, %v2015_v2  ;;  %v2049_v10 = vand.u32 2147483647, %v2047_v19 }
 0x440   :  { %v2071_v13 = vadd.f32 1e-08, %v2069_v29  ;;  %v2083_v39 = vmul.f32 %v2081_v61, %v2065_v63  ;;  %v2020_v24 = vsel %vm2018_vm11, %v2019_v33, %v2017_v55  ;;  %v2035_v51 = vsel %vm2034_vm13, %v4949_v54, %v2033_v6 }
 0x441   :  { %v2064_v1 = vmax.f32 %v2020_v24, 1.5  ;;  %v2038_v28 = vsel %vm2036_vm14, %v2037_v0, %v2035_v51  ;;  %vm2057_vm0 = vcmp.gt.f32.partialorder %v2049_v10, 0.1 }
 0x442   :  { %2343 = vlog2.f32 %v2071_v13  ;;  %v2046_v27 = vsub.f32 %v2038_v28, %v2020_v24  ;;  %vm2059_vm3 = vmand %vm2055_vm2, %vm2057_vm0 }
 0x443   :  { %2345 = vrcp.f32 %v2083_v39  ;;  %v2067_v44 = vmul.f32 %v2342_v22, %v2064_v1  ;;  %v2080_v32 = vmul.f32 2.0, %v2064_v1  ;;  %v2140_v38 = vsel %vm2059_vm3, 1.0, %v4950_v17 }
 0x444   :  { %v2048_v11 = vand.u32 2147483647, %v2046_v27 }
 0x445   :  { %v2070_v14 = vadd.f32 1e-08, %v2067_v44  ;;  %v2082_v16 = vmul.f32 %v2080_v32, %v2064_v1 }
 0x446   :  { %vm2056_vm5 = vcmp.gt.f32.partialorder %v2048_v11, 0.1 }
 0x447   :  { %2347 = vlog2.f32 %v2070_v14  ;;  %vm2058_vm9 = vmand %vm2054_vm8, %vm2056_vm5 }
 0x448   :  { %2349 = vrcp.f32 %v2082_v16  ;;  %v2139_v54 = vsel %vm2058_vm9, 1.0, %v4950_v17 }
 0x44f   :  { %v2344_v45 = vpop.eup %2343 }
 0x450   :  { %v2346_v46 = vpop.eup %2345  ;;  %v2075_v41 = vmul.f32 0.6931472, %v2344_v45 }
 0x451   :  { %v2087_v47 = vmul.f32 %v2346_v46, %v2079_v62 }
 0x453   :  { %v2089_v7 = vadd.f32 %v2087_v47, %v2075_v41 }
 0x454   :  { %v2348_v25 = vpop.eup %2347 }
 0x455   :  { %v2350_v23 = vpop.eup %2349  ;;  %v2142_v36 = vadd.f32 -0.5, %v2089_v7  ;;  %v2073_v30 = vmul.f32 0.6931472, %v2348_v25 }
 0x456   :  { %v2085_v15 = vmul.f32 %v2350_v23, %v2078_v34 }
 0x457   :  { %v2093_v56 = vmul.f32 %v2142_v36, %v2140_v38 }
 0x458   :  { %v2088_v31 = vadd.f32 %v2085_v15, %v2073_v30 }
 0x459   :  { %v2098_v8 = vsel %vm2094_vm6, %v2093_v56, 0.0 }
 0x45a   :  { %2099 = vadd.xlane.f32.xlu0 %v2098_v8  ;;  %v2141_v57 = vadd.f32 -0.5, %v2088_v31 }
 0x45c   :  { %v2092_v52 = vmul.f32 %v2141_v57, %v2139_v54 }
 0x45e   :  { %v2095_v3 = vsel %vm2094_vm6, %v2092_v52, 0.0 }
 0x45f   :  { %2096 = vadd.xlane.f32.xlu1 %v2095_v3 }
 0x4e3   :  { %v2100_v40 = vpop.xlane.xlu0 %2099 }
 0x4e4   :  { %v2103_v20 = vmul.f32 0.125, %v2100_v40 }
 0x4e6   :  { %2106 = vst.msk [vmem:[%s4387_s4 + $0x8] sm:$0xff] %vm2104_vm10, %v2103_v20 }
 0x4e8   :  { %v2097_v35 = vpop.xlane.xlu1 %2096 }
 0x4e9   :  { %v2102_v5 = vmul.f32 0.125, %v2097_v35 }
 0x4eb   :  { %2105 = vst.msk [vmem:[%s4387_s4] sm:$0xff] %vm2104_vm10, %v2102_v5 }

</bundles_post_ra>
